<compile_context>
chip_gen: v5e
topology: v5e:2x2
jax: 0.10.0
libtpu: 0.0.40
codegen_flags: <defaults>
</compile_context>

<pallas_src>
import jax
import jax.numpy as jnp
from jax.experimental import pallas as pl
from jax.experimental.pallas import tpu as pltpu

EPS = 1e-5


def fold_bn(w, b, gamma, beta, mean, var, eps=EPS):
    """Fold eval-mode BatchNorm1d into the preceding (Cin,Cout) weight + bias."""
    s = gamma / jnp.sqrt(var + eps)
    wf = w * s[None, :]
    bf = (b - mean) * s + beta
    return wf, bf.reshape(1, -1)


# ---------------------------------------------------------------------------
# Kernel 1: per-(batch, point-tile) pointwise MLP (3 x Conv1d(k=1) as bf16
# matmuls with f32 accumulation, static ReLU flags) with a running max over
# points held in a VMEM scratch accumulator.
# ---------------------------------------------------------------------------
def pointwise_mlp_max(x_bnc, w1, b1, w2, b2, w3, b3, relu_flags, *, tile_n=512):
    """3x pointwise conv (+ optional ReLU each) then max over points.

    x_bnc: (B, N, Cin) bf16
    w1:    (G, Cin, C1) bf16 with G in {1, B}; G == B when the 3x3 input
           transform has been folded into the first conv weight.
    w2,w3: (Cin_l, Cout_l) bf16.   b1,b2,b3: (1, Cout_l) f32.
    Returns (B, C3) f32  ==  torch.max(conv_stack(x), dim=points).
    """
    B, N, Cin = x_bnc.shape
    G, _, C1 = w1.shape
    C2 = w2.shape[1]
    C3 = w3.shape[1]

    if N <= tile_n:
        tn = N                      # one tile covering the whole points axis
    else:
        tn = tile_n                 # multiple of 8 (use >=256/512 in production)
        pad = (-N) % tn
        if pad:
            # Edge-replicate the last point: the running max is unaffected, and
            # this is safe even for the ReLU-less final layer (values can be <0,
            # so zero padding would NOT be safe).
            x_bnc = jnp.concatenate(
                [x_bnc, jnp.broadcast_to(x_bnc[:, -1:, :], (B, pad, Cin))],
                axis=1)
    Np = x_bnc.shape[1]
    n_tiles = Np // tn

    def kernel(x_ref, w1_ref, b1_ref, w2_ref, b2_ref, w3_ref, b3_ref,
               out_ref, acc_ref):
        n = pl.program_id(1)

        @pl.when(n == 0)
        def _init():
            acc_ref[...] = jnp.full_like(acc_ref, -jnp.inf)

        x = x_ref[0]                                            # (tn, Cin) bf16
        h = jnp.dot(x, w1_ref[0],
                    preferred_element_type=jnp.float32) + b1_ref[...]
        if relu_flags[0]:
            h = jnp.maximum(h, 0.0)
        h = jnp.dot(h.astype(jnp.bfloat16), w2_ref[...],
                    preferred_element_type=jnp.float32) + b2_ref[...]
        if relu_flags[1]:
            h = jnp.maximum(h, 0.0)
        h = jnp.dot(h.astype(jnp.bfloat16), w3_ref[...],
                    preferred_element_type=jnp.float32) + b3_ref[...]
        if relu_flags[2]:
            h = jnp.maximum(h, 0.0)

        # running max over this point tile
        acc_ref[...] = jnp.maximum(acc_ref[...],
                                   jnp.max(h, axis=0, keepdims=True))

        @pl.when(n == pl.num_programs(1) - 1)
        def _finalize():
            out_ref[0] = acc_ref[...]

    w1_map = (lambda b, n: (b, 0, 0)) if G > 1 else (lambda b, n: (0, 0, 0))

    grid_spec = pltpu.PrefetchScalarGridSpec(
        num_scalar_prefetch=0,
        grid=(B, n_tiles),
        in_specs=[
            pl.BlockSpec((1, tn, Cin), lambda b, n: (b, n, 0)),   # pipelined x
            pl.BlockSpec((1, Cin, C1), w1_map),                   # per-batch or shared
            pl.BlockSpec((1, C1), lambda b, n: (0, 0)),
            pl.BlockSpec(w2.shape, lambda b, n: (0, 0)),
            pl.BlockSpec((1, C2), lambda b, n: (0, 0)),
            pl.BlockSpec(w3.shape, lambda b, n: (0, 0)),
            pl.BlockSpec((1, C3), lambda b, n: (0, 0)),
        ],
        out_specs=pl.BlockSpec((1, 1, C3), lambda b, n: (b, 0, 0)),
        scratch_shapes=[pltpu.VMEM((1, C3), jnp.float32)],
    )

    flops = 2 * B * Np * (Cin * C1 + C1 * C2 + C2 * C3)
    bytes_accessed = (x_bnc.size * x_bnc.dtype.itemsize
                      + (w1.size + w2.size + w3.size) * 2
                      + (b1.size + b2.size + b3.size) * 4
                      + B * C3 * 4)

    out = pl.pallas_call(
        kernel,
        out_shape=jax.ShapeDtypeStruct((B, 1, C3), jnp.float32),
        grid_spec=grid_spec,
        compiler_params=pltpu.CompilerParams(
            dimension_semantics=("parallel", "arbitrary"),
            vmem_limit_bytes=32 * 1024 * 1024),
        cost_estimate=pl.CostEstimate(
            flops=flops, transcendentals=0, bytes_accessed=bytes_accessed),
    )(x_bnc, w1, b1, w2, b2, w3, b3)
    return out.reshape(B, C3)


# ---------------------------------------------------------------------------
# Kernel 2: STN3d fc stack: Linear->BN->ReLU, Linear->BN->ReLU, Linear.
# (BN pre-folded; tiny — single block, batch padded to 8-sublane granularity.)
# ---------------------------------------------------------------------------
def fc_stack(x_bc, layers):
    B, _ = x_bc.shape
    (w1, b1), (w2, b2), (w3, b3) = layers
    Cout = w3.shape[1]

    Bp = ((B + 7) // 8) * 8
    if Bp != B:
        x_bc = jnp.pad(x_bc, ((0, Bp - B), (0, 0)))

    def kernel(x_ref, w1_ref, b1_ref, w2_ref, b2_ref, w3_ref, b3_ref, out_ref):
        h = jnp.dot(x_ref[...], w1_ref[...],
                    preferred_element_type=jnp.float32) + b1_ref[...]
        h = jnp.maximum(h, 0.0)
        h = jnp.dot(h, w2_ref[...],
                    preferred_element_type=jnp.float32) + b2_ref[...]
        h = jnp.maximum(h, 0.0)
        out_ref[...] = jnp.dot(h, w3_ref[...],
                               preferred_element_type=jnp.float32) + b3_ref[...]

    out = pl.pallas_call(
        kernel,
        out_shape=jax.ShapeDtypeStruct((Bp, Cout), jnp.float32),
    )(x_bc, w1, b1, w2, b2, w3, b3)
    return out[:B]


# ---------------------------------------------------------------------------
# Parameter init (deterministic, synthetic) + BN folding.
# Conv weights stored bf16 (MXU inputs), biases f32; fc stack stays f32.
# ---------------------------------------------------------------------------
def init_params(key):
    ks = iter(jax.random.split(key, 100))

    def dense(cin, cout):
        w = jax.random.normal(next(ks), (cin, cout), jnp.float32) / jnp.sqrt(cin)
        b = 0.05 * jax.random.normal(next(ks), (cout,), jnp.float32)
        return w, b

    def bn(c):
        gamma = 1.0 + 0.1 * jax.random.normal(next(ks), (c,), jnp.float32)
        beta = 0.1 * jax.random.normal(next(ks), (c,), jnp.float32)
        mean = 0.1 * jax.random.normal(next(ks), (c,), jnp.float32)
        var = 1.0 + jax.random.uniform(next(ks), (c,), jnp.float32)
        return gamma, beta, mean, var

    def conv_bn(cin, cout):
        w, b = dense(cin, cout)
        wf, bf = fold_bn(w, b, *bn(cout))
        return wf.astype(jnp.bfloat16), bf          # bf16 weight, f32 bias

    def fc_bn(cin, cout):
        w, b = dense(cin, cout)
        return fold_bn(w, b, *bn(cout))             # f32 (tiny fc stack)

    w_fc3, b_fc3 = dense(256, 9)                    # last STN fc has no BN
    return {
        # STN3d convs: Conv(3,64)+BN+ReLU, Conv(64,128)+BN+ReLU, Conv(128,1024)+BN+ReLU
        "stn_convs": [conv_bn(3, 64), conv_bn(64, 128), conv_bn(128, 1024)],
        # STN3d fcs: Lin(1024,512)+BN+ReLU, Lin(512,256)+BN+ReLU, Lin(256,9)
        "stn_fcs": [fc_bn(1024, 512), fc_bn(512, 256), (w_fc3, b_fc3.reshape(1, -1))],
        # Main branch: Conv(3,64)+BN0, Conv(64,128)+BN1, Conv(128,1024)+BN2
        "main_convs": [conv_bn(3, 64), conv_bn(64, 128), conv_bn(128, 1024)],
    }


# ---------------------------------------------------------------------------
# Forward pass == PointNetfeat.forward (global_feat=True, feature_transform=False)
# ---------------------------------------------------------------------------
def pointnetfeat_forward(x_ncw, params, tile_n=512):
    B = x_ncw.shape[0]
    x_bnc = jnp.transpose(x_ncw, (0, 2, 1)).astype(jnp.float32)   # (B, N, 3)
    x_bf16 = x_bnc.astype(jnp.bfloat16)            # shared by STN + main branch

    # --- STN3d: conv stack + max over points, then fc stack, + identity ---
    (w1, b1), (w2, b2), (w3, b3) = params["stn_convs"]
    stn_feat = pointwise_mlp_max(x_bf16, w1[None], b1, w2, b2, w3, b3,
                                 (True, True, True), tile_n=tile_n)
    stn_out = fc_stack(stn_feat, params["stn_fcs"])                # (B, 9)
    trans = (stn_out + jnp.eye(3, dtype=jnp.float32).reshape(1, 9)).reshape(B, 3, 3)

    # --- main branch, skip_branch=1:
    # applied layers: Conv0,BN0,ReLU, Conv1, BN1,ReLU, Conv2,BN2 -> max over pts.
    # torch.bmm(trans^T, x)  ==  x_bnc @ trans, folded into the first conv:
    #   x @ trans @ W1  ==  x @ (trans @ W1)  == x @ W1_eff   (host-side fold)
    (m1, c1), (m2, c2), (m3, c3) = params["main_convs"]
    w1_eff = jnp.einsum("bij,jk->bik", trans, m1.astype(jnp.float32),
                        precision=jax.lax.Precision.HIGHEST).astype(jnp.bfloat16)
    feat = pointwise_mlp_max(x_bf16, w1_eff, c1, m2, c2, m3, c3,
                             (True, True, False), tile_n=tile_n)   # (B, 1024)

    trans_feat = None   # feature_transform=False
    return feat, trans, trans_feat


# ---------------------------------------------------------------------------
# Pure-JAX reference mirroring the kernel numerics (bf16 inputs, f32 accumulate)
# for the numerical sanity check.
# ---------------------------------------------------------------------------
def reference_forward(x_ncw, params):
    hp = jax.lax.Precision.HIGHEST
    B = x_ncw.shape[0]
    x = jnp.transpose(x_ncw, (0, 2, 1)).astype(jnp.bfloat16)

    def mlp_max(xb, w1, b1, w2, b2, w3, b3, relus):
        w1b = jnp.broadcast_to(w1, (xb.shape[0],) + w1.shape[1:])
        h = jnp.einsum("bnc,bcd->bnd", xb, w1b,
                       preferred_element_type=jnp.float32) + b1
        if relus[0]:
            h = jnp.maximum(h, 0.0)
        h = jnp.einsum("bnc,cd->bnd", h.astype(jnp.bfloat16), w2,
                       preferred_element_type=jnp.float32) + b2
        if relus[1]:
            h = jnp.maximum(h, 0.0)
        h = jnp.einsum("bnc,cd->bnd", h.astype(jnp.bfloat16), w3,
                       preferred_element_type=jnp.float32) + b3
        if relus[2]:
            h = jnp.maximum(h, 0.0)
        return jnp.max(h, axis=1)

    (w1, b1), (w2, b2), (w3, b3) = params["stn_convs"]
    h = mlp_max(x, w1[None], b1, w2, b2, w3, b3, (True, True, True))
    for i, (w, b) in enumerate(params["stn_fcs"]):
        h = jnp.dot(h, w, precision=hp) + b
        if i < 2:
            h = jnp.maximum(h, 0.0)
    trans = (h + jnp.eye(3, dtype=jnp.float32).reshape(1, 9)).reshape(B, 3, 3)

    (m1, c1), (m2, c2), (m3, c3) = params["main_convs"]
    w1_eff = jnp.einsum("bij,jk->bik", trans, m1.astype(jnp.float32),
                        precision=hp).astype(jnp.bfloat16)
    feat = mlp_max(x, w1_eff, c1, m2, c2, m3, c3, (True, True, False))
    return feat, trans


if __name__ == "__main__":
    key = jax.random.PRNGKey(0)
    kx, kp = jax.random.split(key)
    B, C, N = 2, 3, 200                        # PyTorch NCW: (batch, 3, n_pts)
    x = jax.random.normal(kx, (B, C, N), jnp.float32)
    params = init_params(kp)

    fwd = jax.jit(pointnetfeat_forward, static_argnames=("tile_n",))
    # Small tile so the test exercises the tiled / running-max / ragged-tail
    # path (production default tile_n=512 keeps the (TN,1024) f32 intermediate
    # at ~2 MiB, safe for v7x's 64 MiB VMEM and multiple of 256 for the MXU).
    feat, trans, trans_feat = fwd(x, params, tile_n=64)
    jax.block_until_ready((feat, trans))

    ref_feat, ref_trans = reference_forward(x, params)
    assert feat.shape == (B, 1024) and trans.shape == (B, 3, 3) and trans_feat is None
    assert bool(jnp.allclose(trans, ref_trans, rtol=2e-2, atol=2e-2)), "trans mismatch"
    assert bool(jnp.allclose(feat, ref_feat, rtol=2e-2, atol=2e-2)), "feat mismatch"
    print("KERNEL_OK")
</pallas_src>

<mosaic_0001>
module attributes {stable_mosaic.version = 11 : i64} {
  func.func @kernel(%arg0: i32, %arg1: i32, %arg2: memref<1x64x3xbf16, #tpu.memory_space<vmem>>, %arg3: memref<1x3x64xbf16, #tpu.memory_space<vmem>>, %arg4: memref<1x64xf32, #tpu.memory_space<vmem>>, %arg5: memref<64x128xbf16, #tpu.memory_space<vmem>>, %arg6: memref<1x128xf32, #tpu.memory_space<vmem>>, %arg7: memref<128x1024xbf16, #tpu.memory_space<vmem>>, %arg8: memref<1x1024xf32, #tpu.memory_space<vmem>>, %arg9: memref<1x1x1024xf32, #tpu.memory_space<vmem>>, %arg10: memref<1x1024xf32, #tpu.memory_space<vmem>>) attributes {dimension_semantics = [#tpu.dimension_semantics<parallel>, #tpu.dimension_semantics<arbitrary>], iteration_bounds = array<i64: 2, 4>, scalar_prefetch = 0 : i64, scratch_operands = 1 : i64, tpu.core_type = #tpu.core_type<tc>, window_params = [{transform_indices = @transform_0, window_bounds = array<i64: 1, 64, 3>}, {pipeline_mode = #tpu.pipeline_mode<synchronous>, transform_indices = @transform_1, window_bounds = array<i64: 1, 3, 64>}, {pipeline_mode = #tpu.pipeline_mode<synchronous>, transform_indices = @transform_2, window_bounds = array<i64: 1, 64>}, {pipeline_mode = #tpu.pipeline_mode<synchronous>, transform_indices = @transform_3, window_bounds = array<i64: 64, 128>}, {pipeline_mode = #tpu.pipeline_mode<synchronous>, transform_indices = @transform_4, window_bounds = array<i64: 1, 128>}, {pipeline_mode = #tpu.pipeline_mode<synchronous>, transform_indices = @transform_5, window_bounds = array<i64: 128, 1024>}, {pipeline_mode = #tpu.pipeline_mode<synchronous>, transform_indices = @transform_6, window_bounds = array<i64: 1, 1024>}, {transform_indices = @transform_7, window_bounds = array<i64: 1, 1, 1024>}]} {
    %c0_i32 = arith.constant 0 : i32
    %0 = arith.cmpi eq, %arg1, %c0_i32 : i32
    %1 = arith.extui %0 : i1 to i32
    %c0_i32_0 = arith.constant 0 : i32
    %2 = arith.cmpi ne, %1, %c0_i32_0 : i32
    scf.if %2 {
      %cst_27 = arith.constant 0xFF800000 : f32
      %37 = vector.broadcast %cst_27 : f32 to vector<1x1024xf32>
      %c0_28 = arith.constant 0 : index
      %c0_29 = arith.constant 0 : index
      %38 = vector.load %arg10[%c0_28, %c0_29] : memref<1x1024xf32, #tpu.memory_space<vmem>>, vector<1x1024xf32>
      tpu.vector_store %arg10[%c0_28, %c0_29], %37 {strides = array<i32>} : memref<1x1024xf32, #tpu.memory_space<vmem>>, vector<1x1024xf32>,
    } else {
    }
    %c0 = arith.constant 0 : index
    %c0_1 = arith.constant 0 : index
    %c0_2 = arith.constant 0 : index
    %3 = vector.load %arg2[%c0, %c0_1, %c0_2] : memref<1x64x3xbf16, #tpu.memory_space<vmem>>, vector<1x64x3xbf16>
    %4 = vector.shape_cast %3 : vector<1x64x3xbf16> to vector<64x3xbf16>
    %c0_3 = arith.constant 0 : index
    %c0_4 = arith.constant 0 : index
    %c0_5 = arith.constant 0 : index
    %5 = vector.load %arg3[%c0_3, %c0_4, %c0_5] : memref<1x3x64xbf16, #tpu.memory_space<vmem>>, vector<1x3x64xbf16>
    %6 = vector.shape_cast %5 : vector<1x3x64xbf16> to vector<3x64xbf16>
    %cst = arith.constant dense<0.000000e+00> : vector<64x64xf32>
    %7 = tpu.matmul %4, %6, %cst {dimension_numbers = #tpu.dot_dimension_numbers<[1], [0], [0], [1], [0, 0, 1, 1], [], []>} : vector<64x3xbf16>, vector<3x64xbf16>, vector<64x64xf32> -> vector<64x64xf32>
    %c0_6 = arith.constant 0 : index
    %c0_7 = arith.constant 0 : index
    %8 = vector.load %arg4[%c0_6, %c0_7] : memref<1x64xf32, #tpu.memory_space<vmem>>, vector<1x64xf32>
    %9 = vector.broadcast %8 : vector<1x64xf32> to vector<64x64xf32>
    %10 = arith.addf %7, %9 : vector<64x64xf32>
    %cst_8 = arith.constant 0.000000e+00 : f32
    %11 = vector.broadcast %cst_8 : f32 to vector<64x64xf32>
    %12 = arith.maximumf %10, %11 : vector<64x64xf32>
    %13 = arith.truncf %12 : vector<64x64xf32> to vector<64x64xbf16>
    %c0_9 = arith.constant 0 : index
    %c0_10 = arith.constant 0 : index
    %14 = vector.load %arg5[%c0_9, %c0_10] : memref<64x128xbf16, #tpu.memory_space<vmem>>, vector<64x128xbf16>
    %cst_11 = arith.constant dense<0.000000e+00> : vector<64x128xf32>
    %15 = tpu.matmul %13, %14, %cst_11 {dimension_numbers = #tpu.dot_dimension_numbers<[1], [0], [0], [1], [0, 0, 1, 1], [], []>} : vector<64x64xbf16>, vector<64x128xbf16>, vector<64x128xf32> -> vector<64x128xf32>
    %c0_12 = arith.constant 0 : index
    %c0_13 = arith.constant 0 : index
    %16 = vector.load %arg6[%c0_12, %c0_13] : memref<1x128xf32, #tpu.memory_space<vmem>>, vector<1x128xf32>
    %17 = vector.broadcast %16 : vector<1x128xf32> to vector<64x128xf32>
    %18 = arith.addf %15, %17 : vector<64x128xf32>
    %cst_14 = arith.constant 0.000000e+00 : f32
    %19 = vector.broadcast %cst_14 : f32 to vector<64x128xf32>
    %20 = arith.maximumf %18, %19 : vector<64x128xf32>
    %21 = arith.truncf %20 : vector<64x128xf32> to vector<64x128xbf16>
    %c0_15 = arith.constant 0 : index
    %c0_16 = arith.constant 0 : index
    %22 = vector.load %arg7[%c0_15, %c0_16] : memref<128x1024xbf16, #tpu.memory_space<vmem>>, vector<128x1024xbf16>
    %cst_17 = arith.constant dense<0.000000e+00> : vector<64x1024xf32>
    %23 = tpu.matmul %21, %22, %cst_17 {dimension_numbers = #tpu.dot_dimension_numbers<[1], [0], [0], [1], [0, 0, 1, 1], [], []>} : vector<64x128xbf16>, vector<128x1024xbf16>, vector<64x1024xf32> -> vector<64x1024xf32>
    %c0_18 = arith.constant 0 : index
    %c0_19 = arith.constant 0 : index
    %24 = vector.load %arg8[%c0_18, %c0_19] : memref<1x1024xf32, #tpu.memory_space<vmem>>, vector<1x1024xf32>
    %25 = vector.broadcast %24 : vector<1x1024xf32> to vector<64x1024xf32>
    %26 = arith.addf %23, %25 : vector<64x1024xf32>
    %cst_20 = arith.constant 0.000000e+00 : f32
    %27 = vector.broadcast %cst_20 : f32 to vector<64x1024xf32>
    %28 = arith.maximumf %26, %27 : vector<64x1024xf32>
    %c0_21 = arith.constant 0 : index
    %c0_22 = arith.constant 0 : index
    %29 = vector.load %arg10[%c0_21, %c0_22] : memref<1x1024xf32, #tpu.memory_space<vmem>>, vector<1x1024xf32>
    %cst_23 = arith.constant dense<0xFF800000> : vector<1024xf32>
    %30 = vector.multi_reduction <maximumf>, %28, %cst_23 [0] : vector<64x1024xf32> to vector<1024xf32>
    %31 = vector.shape_cast %30 : vector<1024xf32> to vector<1x1024xf32>
    %32 = arith.maximumf %29, %31 : vector<1x1024xf32>
    %c0_24 = arith.constant 0 : index
    %c0_25 = arith.constant 0 : index
    %33 = vector.load %arg10[%c0_24, %c0_25] : memref<1x1024xf32, #tpu.memory_space<vmem>>, vector<1x1024xf32>
    tpu.vector_store %arg10[%c0_24, %c0_25], %32 {strides = array<i32>} : memref<1x1024xf32, #tpu.memory_space<vmem>>, vector<1x1024xf32>,
    %c3_i32 = arith.constant 3 : i32
    %34 = arith.cmpi eq, %arg1, %c3_i32 : i32
    %35 = arith.extui %34 : i1 to i32
    %c0_i32_26 = arith.constant 0 : i32
    %36 = arith.cmpi ne, %35, %c0_i32_26 : i32
    scf.if %36 {
      %c0_27 = arith.constant 0 : index
      %c0_28 = arith.constant 0 : index
      %37 = vector.load %arg10[%c0_27, %c0_28] : memref<1x1024xf32, #tpu.memory_space<vmem>>, vector<1x1024xf32>
      %c0_29 = arith.constant 0 : index
      %c0_30 = arith.constant 0 : index
      %c0_31 = arith.constant 0 : index
      %38 = vector.load %arg9[%c0_29, %c0_30, %c0_31] : memref<1x1x1024xf32, #tpu.memory_space<vmem>>, vector<1x1x1024xf32>
      %39 = vector.shape_cast %38 : vector<1x1x1024xf32> to vector<1x1024xf32>
      %40 = vector.shape_cast %37 : vector<1x1024xf32> to vector<1x1x1024xf32>
      tpu.vector_store %arg9[%c0_29, %c0_30, %c0_31], %40 {strides = array<i32>} : memref<1x1x1024xf32, #tpu.memory_space<vmem>>, vector<1x1x1024xf32>,
    } else {
    }
    return
  }
  func.func @transform_0(%arg0: i32, %arg1: i32) -> (i32, i32, i32) {
    %c0_i32 = arith.constant 0 : i32
    %c0_i32_0 = arith.constant 0 : i32
    return %arg0, %arg1, %c0_i32 : i32, i32, i32
  }
  func.func @transform_1(%arg0: i32, %arg1: i32) -> (i32, i32, i32) {
    %c0_i32 = arith.constant 0 : i32
    %c0_i32_0 = arith.constant 0 : i32
    %c0_i32_1 = arith.constant 0 : i32
    %c0_i32_2 = arith.constant 0 : i32
    return %c0_i32, %c0_i32_0, %c0_i32_1 : i32, i32, i32
  }
  func.func @transform_2(%arg0: i32, %arg1: i32) -> (i32, i32) {
    %c0_i32 = arith.constant 0 : i32
    %c0_i32_0 = arith.constant 0 : i32
    %c0_i32_1 = arith.constant 0 : i32
    return %c0_i32, %c0_i32_0 : i32, i32
  }
  func.func @transform_3(%arg0: i32, %arg1: i32) -> (i32, i32) {
    %c0_i32 = arith.constant 0 : i32
    %c0_i32_0 = arith.constant 0 : i32
    %c0_i32_1 = arith.constant 0 : i32
    return %c0_i32, %c0_i32_0 : i32, i32
  }
  func.func @transform_4(%arg0: i32, %arg1: i32) -> (i32, i32) {
    %c0_i32 = arith.constant 0 : i32
    %c0_i32_0 = arith.constant 0 : i32
    %c0_i32_1 = arith.constant 0 : i32
    return %c0_i32, %c0_i32_0 : i32, i32
  }
  func.func @transform_5(%arg0: i32, %arg1: i32) -> (i32, i32) {
    %c0_i32 = arith.constant 0 : i32
    %c0_i32_0 = arith.constant 0 : i32
    %c0_i32_1 = arith.constant 0 : i32
    return %c0_i32, %c0_i32_0 : i32, i32
  }
  func.func @transform_6(%arg0: i32, %arg1: i32) -> (i32, i32) {
    %c0_i32 = arith.constant 0 : i32
    %c0_i32_0 = arith.constant 0 : i32
    %c0_i32_1 = arith.constant 0 : i32
    return %c0_i32, %c0_i32_0 : i32, i32
  }
  func.func @transform_7(%arg0: i32, %arg1: i32) -> (i32, i32, i32) {
    %c0_i32 = arith.constant 0 : i32
    %c0_i32_0 = arith.constant 0 : i32
    %c0_i32_1 = arith.constant 0 : i32
    return %arg0, %c0_i32, %c0_i32_0 : i32, i32, i32
  }
}

module attributes {stable_mosaic.version = 11 : i64} {
  func.func @kernel(%arg0: memref<8x1024xf32, #tpu.memory_space<vmem>>, %arg1: memref<1024x512xf32, #tpu.memory_space<vmem>>, %arg2: memref<1x512xf32, #tpu.memory_space<vmem>>, %arg3: memref<512x256xf32, #tpu.memory_space<vmem>>, %arg4: memref<1x256xf32, #tpu.memory_space<vmem>>, %arg5: memref<256x9xf32, #tpu.memory_space<vmem>>, %arg6: memref<1x9xf32, #tpu.memory_space<vmem>>, %arg7: memref<8x9xf32, #tpu.memory_space<vmem>>) attributes {dimension_semantics = [], scalar_prefetch = 0 : i64, scratch_operands = 0 : i64, tpu.core_type = #tpu.core_type<tc>} {
    %c0 = arith.constant 0 : index
    %c0_0 = arith.constant 0 : index
    %0 = vector.load %arg0[%c0, %c0_0] : memref<8x1024xf32, #tpu.memory_space<vmem>>, vector<8x1024xf32>
    %c0_1 = arith.constant 0 : index
    %c0_2 = arith.constant 0 : index
    %1 = vector.load %arg1[%c0_1, %c0_2] : memref<1024x512xf32, #tpu.memory_space<vmem>>, vector<1024x512xf32>
    %cst = arith.constant dense<0.000000e+00> : vector<8x512xf32>
    %2 = tpu.matmul %0, %1, %cst {dimension_numbers = #tpu.dot_dimension_numbers<[1], [0], [0], [1], [0, 0, 1, 1], [], []>} : vector<8x1024xf32>, vector<1024x512xf32>, vector<8x512xf32> -> vector<8x512xf32>
    %c0_3 = arith.constant 0 : index
    %c0_4 = arith.constant 0 : index
    %3 = vector.load %arg2[%c0_3, %c0_4] : memref<1x512xf32, #tpu.memory_space<vmem>>, vector<1x512xf32>
    %4 = vector.broadcast %3 : vector<1x512xf32> to vector<8x512xf32>
    %5 = arith.addf %2, %4 : vector<8x512xf32>
    %cst_5 = arith.constant 0.000000e+00 : f32
    %6 = vector.broadcast %cst_5 : f32 to vector<8x512xf32>
    %7 = arith.maximumf %5, %6 : vector<8x512xf32>
    %c0_6 = arith.constant 0 : index
    %c0_7 = arith.constant 0 : index
    %8 = vector.load %arg3[%c0_6, %c0_7] : memref<512x256xf32, #tpu.memory_space<vmem>>, vector<512x256xf32>
    %cst_8 = arith.constant dense<0.000000e+00> : vector<8x256xf32>
    %9 = tpu.matmul %7, %8, %cst_8 {dimension_numbers = #tpu.dot_dimension_numbers<[1], [0], [0], [1], [0, 0, 1, 1], [], []>} : vector<8x512xf32>, vector<512x256xf32>, vector<8x256xf32> -> vector<8x256xf32>
    %c0_9 = arith.constant 0 : index
    %c0_10 = arith.constant 0 : index
    %10 = vector.load %arg4[%c0_9, %c0_10] : memref<1x256xf32, #tpu.memory_space<vmem>>, vector<1x256xf32>
    %11 = vector.broadcast %10 : vector<1x256xf32> to vector<8x256xf32>
    %12 = arith.addf %9, %11 : vector<8x256xf32>
    %cst_11 = arith.constant 0.000000e+00 : f32
    %13 = vector.broadcast %cst_11 : f32 to vector<8x256xf32>
    %14 = arith.maximumf %12, %13 : vector<8x256xf32>
    %c0_12 = arith.constant 0 : index
    %c0_13 = arith.constant 0 : index
    %15 = vector.load %arg5[%c0_12, %c0_13] : memref<256x9xf32, #tpu.memory_space<vmem>>, vector<256x9xf32>
    %cst_14 = arith.constant dense<0.000000e+00> : vector<8x9xf32>
    %16 = tpu.matmul %14, %15, %cst_14 {dimension_numbers = #tpu.dot_dimension_numbers<[1], [0], [0], [1], [0, 0, 1, 1], [], []>} : vector<8x256xf32>, vector<256x9xf32>, vector<8x9xf32> -> vector<8x9xf32>
    %c0_15 = arith.constant 0 : index
    %c0_16 = arith.constant 0 : index
    %17 = vector.load %arg6[%c0_15, %c0_16] : memref<1x9xf32, #tpu.memory_space<vmem>>, vector<1x9xf32>
    %18 = vector.broadcast %17 : vector<1x9xf32> to vector<8x9xf32>
    %19 = arith.addf %16, %18 : vector<8x9xf32>
    %c0_17 = arith.constant 0 : index
    %c0_18 = arith.constant 0 : index
    %20 = vector.load %arg7[%c0_17, %c0_18] : memref<8x9xf32, #tpu.memory_space<vmem>>, vector<8x9xf32>
    tpu.vector_store %arg7[%c0_17, %c0_18], %19 {strides = array<i32>} : memref<8x9xf32, #tpu.memory_space<vmem>>, vector<8x9xf32>,
    return
  }
}

module attributes {stable_mosaic.version = 11 : i64} {
  func.func @kernel(%arg0: i32, %arg1: i32, %arg2: memref<1x64x3xbf16, #tpu.memory_space<vmem>>, %arg3: memref<1x3x64xbf16, #tpu.memory_space<vmem>>, %arg4: memref<1x64xf32, #tpu.memory_space<vmem>>, %arg5: memref<64x128xbf16, #tpu.memory_space<vmem>>, %arg6: memref<1x128xf32, #tpu.memory_space<vmem>>, %arg7: memref<128x1024xbf16, #tpu.memory_space<vmem>>, %arg8: memref<1x1024xf32, #tpu.memory_space<vmem>>, %arg9: memref<1x1x1024xf32, #tpu.memory_space<vmem>>, %arg10: memref<1x1024xf32, #tpu.memory_space<vmem>>) attributes {dimension_semantics = [#tpu.dimension_semantics<parallel>, #tpu.dimension_semantics<arbitrary>], iteration_bounds = array<i64: 2, 4>, scalar_prefetch = 0 : i64, scratch_operands = 1 : i64, tpu.core_type = #tpu.core_type<tc>, window_params = [{transform_indices = @transform_0, window_bounds = array<i64: 1, 64, 3>}, {transform_indices = @transform_1, window_bounds = array<i64: 1, 3, 64>}, {pipeline_mode = #tpu.pipeline_mode<synchronous>, transform_indices = @transform_2, window_bounds = array<i64: 1, 64>}, {pipeline_mode = #tpu.pipeline_mode<synchronous>, transform_indices = @transform_3, window_bounds = array<i64: 64, 128>}, {pipeline_mode = #tpu.pipeline_mode<synchronous>, transform_indices = @transform_4, window_bounds = array<i64: 1, 128>}, {pipeline_mode = #tpu.pipeline_mode<synchronous>, transform_indices = @transform_5, window_bounds = array<i64: 128, 1024>}, {pipeline_mode = #tpu.pipeline_mode<synchronous>, transform_indices = @transform_6, window_bounds = array<i64: 1, 1024>}, {transform_indices = @transform_7, window_bounds = array<i64: 1, 1, 1024>}]} {
    %c0_i32 = arith.constant 0 : i32
    %0 = arith.cmpi eq, %arg1, %c0_i32 : i32
    %1 = arith.extui %0 : i1 to i32
    %c0_i32_0 = arith.constant 0 : i32
    %2 = arith.cmpi ne, %1, %c0_i32_0 : i32
    scf.if %2 {
      %cst_26 = arith.constant 0xFF800000 : f32
      %35 = vector.broadcast %cst_26 : f32 to vector<1x1024xf32>
      %c0_27 = arith.constant 0 : index
      %c0_28 = arith.constant 0 : index
      %36 = vector.load %arg10[%c0_27, %c0_28] : memref<1x1024xf32, #tpu.memory_space<vmem>>, vector<1x1024xf32>
      tpu.vector_store %arg10[%c0_27, %c0_28], %35 {strides = array<i32>} : memref<1x1024xf32, #tpu.memory_space<vmem>>, vector<1x1024xf32>,
    } else {
    }
    %c0 = arith.constant 0 : index
    %c0_1 = arith.constant 0 : index
    %c0_2 = arith.constant 0 : index
    %3 = vector.load %arg2[%c0, %c0_1, %c0_2] : memref<1x64x3xbf16, #tpu.memory_space<vmem>>, vector<1x64x3xbf16>
    %4 = vector.shape_cast %3 : vector<1x64x3xbf16> to vector<64x3xbf16>
    %c0_3 = arith.constant 0 : index
    %c0_4 = arith.constant 0 : index
    %c0_5 = arith.constant 0 : index
    %5 = vector.load %arg3[%c0_3, %c0_4, %c0_5] : memref<1x3x64xbf16, #tpu.memory_space<vmem>>, vector<1x3x64xbf16>
    %6 = vector.shape_cast %5 : vector<1x3x64xbf16> to vector<3x64xbf16>
    %cst = arith.constant dense<0.000000e+00> : vector<64x64xf32>
    %7 = tpu.matmul %4, %6, %cst {dimension_numbers = #tpu.dot_dimension_numbers<[1], [0], [0], [1], [0, 0, 1, 1], [], []>} : vector<64x3xbf16>, vector<3x64xbf16>, vector<64x64xf32> -> vector<64x64xf32>
    %c0_6 = arith.constant 0 : index
    %c0_7 = arith.constant 0 : index
    %8 = vector.load %arg4[%c0_6, %c0_7] : memref<1x64xf32, #tpu.memory_space<vmem>>, vector<1x64xf32>
    %9 = vector.broadcast %8 : vector<1x64xf32> to vector<64x64xf32>
    %10 = arith.addf %7, %9 : vector<64x64xf32>
    %cst_8 = arith.constant 0.000000e+00 : f32
    %11 = vector.broadcast %cst_8 : f32 to vector<64x64xf32>
    %12 = arith.maximumf %10, %11 : vector<64x64xf32>
    %13 = arith.truncf %12 : vector<64x64xf32> to vector<64x64xbf16>
    %c0_9 = arith.constant 0 : index
    %c0_10 = arith.constant 0 : index
    %14 = vector.load %arg5[%c0_9, %c0_10] : memref<64x128xbf16, #tpu.memory_space<vmem>>, vector<64x128xbf16>
    %cst_11 = arith.constant dense<0.000000e+00> : vector<64x128xf32>
    %15 = tpu.matmul %13, %14, %cst_11 {dimension_numbers = #tpu.dot_dimension_numbers<[1], [0], [0], [1], [0, 0, 1, 1], [], []>} : vector<64x64xbf16>, vector<64x128xbf16>, vector<64x128xf32> -> vector<64x128xf32>
    %c0_12 = arith.constant 0 : index
    %c0_13 = arith.constant 0 : index
    %16 = vector.load %arg6[%c0_12, %c0_13] : memref<1x128xf32, #tpu.memory_space<vmem>>, vector<1x128xf32>
    %17 = vector.broadcast %16 : vector<1x128xf32> to vector<64x128xf32>
    %18 = arith.addf %15, %17 : vector<64x128xf32>
    %cst_14 = arith.constant 0.000000e+00 : f32
    %19 = vector.broadcast %cst_14 : f32 to vector<64x128xf32>
    %20 = arith.maximumf %18, %19 : vector<64x128xf32>
    %21 = arith.truncf %20 : vector<64x128xf32> to vector<64x128xbf16>
    %c0_15 = arith.constant 0 : index
    %c0_16 = arith.constant 0 : index
    %22 = vector.load %arg7[%c0_15, %c0_16] : memref<128x1024xbf16, #tpu.memory_space<vmem>>, vector<128x1024xbf16>
    %cst_17 = arith.constant dense<0.000000e+00> : vector<64x1024xf32>
    %23 = tpu.matmul %21, %22, %cst_17 {dimension_numbers = #tpu.dot_dimension_numbers<[1], [0], [0], [1], [0, 0, 1, 1], [], []>} : vector<64x128xbf16>, vector<128x1024xbf16>, vector<64x1024xf32> -> vector<64x1024xf32>
    %c0_18 = arith.constant 0 : index
    %c0_19 = arith.constant 0 : index
    %24 = vector.load %arg8[%c0_18, %c0_19] : memref<1x1024xf32, #tpu.memory_space<vmem>>, vector<1x1024xf32>
    %25 = vector.broadcast %24 : vector<1x1024xf32> to vector<64x1024xf32>
    %26 = arith.addf %23, %25 : vector<64x1024xf32>
    %c0_20 = arith.constant 0 : index
    %c0_21 = arith.constant 0 : index
    %27 = vector.load %arg10[%c0_20, %c0_21] : memref<1x1024xf32, #tpu.memory_space<vmem>>, vector<1x1024xf32>
    %cst_22 = arith.constant dense<0xFF800000> : vector<1024xf32>
    %28 = vector.multi_reduction <maximumf>, %26, %cst_22 [0] : vector<64x1024xf32> to vector<1024xf32>
    %29 = vector.shape_cast %28 : vector<1024xf32> to vector<1x1024xf32>
    %30 = arith.maximumf %27, %29 : vector<1x1024xf32>
    %c0_23 = arith.constant 0 : index
    %c0_24 = arith.constant 0 : index
    %31 = vector.load %arg10[%c0_23, %c0_24] : memref<1x1024xf32, #tpu.memory_space<vmem>>, vector<1x1024xf32>
    tpu.vector_store %arg10[%c0_23, %c0_24], %30 {strides = array<i32>} : memref<1x1024xf32, #tpu.memory_space<vmem>>, vector<1x1024xf32>,
    %c3_i32 = arith.constant 3 : i32
    %32 = arith.cmpi eq, %arg1, %c3_i32 : i32
    %33 = arith.extui %32 : i1 to i32
    %c0_i32_25 = arith.constant 0 : i32
    %34 = arith.cmpi ne, %33, %c0_i32_25 : i32
    scf.if %34 {
      %c0_26 = arith.constant 0 : index
      %c0_27 = arith.constant 0 : index
      %35 = vector.load %arg10[%c0_26, %c0_27] : memref<1x1024xf32, #tpu.memory_space<vmem>>, vector<1x1024xf32>
      %c0_28 = arith.constant 0 : index
      %c0_29 = arith.constant 0 : index
      %c0_30 = arith.constant 0 : index
      %36 = vector.load %arg9[%c0_28, %c0_29, %c0_30] : memref<1x1x1024xf32, #tpu.memory_space<vmem>>, vector<1x1x1024xf32>
      %37 = vector.shape_cast %36 : vector<1x1x1024xf32> to vector<1x1024xf32>
      %38 = vector.shape_cast %35 : vector<1x1024xf32> to vector<1x1x1024xf32>
      tpu.vector_store %arg9[%c0_28, %c0_29, %c0_30], %38 {strides = array<i32>} : memref<1x1x1024xf32, #tpu.memory_space<vmem>>, vector<1x1x1024xf32>,
    } else {
    }
    return
  }
  func.func @transform_0(%arg0: i32, %arg1: i32) -> (i32, i32, i32) {
    %c0_i32 = arith.constant 0 : i32
    %c0_i32_0 = arith.constant 0 : i32
    return %arg0, %arg1, %c0_i32 : i32, i32, i32
  }
  func.func @transform_1(%arg0: i32, %arg1: i32) -> (i32, i32, i32) {
    %c0_i32 = arith.constant 0 : i32
    %c0_i32_0 = arith.constant 0 : i32
    %c0_i32_1 = arith.constant 0 : i32
    return %arg0, %c0_i32, %c0_i32_0 : i32, i32, i32
  }
  func.func @transform_2(%arg0: i32, %arg1: i32) -> (i32, i32) {
    %c0_i32 = arith.constant 0 : i32
    %c0_i32_0 = arith.constant 0 : i32
    %c0_i32_1 = arith.constant 0 : i32
    return %c0_i32, %c0_i32_0 : i32, i32
  }
  func.func @transform_3(%arg0: i32, %arg1: i32) -> (i32, i32) {
    %c0_i32 = arith.constant 0 : i32
    %c0_i32_0 = arith.constant 0 : i32
    %c0_i32_1 = arith.constant 0 : i32
    return %c0_i32, %c0_i32_0 : i32, i32
  }
  func.func @transform_4(%arg0: i32, %arg1: i32) -> (i32, i32) {
    %c0_i32 = arith.constant 0 : i32
    %c0_i32_0 = arith.constant 0 : i32
    %c0_i32_1 = arith.constant 0 : i32
    return %c0_i32, %c0_i32_0 : i32, i32
  }
  func.func @transform_5(%arg0: i32, %arg1: i32) -> (i32, i32) {
    %c0_i32 = arith.constant 0 : i32
    %c0_i32_0 = arith.constant 0 : i32
    %c0_i32_1 = arith.constant 0 : i32
    return %c0_i32, %c0_i32_0 : i32, i32
  }
  func.func @transform_6(%arg0: i32, %arg1: i32) -> (i32, i32) {
    %c0_i32 = arith.constant 0 : i32
    %c0_i32_0 = arith.constant 0 : i32
    %c0_i32_1 = arith.constant 0 : i32
    return %c0_i32, %c0_i32_0 : i32, i32
  }
  func.func @transform_7(%arg0: i32, %arg1: i32) -> (i32, i32, i32) {
    %c0_i32 = arith.constant 0 : i32
    %c0_i32_0 = arith.constant 0 : i32
    %c0_i32_1 = arith.constant 0 : i32
    return %arg0, %c0_i32, %c0_i32_0 : i32, i32, i32
  }
}

</mosaic_0001>

<bundles_post_ra>
// kernel: pointnetfeat_forward.3
= control target key start
LH: loop header
LB: loop body
LE: loop exit
PB: predicated region body
PF: predicated region fallthrough
CT: control target
= control target key end

     0   :  { %s2624_s0 = inlined_call_operand.vmem [shape: bf16[2,256,3], index: 0, kind: input, shape index: {}]   ;;  %s2625_s1 = inlined_call_operand.hbm [shape: bf16[1,3,64], index: 1, kind: input, shape index: {}]   ;;  %s2626_s2 = inlined_call_operand.hbm [shape: f32[1,64], index: 2, kind: input, shape index: {}]   ;;  %s2627_s3 = inlined_call_operand.hbm [shape: bf16[64,128], index: 3, kind: input, shape index: {}]   ;;  %s2628_s4 = inlined_call_operand.hbm [shape: f32[1,128], index: 4, kind: input, shape index: {}]   ;;  %s2629_s5 = inlined_call_operand.hbm [shape: bf16[128,1024], index: 5, kind: input, shape index: {}]   ;;  %s2630_s6 = inlined_call_operand.hbm [shape: f32[1,1024], index: 6, kind: input, shape index: {}]   ;;  %s2631_s7 = inlined_call_operand.vmem [shape: f32[2,1,1024], index: 7, kind: output, shape index: {}]  }
   0x1   :  { %2632 = sst [smem:[#allocation17_spill]] %s2625_s1 }
   0x2   :  { %12 = vsyncpa [#allocation4], 0 }
   0x3   :  { %13 = vsyncpa [#allocation6], 0 }
   0x4   :  { %14 = vsyncpa [#allocation9], 0 }
   0x5   :  { %15 = vsyncpa [#allocation12], 0  ;;  %s2352_s24 = smov 0   ;;  %s2354_s25 = smov 0  }
   0x6   :  { %s2356_s26 = smov 0   ;;  %s2358_s27 = smov 0  }
   0x7   :  { %s2360_s28 = smov 0  }
   0x8 LB: > { %s242_s8 = sshll.u32 %s2626_s2, 4  ;;  %s1557_s9 = sadd.s32 4294967295, %s2298_s28   ;;  %s2298_s28 = sphi %s2360_s28, %s21_s28   ;;  %s2294_s27 = sphi %s2358_s27, %s2640_s27   ;;  %s2290_s26 = sphi %s2356_s26, %s2639_s26   ;;  %s2286_s25 = sphi %s2354_s25, %s2638_s25   ;;  %s2282_s24 = sphi %s2352_s24, %s2637_s24   ;;  %s243_s8 = int_to_ptr.hbm [resolvable:$true] %s242_s8 }
   0x9   : > { %p1559_p0 = scmp.ge.s32.totalorder %s2298_s28, 1  ;;  %p218_p1 = scmp.lt.s32.totalorder %s2298_s28, 9 }
   0xa   : > { %p2383_p2 = scmp.eq.s32.totalorder %s1557_s9, 0  ;;  %s2300_s12 = smov [#allocation5]  }
   0xb   : > { %p2387_p3 = pnand %p1559_p0, %p218_p1  ;;  %s244_s13 = sshll.u32 %s2300_s12, 4  ;;  %s245_s13 = int_to_ptr.vmem [resolvable:$true] %s244_s13 }
   0xc   : > { %s268_s16 = sshll.u32 %s2628_s4, 4  ;;  %s2301_s18 = smov [#allocation8]   ;;  %s269_s16 = int_to_ptr.hbm [resolvable:$true] %s268_s16 }
   0xd   : > { %p1979_p4 = pneg %p2387_p3  ;;  %s270_s19 = sshll.u32 %s2301_s18, 4  ;;  %s271_s19 = int_to_ptr.vmem [resolvable:$true] %s270_s19 }
   0xe   : > { %s30_s20 = sadd.s32 1, %s2290_s26  ;;  %s33_s21 = sadd.s32 1, %s2294_s27 }
   0xf   : > { %p2398_p5 = pnand %p2383_p2, %p1979_p4  ;;  %p31_p6 = scmp.ge.s32.totalorder %s30_s20, 4 }
  0x10   : > { %s2636_s1 = sld [smem:[#allocation17_spill]]  ;;  %s2302_s30 = smov [#allocation3]  }
  0x11   : > { %1985 = dma.hbm_to_vmem [thread:$0]  (!%p2398_p5), %s243_s8, 16, %s245_s13, [#allocation6]  }
  0x12   : > { %1991 = dma.hbm_to_vmem [thread:$0]  (!%p2398_p5), %s269_s16, 16, %s271_s19, [#allocation9]  }
  0x13   : > { %s2642_s20 = smov (%p31_p6, %s30_s20), 0  ;;  %s2644_s21 = smov (!%p31_p6, %s33_s21), %s2294_s27 }
  0x14   : > { %s232_s9 = sshll.u32 %s2302_s30, 4  ;;  %p35_p7 = scmp.ge.s32.totalorder %s2644_s21, 2  ;;  %s233_s9 = int_to_ptr.vmem [resolvable:$true] %s232_s9 }
  0x15   : > { %s253_s13 = sshll.u32 %s2627_s3, 4  ;;  %s2303_s14 = smov [#allocation7]   ;;  %s254_s13 = int_to_ptr.hbm [resolvable:$true] %s253_s13 }
  0x16   : > { %s230_s29 = sshll.u32 %s2636_s1, 4  ;;  %s2646_s21 = smov (%p35_p7, %s2644_s21), 0  ;;  %s231_s29 = int_to_ptr.hbm [resolvable:$true] %s230_s29 }
  0x17   : > { %1982 = dma.hbm_to_vmem [thread:$0]  (!%p2398_p5), %s231_s29, 32, %s233_s9, [#allocation4]  }
  0x18   : > { %s255_s15 = sshll.u32 %s2303_s14, 4  ;;  %s279_s19 = sshll.u32 %s2629_s5, 4  ;;  %s256_s15 = int_to_ptr.vmem [resolvable:$true] %s255_s15  ;;  %s280_s19 = int_to_ptr.hbm [resolvable:$true] %s279_s19 }
  0x19   : > { %s2304_s22 = smov 64   ;;  %s2305_s23 = smov 4  }
  0x1a   : > { %1988 = dma.hbm_to_vmem [thread:$0]  (!%p2398_p5), %s254_s13, 512, %s256_s15, [#allocation6], %s2304_s22, %s2304_s22, %s2305_s23  }
  0x1b   : > { %s2306_s29 = smov [#allocation10]   ;;  %s2307_s9 = smov 512  }
  0x1c   : > { %s281_s30 = sshll.u32 %s2306_s29, 4  ;;  %s2308_s8 = smov 32   ;;  %s282_s30 = int_to_ptr.vmem [resolvable:$true] %s281_s30 }
  0x1d   : > { %1994 = dma.hbm_to_vmem [thread:$0]  (!%p2398_p5), %s280_s19, 8192, %s282_s30, [#allocation9], %s2307_s9, %s2307_s9, %s2308_s8  }
  0x1e   : > { %s294_s1 = sshll.u32 %s2630_s6, 4  ;;  %s2309_s16 = smov [#allocation11]   ;;  %s295_s1 = int_to_ptr.hbm [resolvable:$true] %s294_s1 }
  0x1f   : > { %s296_s18 = sshll.u32 %s2309_s16, 4  ;;  %322 = sbr.rel (%p2387_p3) target bundleno = 630 (0x276), region = 48  ;;  %s297_s18 = int_to_ptr.vmem [resolvable:$true] %s296_s18 }
  0x20   : > { %1997 = dma.hbm_to_vmem [thread:$0]  (!%p2398_p5), %s295_s1, 128, %s297_s18, [#allocation12]  }
  0x24   : > { %2265 = dma.done.wait (%p2383_p2), [#allocation4], 32  }
  0x25   : > { %2267 = vsyncadd (%p2383_p2), [#allocation4], 4294967264 }
  0x26   : > { %2269 = dma.done.wait (%p2383_p2), [#allocation6], 528  }
  0x27   : > { %2271 = vsyncadd (%p2383_p2), [#allocation6], 4294966768 }
  0x28   : > { %2273 = dma.done.wait (%p2383_p2), [#allocation9], 8208  }
  0x29   : > { %2275 = vsyncadd (%p2383_p2), [#allocation9], 4294959088 }
  0x2a   : > { %2277 = dma.done.wait (%p2383_p2), [#allocation12], 128  }
  0x2b   : > { %2279 = vsyncadd (%p2383_p2), [#allocation12], 4294967168  ;;  %s1574_s1 = sshll.u32 %s2282_s24, 3  ;;  %p384_p8 = scmp.lt.s32.totalorder %s2286_s25, 1 }
  0x2c   : > { %p386_p9 = scmp.lt.s32.totalorder %s1574_s1, 31  ;;  %p1578_p10 = scmp.ne.s32.totalorder %s2282_s24, 0 }
  0x2d   : > { %s2648_s25 = smov (!%p384_p8, %s2286_s25), 1 }
  0x2e   : > { %s2650_s1 = smov (!%p386_p9, %s1574_s1), 31  ;;  %s1575_s11 = sshll.u32 %s2648_s25, 5 }
  0x2f   : > { %s1577_s17 = sshll.u32 %s2648_s25, 3  ;;  %s389_s13 = sadd.s32 %s1575_s11, %s2650_s1 }
  0x30   : > { %s2457_s22 = scalar_lea.vmem %s2631_s7, %s1577_s17  ;;  %s1576_s23 = sshll.u32 %s389_s13, 2 }
  0x31   : > { %s391_s30 = scalar_lea.vmem %s2624_s0, %s1576_s23  ;;  %401 = sbr.rel (%p1578_p10) target bundleno = 56 (0x38), region = 76 }
  0x36   : > { %v2310_v0 = vmov -inf  }
  0x37   : > { %402 = vst [vmem:[#allocation2] sm:$0xff] %v2310_v0 }
  0x38 PF: > { %v411_v1 = vld [vmem:[#allocation3] sm:$0x3]  ;;  %vm449_vm0 = vcmask 1040384   ;;  %vm450_vm1 = vcmask 1041408   ;;  %v2311_v2 = vmov 65535   ;;  %v1878_v6 = vld [vmem:[%s391_s30] sm:$0xff] }
  0x39   : > { %v451_v3 = vsel %vm449_vm0, 4294967295, %v2311_v2  ;;  %v1880_v7 = vld [vmem:[%s391_s30 + $0x10] sm:$0xff]  ;;  %vm436_vm2 = vcmask 23552   ;;  %v1879_v8 = vld [vmem:[%s391_s30 + $0x8] sm:$0xff]  ;;  %v1881_v9 = vld [vmem:[%s391_s30 + $0x18] sm:$0xff]  ;;  %vm533_vm3 = vcmask 523264  }
  0x3a   : > { %v452_v4 = vsel %vm450_vm1, %v451_v3, 0  ;;  %v1885_v10 = vld [vmem:[#allocation7 + $0x18] sm:$0xff]  ;;  %v1884_v11 = vld [vmem:[#allocation7 + $0x10] sm:$0xff]  ;;  %v1883_v12 = vld [vmem:[#allocation7 + $0x8] sm:$0xff]  ;;  %vm1406_vm4 = vcmask 1042434   ;;  %vm1411_vm5 = vcmask 1046534  }
  0x3b   : > { %v454_v5 = vand.u32 %v452_v4, %v411_v1  ;;  %550 = vmatpush.bf16.msra.mxu1 %v1885_v10  ;;  %1951 = vmatpush.bf16.msra.mxu2 %v1885_v10  ;;  %v1882_v13 = vld [vmem:[#allocation7] sm:$0xff]  ;;  %v2465_v15 = vld [vmem:[#allocation5] ss:$0 sm:$0xff]  ;;  %v1853_v23 = vld [vmem:[#allocation10 + $0x1c8] sm:$0xf]  ;;  %vm1409_vm6 = vcmask 1044484  }
  0x3c   : > { %v1845_v17 = vld [vmem:[#allocation10 + $0x1c0] sm:$0xf]  ;;  %v1942_v19 = vld [vmem:[#allocation10 + $0x1c4] sm:$0xf]  ;;  %v1947_v24 = vld [vmem:[#allocation10 + $0x1e4] sm:$0xf0] }
  0x3d   : > { %463 = vmatpush.bf16.msra.mxu0 %v454_v5  ;;  %1950 = vmatpush.bf16.msra.mxu3 %v454_v5  ;;  %v1946_v18 = vld [vmem:[#allocation10 + $0x1dc] sm:$0xf0]  ;;  %v1847_v22 = vld [vmem:[#allocation10 + $0x1e0] sm:$0xf0]  ;;  %v1854_v27 = vor.u32 %v1947_v24, %v1853_v23  ;;  %v1943_v28 = vld [vmem:[#allocation10 + $0x1cc] sm:$0xf] }
  0x3e   : > { %v1846_v21 = vor.u32 %v1946_v18, %v1845_v17  ;;  %v1850_v26 = vor.u32 %v1942_v19, %v1847_v22  ;;  %v1855_v29 = vld [vmem:[#allocation10 + $0x1e8] sm:$0xf0]  ;;  %v1813_v30 = vld [vmem:[#allocation10 + $0x180] sm:$0xf]  ;;  %v1934_v34 = vld [vmem:[#allocation10 + $0x184] sm:$0xf] }
  0x3f   : > { %551 = vmatpush.bf16.msra.mxu1 %v1884_v11  ;;  %1952 = vmatpush.bf16.msra.mxu2 %v1884_v11  ;;  %v1858_v32 = vor.u32 %v1943_v28, %v1855_v29  ;;  %v1938_v33 = vld [vmem:[#allocation10 + $0x19c] sm:$0xf0]  ;;  %v1815_v35 = vld [vmem:[#allocation10 + $0x1a0] sm:$0xf0]  ;;  %v1821_v40 = vld [vmem:[#allocation10 + $0x188] sm:$0xf] }
  0x40   : > { %1595 = vmatmul.msk.bf16.vlgmr.msra.gmra.mxu0 %vm436_vm2, %v1878_v6  ;;  %1597 = vmatmul.msk.bf16.vlgmr.msra.gmra.mxu3 %vm436_vm2, %v1880_v7  ;;  %v1814_v38 = vor.u32 %v1938_v33, %v1813_v30  ;;  %v1818_v39 = vor.u32 %v1934_v34, %v1815_v35  ;;  %v1939_v41 = vld [vmem:[#allocation10 + $0x1a4] sm:$0xf0]  ;;  %v1935_v43 = vld [vmem:[#allocation10 + $0x18c] sm:$0xf]  ;;  %v1781_v45 = vld [vmem:[#allocation10 + $0x140] sm:$0xf] }
  0x41   : > { %1018 = vmatpush.bf16.msrb.mxu3 %v1850_v26  ;;  %1047 = vmatpush.bf16.msrb.mxu0 %v1854_v27  ;;  %v1822_v42 = vor.u32 %v1939_v41, %v1821_v40  ;;  %v1823_v44 = vld [vmem:[#allocation10 + $0x1a8] sm:$0xf0]  ;;  %v1930_v49 = vld [vmem:[#allocation10 + $0x15c] sm:$0xf0]  ;;  %v1926_v50 = vld [vmem:[#allocation10 + $0x144] sm:$0xf] }
  0x42   : > { %v1826_v48 = vor.u32 %v1935_v43, %v1823_v44  ;;  %v1782_v51 = vor.u32 %v1930_v49, %v1781_v45  ;;  %v1783_v52 = vld [vmem:[#allocation10 + $0x160] sm:$0xf0]  ;;  %v1789_v53 = vld [vmem:[#allocation10 + $0x148] sm:$0xf]  ;;  %v1927_v58 = vld [vmem:[#allocation10 + $0x14c] sm:$0xf] }
  0x43   : > { %552 = vmatpush.bf16.msra.mxu1 %v1883_v12  ;;  %1953 = vmatpush.bf16.msra.mxu2 %v1883_v12  ;;  %v1931_v54 = vld [vmem:[#allocation10 + $0x164] sm:$0xf0]  ;;  %v1786_v56 = vor.u32 %v1926_v50, %v1783_v52  ;;  %v1791_v59 = vld [vmem:[#allocation10 + $0x168] sm:$0xf0]  ;;  %v1749_v60 = vld [vmem:[#allocation10 + $0x100] sm:$0xf] }
  0x44   : > { %v1790_v57 = vor.u32 %v1931_v54, %v1789_v53  ;;  %v1794_v62 = vor.u32 %v1927_v58, %v1791_v59  ;;  %v1922_v63 = vld [vmem:[#allocation10 + $0x11c] sm:$0xf0]  ;;  %v1918_v0 = vld [vmem:[#allocation10 + $0x104] sm:$0xf]  ;;  %v1757_v3 = vld [vmem:[#allocation10 + $0x108] sm:$0xf] }
  0x45   : > { %1019 = vmatpush.bf16.msrb.mxu3 %v1818_v39  ;;  %1048 = vmatpush.bf16.msrb.mxu0 %v1822_v42  ;;  %v1751_v1 = vld [vmem:[#allocation10 + $0x120] sm:$0xf0]  ;;  %v1923_v4 = vld [vmem:[#allocation10 + $0x124] sm:$0xf0]  ;;  %v1919_v5 = vld [vmem:[#allocation10 + $0x10c] sm:$0xf]  ;;  %v1750_v7 = vor.u32 %v1922_v63, %v1749_v60 }
  0x46   : > { %v1754_v10 = vor.u32 %v1918_v0, %v1751_v1  ;;  %v1717_v11 = vld [vmem:[#allocation10 + $0xc0] sm:$0xf]  ;;  %v1719_v17 = vld [vmem:[#allocation10 + $0xe0] sm:$0xf0]  ;;  %v1725_v34 = vld [vmem:[#allocation10 + $0xc8] sm:$0xf] }
  0x47   : > { %553 = vmatpush.bf16.msra.mxu1 %v1882_v13  ;;  %1954 = vmatpush.bf16.msra.mxu2 %v1882_v13  ;;  %v1914_v12 = vld [vmem:[#allocation10 + $0xdc] sm:$0xf0]  ;;  %v1758_v13 = vor.u32 %v1923_v4, %v1757_v3  ;;  %v1915_v35 = vld [vmem:[#allocation10 + $0xe4] sm:$0xf0]  ;;  %v1902_v42 = vld [vmem:[#allocation10 + $0x84] sm:$0xf] }
  0x48   : > { %v1718_v19 = vor.u32 %v1914_v12, %v1717_v11  ;;  %v1685_v40 = vld [vmem:[#allocation10 + $0x80] sm:$0xf]  ;;  %v1687_v44 = vld [vmem:[#allocation10 + $0xa0] sm:$0xf0]  ;;  %v1693_v45 = vld [vmem:[#allocation10 + $0x88] sm:$0xf] }
  0x49   : > { %1020 = vmatpush.bf16.msrb.mxu3 %v1786_v56  ;;  %1049 = vmatpush.bf16.msrb.mxu0 %v1790_v57  ;;  %v1906_v41 = vld [vmem:[#allocation10 + $0x9c] sm:$0xf0]  ;;  %v1695_v49 = vld [vmem:[#allocation10 + $0xa8] sm:$0xf0]  ;;  %v1894_v53 = vld [vmem:[#allocation10 + $0x44] sm:$0xf] }
  0x4a   : > { %v1686_v43 = vor.u32 %v1906_v41, %v1685_v40  ;;  %v1653_v50 = vld [vmem:[#allocation10 + $0x40] sm:$0xf]  ;;  %v1655_v54 = vld [vmem:[#allocation10 + $0x60] sm:$0xf0]  ;;  %v1661_v57 = vld [vmem:[#allocation10 + $0x48] sm:$0xf] }
  0x4b   : > { %989 = vmatpush.bf16.msrb.mxu2 %v1846_v21  ;;  %1076 = vmatpush.bf16.msrb.mxu1 %v1858_v32  ;;  %v1898_v52 = vld [vmem:[#allocation10 + $0x5c] sm:$0xf0]  ;;  %v1658_v56 = vor.u32 %v1894_v53, %v1655_v54  ;;  %v1899_v58 = vld [vmem:[#allocation10 + $0x64] sm:$0xf0]  ;;  %v1895_v59 = vld [vmem:[#allocation10 + $0x4c] sm:$0xf] }
  0x4c   : > { %v1662_v60 = vor.u32 %v1899_v58, %v1661_v57  ;;  %v1621_v63 = vld [vmem:[#allocation10] sm:$0xf]  ;;  %v1886_v1 = vld [vmem:[#allocation10 + $0x4] sm:$0xf]  ;;  %v1629_v4 = vld [vmem:[#allocation10 + $0x8] sm:$0xf] }
  0x4d   : > { %1021 = vmatpush.bf16.msrb.mxu3 %v1754_v10  ;;  %1050 = vmatpush.bf16.msrb.mxu0 %v1758_v13  ;;  %v1890_v0 = vld [vmem:[#allocation10 + $0x1c] sm:$0xf0]  ;;  %v1623_v3 = vld [vmem:[#allocation10 + $0x20] sm:$0xf0]  ;;  %v1861_v11 = vld [vmem:[#allocation10 + $0x1d0] sm:$0xf] }
  0x4e   : > { %v1948_v12 = vld [vmem:[#allocation10 + $0x1ec] sm:$0xf0]  ;;  %v1944_v13 = vld [vmem:[#allocation10 + $0x1d4] sm:$0xf]  ;;  %v1773_v58 = vld [vmem:[#allocation10 + $0x118] sm:$0xf] }
  0x4f   : > { %990 = vmatpush.bf16.msrb.mxu2 %v1814_v38  ;;  %1077 = vmatpush.bf16.msrb.mxu1 %v1826_v48  ;;  %v1727_v38 = vld [vmem:[#allocation10 + $0xe8] sm:$0xf0]  ;;  %v1799_v41 = vld [vmem:[#allocation10 + $0x170] sm:$0xf0]  ;;  %vm1413_vm7 = vcmask 1045508   ;;  %vm1415_vm8 = vcmask 1043456  }
  0x50   : > { %1596 = vmatmul.msk.bf16.gmra.mxu0 %vm436_vm2, %v1879_v8  ;;  %1598 = vmatmul.msk.bf16.gmra.mxu3 %vm436_vm2, %v1881_v9  ;;  %v1759_v8 = vld [vmem:[#allocation10 + $0x128] sm:$0xf0]  ;;  %v1767_v53 = vld [vmem:[#allocation10 + $0x130] sm:$0xf0]  ;;  %p1875_p11 = scmp.ne.s32.totalorder %s2282_s24, 3 }
  0x51   : > { %v1903_v48 = vld [vmem:[#allocation10 + $0x8c] sm:$0xf] }
  0x53   : > { %991 = vmatpush.bf16.msrb.mxu2 %v1782_v51  ;;  %1078 = vmatpush.bf16.msrb.mxu1 %v1794_v62  ;;  %v1698_v51 = vor.u32 %v1903_v48, %v1695_v49  ;;  %v2482_v48 = vld [vmem:[#allocation8] ss:$0 sm:$0xff] }
  0x57   : > { %992 = vmatpush.bf16.msrb.mxu2 %v1750_v7 }
  0x5b   : > { %993 = vmatpush.bf16.msrb.mxu2 %v1718_v19  ;;  %v1949_v19 = vld [vmem:[#allocation10 + $0x1f4] sm:$0xf0] }
  0x5f   : > { %994 = vmatpush.bf16.msrb.mxu2 %v1686_v43  ;;  %v1933_v43 = vld [vmem:[#allocation10 + $0x174] sm:$0xf0] }
  0xbd   : > { %v465_v14 = vpop.f32.mrf.mxu0 }
  0xbe   : > { %v466_v16 = vadd.f32 %v2465_v15, %v465_v14  ;;  %v1762_v14 = vor.u32 %v1919_v5, %v1759_v8  ;;  %v1891_v5 = vld [vmem:[#allocation10 + $0x24] sm:$0xf0]  ;;  %v1887_v8 = vld [vmem:[#allocation10 + $0xc] sm:$0xf] }
  0xbf   : > { %v1630_v7 = vor.u32 %v1891_v5, %v1629_v4  ;;  %v1733_v4 = vld [vmem:[#allocation10 + $0xd0] sm:$0xf] }
  0xc0   : > { %v485_v36 = vmax.f32 %v466_v16, 0.0  ;;  %v1910_v16 = vld [vmem:[#allocation10 + $0xc4] sm:$0xf]  ;;  %1079 = vmatpush.bf16.msrb.mxu1 %v1762_v14  ;;  %v1862_v14 = vor.u32 %v1948_v12, %v1861_v11  ;;  %v1916_v5 = vld [vmem:[#allocation10 + $0xec] sm:$0xf0] }
  0xc3   : > { %v475_v20 = vpop.f32.mrf.mxu3 }
  0xc4   : > { %v2469_v25 = vadd.f32 %v2465_v15, %v475_v20  ;;  %v1722_v20 = vor.u32 %v1910_v16, %v1719_v17  ;;  %v1863_v16 = vld [vmem:[#allocation10 + $0x1f0] sm:$0xf0] }
  0xc5   : > { %v467_v31 = vpop.f32.mrf.mxu0  ;;  %v1866_v17 = vor.u32 %v1944_v13, %v1863_v16  ;;  %v1913_v13 = vld [vmem:[#allocation10 + $0xdc] sm:$0xf]  ;;  %v1701_v16 = vld [vmem:[#allocation10 + $0x90] sm:$0xf] }
  0xc6   : > { %v468_v37 = vadd.f32 %v2465_v15, %v467_v31  ;;  %v489_v47 = vmax.f32 %v2469_v25, 0.0  ;;  %1022 = vmatpush.bf16.msrb.mxu3 %v1722_v20  ;;  %v1945_v20 = vld [vmem:[#allocation10 + $0x1dc] sm:$0xf] }
  0xc8   : > { %v486_v46 = vmax.f32 %v468_v37, 0.0  ;;  %v1726_v37 = vor.u32 %v1915_v35, %v1725_v34  ;;  %v1839_v34 = vld [vmem:[#allocation10 + $0x1b8] sm:$0xf0] }
  0xca   : > { %v493_v55 = vpack.c.bf16 %v486_v46, %v485_v36  ;;  %v1911_v36 = vld [vmem:[#allocation10 + $0xcc] sm:$0xf]  ;;  %1051 = vmatpush.bf16.msrb.mxu0 %v1726_v37  ;;  %v1907_v46 = vld [vmem:[#allocation10 + $0xa4] sm:$0xf0]  ;;  %v1797_v37 = vld [vmem:[#allocation10 + $0x150] sm:$0xf] }
  0xcb   : > { %v477_v61 = vpop.f32.mrf.mxu3  ;;  %v1730_v39 = vor.u32 %v1911_v36, %v1727_v38  ;;  %v1932_v38 = vld [vmem:[#allocation10 + $0x16c] sm:$0xf0] }
  0xcc   : > { %1615 = vmatmul.msk.bf16.vlgmr.msra.gmra.mxu1 %vm533_vm3, %v493_v55  ;;  %v478_v2 = vadd.f32 %v2465_v15, %v477_v61  ;;  %v1654_v55 = vor.u32 %v1898_v52, %v1653_v50  ;;  %v1663_v61 = vld [vmem:[#allocation10 + $0x68] sm:$0xf0]  ;;  %v1798_v40 = vor.u32 %v1932_v38, %v1797_v37  ;;  %v1924_v50 = vld [vmem:[#allocation10 + $0x12c] sm:$0xf0] }
  0xcd   : > { %v470_v6 = vpop.f32.mrf.mxu0  ;;  %1080 = vmatpush.bf16.msrb.mxu1 %v1730_v39  ;;  %v1666_v62 = vor.u32 %v1895_v59, %v1663_v61  ;;  %v1928_v39 = vld [vmem:[#allocation10 + $0x154] sm:$0xf]  ;;  %v1925_v59 = vld [vmem:[#allocation10 + $0x134] sm:$0xf0]  ;;  %v1669_v37 = vld [vmem:[#allocation10 + $0x50] sm:$0xf] }
  0xce   : > { %v490_v9 = vmax.f32 %v478_v2, 0.0  ;;  %v471_v22 = vadd.f32 %v2465_v15, %v470_v6  ;;  %995 = vmatpush.bf16.msrb.mxu2 %v1654_v55  ;;  %v1622_v2 = vor.u32 %v1890_v0, %v1621_v63  ;;  %v1626_v6 = vor.u32 %v1886_v1, %v1623_v3  ;;  %v1900_v38 = vld [vmem:[#allocation10 + $0x6c] sm:$0xf0] }
  0xcf   : > { %v1774_v61 = vor.u32 %v1925_v59, %v1773_v58 }
  0xd0   : > { %v495_v18 = vpack.c.bf16 %v490_v9, %v489_v47  ;;  %v487_v25 = vmax.f32 %v471_v22, 0.0  ;;  %v1694_v47 = vor.u32 %v1907_v46, %v1693_v45  ;;  %v1631_v9 = vld [vmem:[#allocation10 + $0x28] sm:$0xf0]  ;;  %v1871_v22 = vld [vmem:[#allocation10 + $0x1f8] sm:$0xf0] }
  0xd1   : > { %1081 = vmatpush.bf16.msrb.mxu1 %v1698_v51  ;;  %v1634_v10 = vor.u32 %v1887_v8, %v1631_v9  ;;  %v1929_v46 = vld [vmem:[#allocation10 + $0x15c] sm:$0xf]  ;;  %v1920_v51 = vld [vmem:[#allocation10 + $0x114] sm:$0xf]  ;;  %v1741_v9 = vld [vmem:[#allocation10 + $0xd8] sm:$0xf] }
  0xd2   : > { %1617 = vmatmul.msk.bf16.vlgmr.msra.gmra.mxu2 %vm533_vm3, %v495_v18  ;;  %1052 = vmatpush.bf16.msrb.mxu0 %v1694_v47  ;;  %v1869_v18 = vld [vmem:[#allocation10 + $0x1d8] sm:$0xf]  ;;  %v1765_v47 = vld [vmem:[#allocation10 + $0x110] sm:$0xf]  ;;  %v1770_v54 = vor.u32 %v1920_v51, %v1767_v53  ;;  %v1735_v8 = vld [vmem:[#allocation10 + $0xf0] sm:$0xf0] }
  0xd3   : > { %v480_v21 = vpop.f32.mrf.mxu3  ;;  %996 = vmatpush.bf16.msrb.mxu2 %v1622_v2  ;;  %v1766_v52 = vor.u32 %v1924_v50, %v1765_v47  ;;  %v1637_v47 = vld [vmem:[#allocation10 + $0x10] sm:$0xf]  ;;  %v1888_v51 = vld [vmem:[#allocation10 + $0x14] sm:$0xf] }
  0xd4   : > { %v481_v27 = vadd.f32 %v2465_v15, %v480_v21  ;;  %v1870_v21 = vor.u32 %v1949_v19, %v1869_v18  ;;  %v1908_v18 = vld [vmem:[#allocation10 + $0xac] sm:$0xf0]  ;;  %v1904_v19 = vld [vmem:[#allocation10 + $0x94] sm:$0xf] }
  0xd5   : > { %v472_v23 = vpop.f32.mrf.mxu0  ;;  %1082 = vmatpush.bf16.msrb.mxu1 %v1666_v62  ;;  %v1775_v62 = vld [vmem:[#allocation10 + $0x138] sm:$0xf0]  ;;  %v1892_v50 = vld [vmem:[#allocation10 + $0x2c] sm:$0xf0] }
  0xd6   : > { %v473_v24 = vadd.f32 %v2465_v15, %v472_v23  ;;  %v491_v30 = vmax.f32 %v481_v27, 0.0  ;;  %1053 = vmatpush.bf16.msrb.mxu0 %v1662_v60  ;;  %v1829_v23 = vld [vmem:[#allocation10 + $0x190] sm:$0xf]  ;;  %v1936_v27 = vld [vmem:[#allocation10 + $0x194] sm:$0xf]  ;;  %v1638_v53 = vor.u32 %v1892_v50, %v1637_v47 }
  0xd7   : > { %1105 = vmatpush.bf16.msra.mxu2 %v1862_v14  ;;  %v1921_v60 = vld [vmem:[#allocation10 + $0x11c] sm:$0xf] }
  0xd8   : > { %v488_v26 = vmax.f32 %v473_v24, 0.0  ;;  %v1940_v24 = vld [vmem:[#allocation10 + $0x1ac] sm:$0xf0]  ;;  %v1778_v1 = vor.u32 %v1921_v60, %v1775_v62  ;;  %v1743_v14 = vld [vmem:[#allocation10 + $0xf8] sm:$0xf0] }
  0xd9   : > { %1083 = vmatpush.bf16.msrb.mxu1 %v1634_v10  ;;  %v1917_v10 = vld [vmem:[#allocation10 + $0xf4] sm:$0xf0] }
  0xda   : > { %v494_v28 = vpack.c.bf16 %v488_v26, %v487_v25  ;;  %1054 = vmatpush.bf16.msrb.mxu0 %v1630_v7  ;;  %v1874_v25 = vor.u32 %v1945_v20, %v1871_v22  ;;  %v1830_v26 = vor.u32 %v1940_v24, %v1829_v23  ;;  %v1734_v7 = vor.u32 %v1916_v5, %v1733_v4  ;;  %v1703_v22 = vld [vmem:[#allocation10 + $0xb0] sm:$0xf0]  ;;  %v1709_v23 = vld [vmem:[#allocation10 + $0x98] sm:$0xf] }
  0xdb   : > { %v482_v29 = vpop.f32.mrf.mxu3  ;;  %v1742_v12 = vor.u32 %v1917_v10, %v1741_v9  ;;  %v1909_v24 = vld [vmem:[#allocation10 + $0xb4] sm:$0xf0] }
  0xdc   : > { %1616 = vmatmul.msk.bf16.gmra.mxu1 %vm533_vm3, %v494_v28  ;;  %v483_v31 = vadd.f32 %v2465_v15, %v482_v29  ;;  %v1690_v15 = vor.u32 %v1902_v42, %v1687_v44  ;;  %v1831_v28 = vld [vmem:[#allocation10 + $0x1b0] sm:$0xf0]  ;;  %1106 = vmatpush.bf16.msra.mxu2 %v1830_v26  ;;  %v1805_v42 = vld [vmem:[#allocation10 + $0x158] sm:$0xf]  ;;  %v1802_v44 = vor.u32 %v1928_v39, %v1799_v41 }
  0xdd   : > { %v1834_v29 = vor.u32 %v1936_v27, %v1831_v28  ;;  %1192 = vmatpush.bf16.msra.mxu1 %v1874_v25  ;;  %v1806_v45 = vor.u32 %v1933_v43, %v1805_v42  ;;  %v1706_v25 = vor.u32 %v1904_v19, %v1703_v22  ;;  %v1710_v26 = vor.u32 %v1909_v24, %v1709_v23  ;;  %v1905_v27 = vld [vmem:[#allocation10 + $0x9c] sm:$0xf]  ;;  %v1896_v39 = vld [vmem:[#allocation10 + $0x54] sm:$0xf]  ;;  %v1677_v42 = vld [vmem:[#allocation10 + $0x58] sm:$0xf] }
  0xde   : > { %v492_v32 = vmax.f32 %v483_v31, 0.0  ;;  %1023 = vmatpush.bf16.msrb.mxu3 %v1690_v15  ;;  %1163 = vmatpush.bf16.msra.mxu0 %v1870_v21  ;;  %v1941_v31 = vld [vmem:[#allocation10 + $0x1b4] sm:$0xf0]  ;;  %v1807_v15 = vld [vmem:[#allocation10 + $0x178] sm:$0xf0]  ;;  %v1702_v21 = vor.u32 %v1908_v18, %v1701_v16 }
  0xdf   : > { %v1810_v49 = vor.u32 %v1929_v46, %v1807_v15  ;;  %v1711_v28 = vld [vmem:[#allocation10 + $0xb8] sm:$0xf0]  ;;  %v1671_v41 = vld [vmem:[#allocation10 + $0x70] sm:$0xf0]  ;;  %v1901_v43 = vld [vmem:[#allocation10 + $0x74] sm:$0xf0] }
  0xe0   : > { %v496_v33 = vpack.c.bf16 %v492_v32, %v491_v30  ;;  %v1837_v30 = vld [vmem:[#allocation10 + $0x198] sm:$0xf]  ;;  %v1937_v32 = vld [vmem:[#allocation10 + $0x19c] sm:$0xf]  ;;  %1107 = vmatpush.bf16.msra.mxu2 %v1798_v40  ;;  %v1670_v40 = vor.u32 %v1900_v38, %v1669_v37 }
  0xe1   : > { %v1842_v35 = vor.u32 %v1937_v32, %v1839_v34  ;;  %v1897_v46 = vld [vmem:[#allocation10 + $0x5c] sm:$0xf] }
  0xe2   : > { %1618 = vmatmul.msk.bf16.gmra.mxu2 %vm533_vm3, %v496_v33  ;;  %1024 = vmatpush.bf16.msrb.mxu3 %v1658_v56  ;;  %v1838_v33 = vor.u32 %v1941_v31, %v1837_v30  ;;  %v1679_v15 = vld [vmem:[#allocation10 + $0x78] sm:$0xf0] }
  0xe3   : > { %1193 = vmatpush.bf16.msra.mxu1 %v1842_v35 }
  0xe4   : > { %1164 = vmatpush.bf16.msra.mxu0 %v1838_v33  ;;  %1108 = vmatpush.bf16.msra.mxu2 %v1766_v52  ;;  %v1639_v52 = vld [vmem:[#allocation10 + $0x30] sm:$0xf0] }
  0xe6   : > { %1025 = vmatpush.bf16.msrb.mxu3 %v1626_v6  ;;  %v1912_v6 = vld [vmem:[#allocation10 + $0xd4] sm:$0xf] }
  0xe7   : > { %1194 = vmatpush.bf16.msra.mxu1 %v1810_v49  ;;  %v1738_v11 = vor.u32 %v1912_v6, %v1735_v8  ;;  %v1682_v49 = vor.u32 %v1897_v46, %v1679_v15 }
  0xe8   : > { %1165 = vmatpush.bf16.msra.mxu0 %v1806_v45  ;;  %1109 = vmatpush.bf16.msra.mxu2 %v1734_v7  ;;  %v1678_v45 = vor.u32 %v1901_v43, %v1677_v42 }
  0xea   : > { %1134 = vmatpush.bf16.msra.mxu3 %v1866_v17  ;;  %v1746_v17 = vor.u32 %v1913_v13, %v1743_v14 }
  0xeb   : > { %1195 = vmatpush.bf16.msra.mxu1 %v1778_v1 }
  0xec   : > { %1166 = vmatpush.bf16.msra.mxu0 %v1774_v61  ;;  %1110 = vmatpush.bf16.msra.mxu2 %v1702_v21  ;;  %v1647_v61 = vld [vmem:[#allocation10 + $0x38] sm:$0xf0] }
  0xee   : > { %1135 = vmatpush.bf16.msra.mxu3 %v1834_v29  ;;  %v1714_v29 = vor.u32 %v1905_v27, %v1711_v28 }
  0xef   : > { %1196 = vmatpush.bf16.msra.mxu1 %v1746_v17 }
  0xf0   : > { %1167 = vmatpush.bf16.msra.mxu0 %v1742_v12  ;;  %1111 = vmatpush.bf16.msra.mxu2 %v1670_v40 }
  0xf2   : > { %1136 = vmatpush.bf16.msra.mxu3 %v1802_v44  ;;  %v1674_v44 = vor.u32 %v1896_v39, %v1671_v41 }
  0xf3   : > { %1197 = vmatpush.bf16.msra.mxu1 %v1714_v29 }
  0xf4   : > { %1168 = vmatpush.bf16.msra.mxu0 %v1710_v26  ;;  %1112 = vmatpush.bf16.msra.mxu2 %v1638_v53 }
  0xf6   : > { %1137 = vmatpush.bf16.msra.mxu3 %v1770_v54  ;;  %v1642_v54 = vor.u32 %v1888_v51, %v1639_v52 }
  0xf7   : > { %1198 = vmatpush.bf16.msra.mxu1 %v1682_v49 }
  0xf8   : > { %1169 = vmatpush.bf16.msra.mxu0 %v1678_v45 }
  0xfa   : > { %1138 = vmatpush.bf16.msra.mxu3 %v1738_v11 }
  0xfe   : > { %1139 = vmatpush.bf16.msra.mxu3 %v1706_v25 }
 0x102   : > { %1140 = vmatpush.bf16.msra.mxu3 %v1674_v44 }
 0x106   : > { %1141 = vmatpush.bf16.msra.mxu3 %v1642_v54 }
 0x149   : > { %v555_v36 = vpop.f32.mrf.mxu1 }
 0x14a   : > { %v556_v55 = vadd.f32 %v2482_v48, %v555_v36 }
 0x14c   : > { %v575_v63 = vmax.f32 %v556_v55, 0.0  ;;  %v1645_v55 = vld [vmem:[#allocation10 + $0x18] sm:$0xf] }
 0x151   : > { %v557_v56 = vpop.f32.mrf.mxu1 }
 0x152   : > { %v558_v57 = vadd.f32 %v2482_v48, %v557_v56  ;;  %v1893_v56 = vld [vmem:[#allocation10 + $0x34] sm:$0xf0] }
 0x153   : > { %v1646_v60 = vor.u32 %v1893_v56, %v1645_v55 }
 0x154   : > { %v576_v0 = vmax.f32 %v558_v57, 0.0  ;;  %v1889_v57 = vld [vmem:[#allocation10 + $0x1c] sm:$0xf] }
 0x155   : > { %v565_v20 = vpop.f32.mrf.mxu2  ;;  %v1650_v62 = vor.u32 %v1889_v57, %v1647_v61  ;;  %1170 = vmatpush.bf16.msra.mxu0 %v1646_v60 }
 0x156   : > { %v2486_v2 = vpack.c.bf16 %v576_v0, %v575_v63  ;;  %v566_v58 = vadd.f32 %v2482_v48, %v565_v20 }
 0x157   : > { %1199 = vmatpush.bf16.msra.mxu1 %v1650_v62 }
 0x158   : > { %997 = vmatmul.bf16.vlgmr.msrb.gmra.mxu2 %v2486_v2  ;;  %1026 = vmatmul.bf16.vlgmr.msrb.gmra.mxu3 %v2486_v2  ;;  %v579_v0 = vmax.f32 %v566_v58, 0.0 }
 0x159   : > { %1055 = vmatmul.bf16.vlgmr.msrb.gmra.mxu0 %v2486_v2  ;;  %1084 = vmatmul.bf16.vlgmr.msrb.gmra.mxu1 %v2486_v2  ;;  %v560_v3 = vpop.f32.mrf.mxu1 }
 0x15a   : > { %v561_v30 = vadd.f32 %v2482_v48, %v560_v3 }
 0x15c   : > { %v577_v33 = vmax.f32 %v561_v30, 0.0 }
 0x15d   : > { %v567_v36 = vpop.f32.mrf.mxu2 }
 0x15e   : > { %v568_v59 = vadd.f32 %v2482_v48, %v567_v36 }
 0x160   : > { %v580_v1 = vmax.f32 %v568_v59, 0.0 }
 0x161   : > { %v562_v31 = vpop.f32.mrf.mxu1 }
 0x162   : > { %v563_v32 = vadd.f32 %v2482_v48, %v562_v31  ;;  %v585_v3 = vpack.c.bf16 %v580_v1, %v579_v0 }
 0x164   : > { %v578_v34 = vmax.f32 %v563_v32, 0.0 }
 0x165   : > { %v570_v63 = vpop.f32.mrf.mxu2 }
 0x166   : > { %v2494_v35 = vpack.c.bf16 %v578_v34, %v577_v33  ;;  %v571_v5 = vadd.f32 %v2482_v48, %v570_v63 }
 0x168   : > { %1002 = vmatmul.bf16.gmra.mxu2 %v2494_v35  ;;  %1031 = vmatmul.bf16.gmra.mxu3 %v2494_v35  ;;  %v581_v7 = vmax.f32 %v571_v5, 0.0 }
 0x169   : > { %1060 = vmatmul.bf16.gmra.mxu0 %v2494_v35  ;;  %1089 = vmatmul.bf16.gmra.mxu1 %v2494_v35 }
 0x16d   : > { %v572_v4 = vpop.f32.mrf.mxu2 }
 0x16e   : > { %v573_v6 = vadd.f32 %v2482_v48, %v572_v4  ;;  %v2512_v48 = vld [vmem:[#allocation11] sm:$0xff] }
 0x16f   : > { %v2515_v11 = vperm.slane %v2512_v48, 2  ;;  %v2518_v12 = vperm.slane %v2512_v48, 3  ;;  %v2523_v18 = vperm.slane %v2512_v48, 0  ;;  %v2526_v19 = vperm.slane %v2512_v48, 1 }
 0x170   : > { %v582_v8 = vmax.f32 %v573_v6, 0.0 }
 0x172   : > { %v586_v9 = vpack.c.bf16 %v582_v8, %v581_v7 }
 0x178   : > { %1007 = vmatmul.bf16.gmra.mxu2 %v585_v3  ;;  %1036 = vmatmul.bf16.gmra.mxu3 %v585_v3 }
 0x179   : > { %1065 = vmatmul.bf16.gmra.mxu0 %v585_v3  ;;  %1094 = vmatmul.bf16.gmra.mxu1 %v585_v3 }
 0x188   : > { %1012 = vmatmul.bf16.gmra.mxu2 %v586_v9  ;;  %1041 = vmatmul.bf16.gmra.mxu3 %v586_v9 }
 0x189   : > { %1070 = vmatmul.bf16.gmra.mxu0 %v586_v9  ;;  %1099 = vmatmul.bf16.gmra.mxu1 %v586_v9 }
 0x198   : > { %1113 = vmatmul.bf16.vlgmr.msra.gmra.mxu2 %v2486_v2  ;;  %1142 = vmatmul.bf16.vlgmr.msra.gmra.mxu3 %v2486_v2 }
 0x199   : > { %1171 = vmatmul.bf16.vlgmr.msra.gmra.mxu0 %v2486_v2  ;;  %1200 = vmatmul.bf16.vlgmr.msra.gmra.mxu1 %v2486_v2 }
 0x1a8   : > { %1118 = vmatmul.bf16.gmra.mxu2 %v2494_v35  ;;  %1147 = vmatmul.bf16.gmra.mxu3 %v2494_v35 }
 0x1a9   : > { %1176 = vmatmul.bf16.gmra.mxu0 %v2494_v35  ;;  %1205 = vmatmul.bf16.gmra.mxu1 %v2494_v35 }
 0x1b8   : > { %1123 = vmatmul.bf16.gmra.mxu2 %v585_v3  ;;  %1152 = vmatmul.bf16.gmra.mxu3 %v585_v3 }
 0x1b9   : > { %1181 = vmatmul.bf16.gmra.mxu0 %v585_v3  ;;  %1210 = vmatmul.bf16.gmra.mxu1 %v585_v3 }
 0x1c8   : > { %1128 = vmatmul.bf16.gmra.mxu2 %v586_v9  ;;  %1157 = vmatmul.bf16.gmra.mxu3 %v586_v9 }
 0x1c9   : > { %1186 = vmatmul.bf16.gmra.mxu0 %v586_v9  ;;  %1215 = vmatmul.bf16.gmra.mxu1 %v586_v9 }
 0x1d6   : > { %v1056_v10 = vpop.f32.mrf.mxu0  ;;  %v1085_v2 = vpop.f32.mrf.mxu1 }
 0x1d7   : > { %v1057_v16 = vadd.f32 %v1056_v10, %v2515_v11  ;;  %v1086_v17 = vadd.f32 %v1085_v2, %v2518_v12 }
 0x1d9   : > { %v1223_v24 = vmax.f32 %v1057_v16, 0.0  ;;  %v1224_v25 = vmax.f32 %v1086_v17, 0.0 }
 0x1db   : > { %v998_v13 = vpop.f32.mrf.mxu2  ;;  %v1027_v14 = vpop.f32.mrf.mxu3 }
 0x1dc   : > { %v999_v28 = vadd.f32 %v998_v13, %v2523_v18  ;;  %v1028_v29 = vadd.f32 %v1027_v14, %v2526_v19 }
 0x1de   : > { %v1058_v20 = vpop.f32.mrf.mxu0  ;;  %v1087_v21 = vpop.f32.mrf.mxu1  ;;  %v1221_v36 = vmax.f32 %v999_v28, 0.0  ;;  %v1222_v37 = vmax.f32 %v1028_v29, 0.0 }
 0x1df   : > { %v1059_v22 = vadd.f32 %v1058_v20, %v2515_v11  ;;  %v1088_v23 = vadd.f32 %v1087_v21, %v2518_v12 }
 0x1e1   : > { %v1231_v26 = vmax.f32 %v1059_v22, 0.0  ;;  %v1232_v27 = vmax.f32 %v1088_v23, 0.0 }
 0x1e3   : > { %v1312_v30 = vmax.f32 %v1223_v24, %v1231_v26  ;;  %v1325_v31 = vmax.f32 %v1224_v25, %v1232_v27  ;;  %v1000_v32 = vpop.f32.mrf.mxu2  ;;  %v1029_v33 = vpop.f32.mrf.mxu3 }
 0x1e4   : > { %v1001_v34 = vadd.f32 %v1000_v32, %v2523_v18  ;;  %v1030_v35 = vadd.f32 %v1029_v33, %v2526_v19 }
 0x1e6   : > { %v1229_v38 = vmax.f32 %v1001_v34, 0.0  ;;  %v1230_v39 = vmax.f32 %v1030_v35, 0.0  ;;  %v1061_v40 = vpop.f32.mrf.mxu0  ;;  %v1090_v41 = vpop.f32.mrf.mxu1 }
 0x1e7   : > { %v1062_v42 = vadd.f32 %v1061_v40, %v2515_v11  ;;  %v1091_v43 = vadd.f32 %v1090_v41, %v2518_v12 }
 0x1e8   : > { %v1286_v44 = vmax.f32 %v1221_v36, %v1229_v38  ;;  %v1299_v45 = vmax.f32 %v1222_v37, %v1230_v39 }
 0x1e9   : > { %v1239_v46 = vmax.f32 %v1062_v42, 0.0  ;;  %v1240_v15 = vmax.f32 %v1091_v43, 0.0 }
 0x1eb   : > { %v1313_v47 = vmax.f32 %v1312_v30, %v1239_v46  ;;  %v1326_v49 = vmax.f32 %v1325_v31, %v1240_v15  ;;  %v1003_v50 = vpop.f32.mrf.mxu2  ;;  %v1032_v51 = vpop.f32.mrf.mxu3 }
 0x1ec   : > { %v1004_v52 = vadd.f32 %v1003_v50, %v2523_v18  ;;  %v1033_v53 = vadd.f32 %v1032_v51, %v2526_v19 }
 0x1ee   : > { %v1237_v54 = vmax.f32 %v1004_v52, 0.0  ;;  %v1238_v55 = vmax.f32 %v1033_v53, 0.0  ;;  %v1063_v56 = vpop.f32.mrf.mxu0  ;;  %v1092_v57 = vpop.f32.mrf.mxu1 }
 0x1ef   : > { %v1064_v58 = vadd.f32 %v1063_v56, %v2515_v11  ;;  %v1093_v59 = vadd.f32 %v1092_v57, %v2518_v12 }
 0x1f0   : > { %v1287_v60 = vmax.f32 %v1286_v44, %v1237_v54  ;;  %v1300_v61 = vmax.f32 %v1299_v45, %v1238_v55 }
 0x1f1   : > { %v1247_v62 = vmax.f32 %v1064_v58, 0.0  ;;  %v1248_v63 = vmax.f32 %v1093_v59, 0.0 }
 0x1f3   : > { %v1314_v0 = vmax.f32 %v1313_v47, %v1247_v62  ;;  %v1327_v1 = vmax.f32 %v1326_v49, %v1248_v63  ;;  %v1005_v3 = vpop.f32.mrf.mxu2  ;;  %v1034_v4 = vpop.f32.mrf.mxu3 }
 0x1f4   : > { %v1006_v5 = vadd.f32 %v1005_v3, %v2523_v18  ;;  %v1035_v6 = vadd.f32 %v1034_v4, %v2526_v19 }
 0x1f6   : > { %v1245_v7 = vmax.f32 %v1006_v5, 0.0  ;;  %v1246_v8 = vmax.f32 %v1035_v6, 0.0  ;;  %v1066_v9 = vpop.f32.mrf.mxu0  ;;  %v1095_v10 = vpop.f32.mrf.mxu1 }
 0x1f7   : > { %v1067_v2 = vadd.f32 %v1066_v9, %v2515_v11  ;;  %v1096_v13 = vadd.f32 %v1095_v10, %v2518_v12 }
 0x1f8   : > { %v1288_v14 = vmax.f32 %v1287_v60, %v1245_v7  ;;  %v1301_v16 = vmax.f32 %v1300_v61, %v1246_v8 }
 0x1f9   : > { %v1255_v17 = vmax.f32 %v1067_v2, 0.0  ;;  %v1256_v20 = vmax.f32 %v1096_v13, 0.0 }
 0x1fb   : > { %v1315_v21 = vmax.f32 %v1314_v0, %v1255_v17  ;;  %v1328_v22 = vmax.f32 %v1327_v1, %v1256_v20  ;;  %v1008_v23 = vpop.f32.mrf.mxu2  ;;  %v1037_v24 = vpop.f32.mrf.mxu3 }
 0x1fc   : > { %v1009_v25 = vadd.f32 %v1008_v23, %v2523_v18  ;;  %v1038_v26 = vadd.f32 %v1037_v24, %v2526_v19 }
 0x1fe   : > { %v1253_v27 = vmax.f32 %v1009_v25, 0.0  ;;  %v1254_v28 = vmax.f32 %v1038_v26, 0.0  ;;  %v1068_v29 = vpop.f32.mrf.mxu0  ;;  %v1097_v30 = vpop.f32.mrf.mxu1 }
 0x1ff   : > { %v1069_v31 = vadd.f32 %v1068_v29, %v2515_v11  ;;  %v1098_v32 = vadd.f32 %v1097_v30, %v2518_v12 }
 0x200   : > { %v1289_v33 = vmax.f32 %v1288_v14, %v1253_v27  ;;  %v1302_v34 = vmax.f32 %v1301_v16, %v1254_v28 }
 0x201   : > { %v1263_v35 = vmax.f32 %v1069_v31, 0.0  ;;  %v1264_v36 = vmax.f32 %v1098_v32, 0.0 }
 0x203   : > { %v1316_v37 = vmax.f32 %v1315_v21, %v1263_v35  ;;  %v1329_v38 = vmax.f32 %v1328_v22, %v1264_v36  ;;  %v1010_v39 = vpop.f32.mrf.mxu2  ;;  %v1039_v40 = vpop.f32.mrf.mxu3 }
 0x204   : > { %v1011_v41 = vadd.f32 %v1010_v39, %v2523_v18  ;;  %v1040_v42 = vadd.f32 %v1039_v40, %v2526_v19 }
 0x206   : > { %v1261_v43 = vmax.f32 %v1011_v41, 0.0  ;;  %v1262_v44 = vmax.f32 %v1040_v42, 0.0  ;;  %v1071_v45 = vpop.f32.mrf.mxu0  ;;  %v1100_v46 = vpop.f32.mrf.mxu1 }
 0x207   : > { %v1072_v15 = vadd.f32 %v1071_v45, %v2515_v11  ;;  %v1101_v47 = vadd.f32 %v1100_v46, %v2518_v12 }
 0x208   : > { %v1290_v49 = vmax.f32 %v1289_v33, %v1261_v43  ;;  %v1303_v50 = vmax.f32 %v1302_v34, %v1262_v44 }
 0x209   : > { %v1271_v51 = vmax.f32 %v1072_v15, 0.0  ;;  %v1272_v52 = vmax.f32 %v1101_v47, 0.0 }
 0x20b   : > { %v1317_v53 = vmax.f32 %v1316_v37, %v1271_v51  ;;  %v1330_v54 = vmax.f32 %v1329_v38, %v1272_v52  ;;  %v1013_v55 = vpop.f32.mrf.mxu2  ;;  %v1042_v56 = vpop.f32.mrf.mxu3 }
 0x20c   : > { %v1014_v57 = vadd.f32 %v1013_v55, %v2523_v18  ;;  %v1043_v58 = vadd.f32 %v1042_v56, %v2526_v19 }
 0x20e   : > { %v1269_v59 = vmax.f32 %v1014_v57, 0.0  ;;  %v1270_v60 = vmax.f32 %v1043_v58, 0.0  ;;  %v1073_v61 = vpop.f32.mrf.mxu0  ;;  %v1102_v62 = vpop.f32.mrf.mxu1 }
 0x20f   : > { %v1074_v63 = vadd.f32 %v1073_v61, %v2515_v11  ;;  %v1103_v0 = vadd.f32 %v1102_v62, %v2518_v12 }
 0x210   : > { %v1291_v1 = vmax.f32 %v1290_v49, %v1269_v59  ;;  %v1304_v3 = vmax.f32 %v1303_v50, %v1270_v60 }
 0x211   : > { %v1279_v4 = vmax.f32 %v1074_v63, 0.0  ;;  %v1280_v5 = vmax.f32 %v1103_v0, 0.0  ;;  %v2563_v0 = vperm.slane %v2512_v48, 6 }
 0x213   : > { %v1318_v6 = vmax.f32 %v1317_v53, %v1279_v4  ;;  %v1331_v7 = vmax.f32 %v1330_v54, %v1280_v5  ;;  %v1015_v8 = vpop.f32.mrf.mxu2  ;;  %v1044_v9 = vpop.f32.mrf.mxu3  ;;  %v2569_v5 = vperm.slane %v2512_v48, 4 }
 0x214   : > { %v1016_v10 = vadd.f32 %v1015_v8, %v2523_v18  ;;  %v1045_v2 = vadd.f32 %v1044_v9, %v2526_v19 }
 0x215   : > { %v1319_v13 = vrot.slane %v1318_v6, 4  ;;  %v1332_v14 = vrot.slane %v1331_v7, 4 }
 0x216   : > { %v1277_v16 = vmax.f32 %v1016_v10, 0.0  ;;  %v1278_v17 = vmax.f32 %v1045_v2, 0.0  ;;  %v1172_v20 = vpop.f32.mrf.mxu0  ;;  %v1201_v11 = vpop.f32.mrf.mxu1 }
 0x217   : > { %v1320_v21 = vmax.f32 %v1318_v6, %v1319_v13  ;;  %v1333_v12 = vmax.f32 %v1331_v7, %v1332_v14  ;;  %v2572_v6 = vperm.slane %v2512_v48, 5  ;;  %v1173_v14 = vadd.f32 %v1172_v20, %v2563_v0 }
 0x218   : > { %v1292_v22 = vmax.f32 %v1291_v1, %v1277_v16  ;;  %v1305_v23 = vmax.f32 %v1304_v3, %v1278_v17  ;;  %v2566_v1 = vperm.slane %v2512_v48, 7 }
 0x219   : > { %v1321_v24 = vrot.slane %v1320_v21, 2  ;;  %v1334_v25 = vrot.slane %v1333_v12, 2 }
 0x21a   : > { %v1293_v26 = vrot.slane %v1292_v22, 4  ;;  %v1306_v27 = vrot.slane %v1305_v23, 4  ;;  %v1202_v16 = vadd.f32 %v1201_v11, %v2566_v1 }
 0x21b   : > { %v1322_v28 = vmax.f32 %v1320_v21, %v1321_v24  ;;  %v1335_v29 = vmax.f32 %v1333_v12, %v1334_v25  ;;  %v1114_v30 = vpop.f32.mrf.mxu2  ;;  %v1143_v18 = vpop.f32.mrf.mxu3 }
 0x21c   : > { %v1294_v31 = vmax.f32 %v1292_v22, %v1293_v26  ;;  %v1307_v19 = vmax.f32 %v1305_v23, %v1306_v27  ;;  %v1115_v17 = vadd.f32 %v1114_v30, %v2569_v5  ;;  %v1144_v21 = vadd.f32 %v1143_v18, %v2572_v6 }
 0x21d   : > { %v1323_v32 = vrot.slane %v1322_v28, 1  ;;  %v1336_v33 = vrot.slane %v1335_v29, 1  ;;  %v1228_v20 = vmax.f32 %v1202_v16, 0.0 }
 0x21e   : > { %v1295_v34 = vrot.slane %v1294_v31, 2  ;;  %v1308_v35 = vrot.slane %v1307_v19, 2  ;;  %v1174_v36 = vpop.f32.mrf.mxu0  ;;  %v1203_v37 = vpop.f32.mrf.mxu1 }
 0x21f   : > { %v1324_v38 = vmax.f32 %v1322_v28, %v1323_v32  ;;  %v1337_v39 = vmax.f32 %v1335_v29, %v1336_v33  ;;  %v1175_v7 = vadd.f32 %v1174_v36, %v2563_v0  ;;  %v1204_v8 = vadd.f32 %v1203_v37, %v2566_v1 }
 0x220   : > { %v1296_v40 = vmax.f32 %v1294_v31, %v1295_v34  ;;  %v1309_v41 = vmax.f32 %v1307_v19, %v1308_v35  ;;  %v1227_v28 = vmax.f32 %v1173_v14, 0.0  ;;  %v1225_v31 = vmax.f32 %v1115_v17, 0.0 }
 0x221   : > { %v1399_v42 = vrot.slane %v1324_v38, 6  ;;  %v1400_v43 = vrot.slane %v1337_v39, 5  ;;  %v1235_v22 = vmax.f32 %v1175_v7, 0.0  ;;  %v1236_v23 = vmax.f32 %v1204_v8, 0.0 }
 0x222   : > { %v1297_v44 = vrot.slane %v1296_v40, 1  ;;  %v1310_v45 = vrot.slane %v1309_v41, 1  ;;  %v1226_v19 = vmax.f32 %v1144_v21, 0.0 }
 0x223   : > { %v1407_v46 = vsel %vm1406_vm4, %v1399_v42, %v1400_v43  ;;  %v1116_v15 = vpop.f32.mrf.mxu2  ;;  %v1145_v47 = vpop.f32.mrf.mxu3  ;;  %v1364_v34 = vmax.f32 %v1227_v28, %v1235_v22  ;;  %v1377_v35 = vmax.f32 %v1228_v20, %v1236_v23 }
 0x224   : > { %v1311_v49 = vmax.f32 %v1309_v41, %v1310_v45  ;;  %v1298_v50 = vmax.f32 %v1296_v40, %v1297_v44  ;;  %v1117_v9 = vadd.f32 %v1116_v15, %v2569_v5  ;;  %v1146_v10 = vadd.f32 %v1145_v47, %v2572_v6 }
 0x226   : > { %v1398_v51 = vrot.slane %v1311_v49, 7  ;;  %v1177_v52 = vpop.f32.mrf.mxu0  ;;  %v1206_v53 = vpop.f32.mrf.mxu1  ;;  %v1233_v24 = vmax.f32 %v1117_v9, 0.0  ;;  %v1234_v25 = vmax.f32 %v1146_v10, 0.0 }
 0x227   : > { %v1178_v48 = vadd.f32 %v1177_v52, %v2563_v0  ;;  %v1207_v12 = vadd.f32 %v1206_v53, %v2566_v1 }
 0x228   : > { %v1405_v54 = vsel %vm449_vm0, %v1298_v50, %v1398_v51  ;;  %v1338_v38 = vmax.f32 %v1225_v31, %v1233_v24  ;;  %v1351_v39 = vmax.f32 %v1226_v19, %v1234_v25 }
 0x229   : > { %v2560_v55 = vsel %vm450_vm1, %v1405_v54, %v1407_v46  ;;  %v1243_v32 = vmax.f32 %v1178_v48, 0.0  ;;  %v1244_v33 = vmax.f32 %v1207_v12, 0.0 }
 0x22b   : > { %v1119_v56 = vpop.f32.mrf.mxu2  ;;  %v1148_v57 = vpop.f32.mrf.mxu3  ;;  %v1365_v47 = vmax.f32 %v1364_v34, %v1243_v32  ;;  %v1378_v49 = vmax.f32 %v1377_v35, %v1244_v33 }
 0x22c   : > { %v1120_v26 = vadd.f32 %v1119_v56, %v2569_v5  ;;  %v1149_v27 = vadd.f32 %v1148_v57, %v2572_v6 }
 0x22e   : > { %v1179_v58 = vpop.f32.mrf.mxu0  ;;  %v1208_v59 = vpop.f32.mrf.mxu1  ;;  %v1241_v40 = vmax.f32 %v1120_v26, 0.0  ;;  %v1242_v41 = vmax.f32 %v1149_v27, 0.0 }
 0x22f   : > { %v1180_v11 = vadd.f32 %v1179_v58, %v2563_v0  ;;  %v1209_v29 = vadd.f32 %v1208_v59, %v2566_v1 }
 0x230   : > { %v1339_v57 = vmax.f32 %v1338_v38, %v1241_v40  ;;  %v1352_v58 = vmax.f32 %v1351_v39, %v1242_v41 }
 0x231   : > { %v1251_v44 = vmax.f32 %v1180_v11, 0.0  ;;  %v1252_v45 = vmax.f32 %v1209_v29, 0.0 }
 0x233   : > { %v1121_v60 = vpop.f32.mrf.mxu2  ;;  %v1150_v61 = vpop.f32.mrf.mxu3  ;;  %v1379_v7 = vmax.f32 %v1378_v49, %v1252_v45 }
 0x234   : > { %v1122_v50 = vadd.f32 %v1121_v60, %v2569_v5  ;;  %v1151_v51 = vadd.f32 %v1150_v61, %v2572_v6 }
 0x236   : > { %v1182_v62 = vpop.f32.mrf.mxu0  ;;  %v1211_v63 = vpop.f32.mrf.mxu1  ;;  %v1250_v61 = vmax.f32 %v1151_v51, 0.0 }
 0x237   : > { %v1183_v36 = vadd.f32 %v1182_v62, %v2563_v0  ;;  %v1212_v37 = vadd.f32 %v1211_v63, %v2566_v1  ;;  %v1366_v63 = vmax.f32 %v1365_v47, %v1251_v44 }
 0x238   : > { %v1353_v11 = vmax.f32 %v1352_v58, %v1250_v61 }
 0x239   : > { %v1259_v52 = vmax.f32 %v1183_v36, 0.0  ;;  %v1260_v53 = vmax.f32 %v1212_v37, 0.0 }
 0x23b   : > { %v1124_v3 = vpop.f32.mrf.mxu2  ;;  %v1153_v4 = vpop.f32.mrf.mxu3  ;;  %v1367_v16 = vmax.f32 %v1366_v63, %v1259_v52  ;;  %v1380_v17 = vmax.f32 %v1379_v7, %v1260_v53 }
 0x23c   : > { %v1125_v59 = vadd.f32 %v1124_v3, %v2569_v5  ;;  %v1154_v62 = vadd.f32 %v1153_v4, %v2572_v6 }
 0x23e   : > { %v1184_v2 = vpop.f32.mrf.mxu0  ;;  %v1213_v13 = vpop.f32.mrf.mxu1  ;;  %v1257_v12 = vmax.f32 %v1125_v59, 0.0  ;;  %v1258_v3 = vmax.f32 %v1154_v62, 0.0 }
 0x23f   : > { %v1185_v46 = vadd.f32 %v1184_v2, %v2563_v0  ;;  %v1214_v15 = vadd.f32 %v1213_v13, %v2566_v1  ;;  %v1249_v2 = vmax.f32 %v1122_v50, 0.0 }
 0x240   : > { %v1354_v34 = vmax.f32 %v1353_v11, %v1258_v3 }
 0x241   : > { %v1267_v8 = vmax.f32 %v1185_v46, 0.0  ;;  %v1268_v9 = vmax.f32 %v1214_v15, 0.0  ;;  %v1340_v20 = vmax.f32 %v1339_v57, %v1249_v2 }
 0x243   : > { %v1126_v30 = vpop.f32.mrf.mxu2  ;;  %v1155_v18 = vpop.f32.mrf.mxu3  ;;  %v1368_v25 = vmax.f32 %v1367_v16, %v1267_v8  ;;  %v1381_v26 = vmax.f32 %v1380_v17, %v1268_v9  ;;  %v1341_v33 = vmax.f32 %v1340_v20, %v1257_v12 }
 0x244   : > { %v1127_v13 = vadd.f32 %v1126_v30, %v2569_v5  ;;  %v1156_v14 = vadd.f32 %v1155_v18, %v2572_v6 }
 0x246   : > { %v1187_v42 = vpop.f32.mrf.mxu0  ;;  %v1216_v43 = vpop.f32.mrf.mxu1  ;;  %v1265_v29 = vmax.f32 %v1127_v13, 0.0  ;;  %v1266_v30 = vmax.f32 %v1156_v14, 0.0 }
 0x247   : > { %v1188_v54 = vadd.f32 %v1187_v42, %v2563_v0  ;;  %v1217_v56 = vadd.f32 %v1216_v43, %v2566_v1 }
 0x248   : > { %v1342_v41 = vmax.f32 %v1341_v33, %v1265_v29 }
 0x249   : > { %v1275_v21 = vmax.f32 %v1188_v54, 0.0  ;;  %v1276_v48 = vmax.f32 %v1217_v56, 0.0 }
 0x24b   : > { %v1129_v10 = vpop.f32.mrf.mxu2  ;;  %v1158_v60 = vpop.f32.mrf.mxu3  ;;  %v1369_v18 = vmax.f32 %v1368_v25, %v1275_v21  ;;  %v1382_v31 = vmax.f32 %v1381_v26, %v1276_v48 }
 0x24c   : > { %v1130_v4 = vadd.f32 %v1129_v10, %v2569_v5  ;;  %v1159_v22 = vadd.f32 %v1158_v60, %v2572_v6 }
 0x24e   : > { %v1189_v23 = vpop.f32.mrf.mxu0  ;;  %v1218_v24 = vpop.f32.mrf.mxu1  ;;  %v1273_v35 = vmax.f32 %v1130_v4, 0.0  ;;  %v1274_v36 = vmax.f32 %v1159_v22, 0.0  ;;  %v1285_v4 = vld [vmem:[#allocation2] sm:$0xff] }
 0x24f   : > { %v1190_v27 = vadd.f32 %v1189_v23, %v2563_v0  ;;  %v1219_v28 = vadd.f32 %v1218_v24, %v2566_v1  ;;  %v1355_v0 = vmax.f32 %v1354_v34, %v1266_v30 }
 0x250   : > { %v1343_v45 = vmax.f32 %v1342_v41, %v1273_v35 }
 0x251   : > { %v1283_v19 = vmax.f32 %v1190_v27, 0.0  ;;  %v1284_v32 = vmax.f32 %v1219_v28, 0.0  ;;  %v1356_v46 = vmax.f32 %v1355_v0, %v1274_v36 }
 0x253   : > { %v1370_v37 = vmax.f32 %v1369_v18, %v1283_v19  ;;  %v1383_v38 = vmax.f32 %v1382_v31, %v1284_v32  ;;  %v1131_v39 = vpop.f32.mrf.mxu2  ;;  %v1160_v40 = vpop.f32.mrf.mxu3 }
 0x254   : > { %v1132_v1 = vadd.f32 %v1131_v39, %v2569_v5  ;;  %v1161_v42 = vadd.f32 %v1160_v40, %v2572_v6 }
 0x255   : > { %v1371_v43 = vrot.slane %v1370_v37, 4  ;;  %v1384_v44 = vrot.slane %v1383_v38, 4 }
 0x256   : > { %v1281_v15 = vmax.f32 %v1132_v1, 0.0  ;;  %v1282_v47 = vmax.f32 %v1161_v42, 0.0 }
 0x257   : > { %v1372_v49 = vmax.f32 %v1370_v37, %v1371_v43  ;;  %v1385_v50 = vmax.f32 %v1383_v38, %v1384_v44 }
 0x258   : > { %v1344_v51 = vmax.f32 %v1343_v45, %v1281_v15  ;;  %v1357_v52 = vmax.f32 %v1356_v46, %v1282_v47 }
 0x259   : > { %v1373_v53 = vrot.slane %v1372_v49, 2  ;;  %v1386_v54 = vrot.slane %v1385_v50, 2 }
 0x25a   : > { %v1345_v56 = vrot.slane %v1344_v51, 4  ;;  %v1358_v57 = vrot.slane %v1357_v52, 4 }
 0x25b   : > { %v1374_v58 = vmax.f32 %v1372_v49, %v1373_v53  ;;  %v1387_v59 = vmax.f32 %v1385_v50, %v1386_v54 }
 0x25c   : > { %v1346_v62 = vmax.f32 %v1344_v51, %v1345_v56  ;;  %v1359_v5 = vmax.f32 %v1357_v52, %v1358_v57 }
 0x25d   : > { %v1375_v63 = vrot.slane %v1374_v58, 1  ;;  %v1388_v6 = vrot.slane %v1387_v59, 1 }
 0x25e   : > { %v1347_v7 = vrot.slane %v1346_v62, 2  ;;  %v1360_v8 = vrot.slane %v1359_v5, 2 }
 0x25f   : > { %v1376_v9 = vmax.f32 %v1374_v58, %v1375_v63  ;;  %v1389_v10 = vmax.f32 %v1387_v59, %v1388_v6 }
 0x260   : > { %v1348_v60 = vmax.f32 %v1346_v62, %v1347_v7  ;;  %v1361_v2 = vmax.f32 %v1359_v5, %v1360_v8 }
 0x261   : > { %v1403_v14 = vrot.slane %v1376_v9, 2  ;;  %v1404_v16 = vrot.slane %v1389_v10, 1 }
 0x262   : > { %v1349_v61 = vrot.slane %v1348_v60, 1  ;;  %v1362_v13 = vrot.slane %v1361_v2, 1 }
 0x263   : > { %v1412_v3 = vsel %vm1411_vm5, %v1403_v14, %v1404_v16 }
 0x264   : > { %v1350_v17 = vmax.f32 %v1348_v60, %v1349_v61  ;;  %v1363_v21 = vmax.f32 %v1361_v2, %v1362_v13 }
 0x266   : > { %v1401_v48 = vrot.slane %v1350_v17, 4  ;;  %v1402_v12 = vrot.slane %v1363_v21, 3 }
 0x268   : > { %v1410_v22 = vsel %vm1409_vm6, %v1401_v48, %v1402_v12 }
 0x269   : > { %v1414_v23 = vsel %vm1413_vm7, %v1410_v22, %v1412_v3  ;;  %1423 = sbr.rel (%p1875_p11) target bundleno = 630 (0x276), region = 80 }
 0x26a   : > { %v1416_v24 = vsel %vm1415_vm8, %v2560_v55, %v1414_v23 }
 0x26b   : > { %v1418_v25 = vmax.f32 %v1285_v4, %v1416_v24 }
 0x26d   : > { %1419 = vst [vmem:[#allocation2] sm:$0xff] %v1418_v25 }
 0x274   : > { %v1424_v26 = vld [vmem:[#allocation2] sm:$0xff] }
 0x275   : > { %1425 = vst [vmem:[%s2457_s22] sm:$0xff] %v1424_v26 }
 0x276 PF: > { %s21_s28 = sadd.s32 1, %s2298_s28   ;;  %s2637_s24 = smov %s2290_s26 }
 0x277   : > { %p18_p12 = scmp.ge.s32.totalorder %s21_s28, 10   ;;  %s2638_s25 = smov %s2294_s27 }
 0x278   : > { %s2639_s26 = smov %s2642_s20  ;;  %s2640_s27 = smov %s2646_s21 }
 0x279   :  { %20 = sbr.rel (!%p18_p12) target bundleno = 8 (0x8), region = 111 }
 0x27e   :  { %1445 = vsyncpa [#allocation4], 1 }
 0x27f   :  { %1447 = vsyncpa [#allocation4 + $0x1], 1 }
 0x280   :  { %1448 = vsyncpa [#allocation6], 1 }
 0x281   :  { %1449 = vsyncpa [#allocation9], 1 }
 0x282   :  { %1450 = vsyncpa [#allocation12], 1 }

// kernel: pointnetfeat_forward.5
= control target key start
LH: loop header
LB: loop body
LE: loop exit
PB: predicated region body
PF: predicated region fallthrough
CT: control target
= control target key end

     0   :  { %12 = vsyncpa [#allocation4], 0  ;;  %s2472_s0 = inlined_call_operand.vmem [shape: bf16[2,256,3], index: 0, kind: input, shape index: {}]   ;;  %s2473_s1 = inlined_call_operand.vmem [shape: bf16[2,3,64], index: 1, kind: input, shape index: {}]   ;;  %s2474_s2 = inlined_call_operand.hbm [shape: f32[1,64], index: 2, kind: input, shape index: {}]   ;;  %s2475_s3 = inlined_call_operand.hbm [shape: bf16[64,128], index: 3, kind: input, shape index: {}]   ;;  %s2476_s4 = inlined_call_operand.hbm [shape: f32[1,128], index: 4, kind: input, shape index: {}]   ;;  %s2477_s5 = inlined_call_operand.hbm [shape: bf16[128,1024], index: 5, kind: input, shape index: {}]   ;;  %s2478_s6 = inlined_call_operand.hbm [shape: f32[1,1024], index: 6, kind: input, shape index: {}]   ;;  %s2479_s7 = inlined_call_operand.vmem [shape: f32[2,1,1024], index: 7, kind: output, shape index: {}]  }
   0x1   :  { %13 = vsyncpa [#allocation6], 0 }
   0x2   :  { %14 = vsyncpa [#allocation9], 0  ;;  %s2246_s24 = smov 0   ;;  %s2248_s25 = smov 0  }
   0x3   :  { %s2250_s26 = smov 0   ;;  %s2252_s27 = smov 0  }
   0x4   :  { %s2254_s28 = smov 0  }
   0x5 LB: > { %s245_s8 = sshll.u32 %s2475_s3, 4  ;;  %s1497_s9 = sadd.s32 4294967295, %s2193_s28   ;;  %s2193_s28 = sphi %s2254_s28, %s20_s28   ;;  %s2189_s27 = sphi %s2252_s27, %s2486_s27   ;;  %s2185_s26 = sphi %s2250_s26, %s2485_s26   ;;  %s2181_s25 = sphi %s2248_s25, %s2484_s25   ;;  %s2177_s24 = sphi %s2246_s24, %s2483_s24   ;;  %s246_s8 = int_to_ptr.hbm [resolvable:$true] %s245_s8 }
   0x6   : > { %p1499_p0 = scmp.ge.s32.totalorder %s2193_s28, 1  ;;  %p222_p1 = scmp.lt.s32.totalorder %s2193_s28, 9 }
   0x7   : > { %p2277_p2 = scmp.eq.s32.totalorder %s1497_s9, 0  ;;  %s2195_s12 = smov [#allocation5]  }
   0x8   : > { %p2281_p3 = pnand %p1499_p0, %p222_p1  ;;  %s247_s13 = sshll.u32 %s2195_s12, 4  ;;  %s248_s13 = int_to_ptr.vmem [resolvable:$true] %s247_s13 }
   0x9   : > { %s271_s16 = sshll.u32 %s2477_s5, 4  ;;  %s2196_s18 = smov [#allocation8]   ;;  %s272_s16 = int_to_ptr.hbm [resolvable:$true] %s271_s16 }
   0xa   : > { %p1914_p4 = pneg %p2281_p3  ;;  %s273_s19 = sshll.u32 %s2196_s18, 4  ;;  %s274_s19 = int_to_ptr.vmem [resolvable:$true] %s273_s19 }
   0xb   : > { %s2197_s20 = smov 64   ;;  %s2198_s21 = smov 4  }
   0xc   : > { %p2292_p5 = pnand %p2277_p2, %p1914_p4  ;;  %s2199_s22 = smov 512  }
   0xd   : > { %s2200_s23 = smov 32   ;;  %s29_s29 = sadd.s32 1, %s2185_s26 }
   0xe   : > { %1920 = dma.hbm_to_vmem [thread:$0]  (!%p2292_p5), %s246_s8, 512, %s248_s13, [#allocation6], %s2197_s20, %s2197_s20, %s2198_s21  }
   0xf   : > { %1926 = dma.hbm_to_vmem [thread:$0]  (!%p2292_p5), %s272_s16, 8192, %s274_s19, [#allocation9], %s2199_s22, %s2199_s22, %s2200_s23  }
  0x10   : > { %p30_p6 = scmp.ge.s32.totalorder %s29_s29, 4  ;;  %s32_s30 = sadd.s32 1, %s2189_s27 }
  0x11   : > { %s234_s14 = sshll.u32 %s2474_s2, 4  ;;  %s2201_s15 = smov [#allocation3]   ;;  %s235_s14 = int_to_ptr.hbm [resolvable:$true] %s234_s14 }
  0x12   : > { %s2488_s29 = smov (%p30_p6, %s29_s29), 0  ;;  %s2490_s30 = smov (!%p30_p6, %s32_s30), %s2189_s27 }
  0x13   : > { %s236_s18 = sshll.u32 %s2201_s15, 4  ;;  %p34_p7 = scmp.ge.s32.totalorder %s2490_s30, 2  ;;  %s237_s18 = int_to_ptr.vmem [resolvable:$true] %s236_s18 }
  0x14   : > { %1917 = dma.hbm_to_vmem [thread:$0]  (!%p2292_p5), %s235_s14, 16, %s237_s18, [#allocation4]  }
  0x15   : > { %s2492_s30 = smov (%p34_p7, %s2490_s30), 0  ;;  %s260_s16 = sshll.u32 %s2476_s4, 4  ;;  %s261_s16 = int_to_ptr.hbm [resolvable:$true] %s260_s16 }
  0x16   : > { %s2202_s19 = smov [#allocation7]   ;;  %s286_s23 = sshll.u32 %s2478_s6, 4  ;;  %s287_s23 = int_to_ptr.hbm [resolvable:$true] %s286_s23 }
  0x17   : > { %s262_s20 = sshll.u32 %s2202_s19, 4  ;;  %s2203_s9 = smov [#allocation10]   ;;  %s263_s20 = int_to_ptr.vmem [resolvable:$true] %s262_s20 }
  0x18   : > { %1923 = dma.hbm_to_vmem [thread:$0]  (!%p2292_p5), %s261_s16, 16, %s263_s20, [#allocation6]  }
  0x19   : > { %s288_s12 = sshll.u32 %s2203_s9, 4  ;;  %321 = sbr.rel (%p2281_p3) target bundleno = 621 (0x26d), region = 48  ;;  %s289_s12 = int_to_ptr.vmem [resolvable:$true] %s288_s12 }
  0x1a   : > { %1929 = dma.hbm_to_vmem [thread:$0]  (!%p2292_p5), %s287_s23, 128, %s289_s12, [#allocation9]  }
  0x1e   : > { %2164 = dma.done.wait (%p2277_p2), [#allocation4], 16  }
  0x1f   : > { %2166 = vsyncadd (%p2277_p2), [#allocation4], 4294967280 }
  0x20   : > { %2168 = dma.done.wait (%p2277_p2), [#allocation6], 528  }
  0x21   : > { %2170 = vsyncadd (%p2277_p2), [#allocation6], 4294966768 }
  0x22   : > { %2172 = dma.done.wait (%p2277_p2), [#allocation9], 8320  }
  0x23   : > { %2174 = vsyncadd (%p2277_p2), [#allocation9], 4294958976  ;;  %s1512_s11 = sshll.u32 %s2177_s24, 3  ;;  %p382_p8 = scmp.lt.s32.totalorder %s2181_s25, 1 }
  0x24   : > { %p384_p9 = scmp.lt.s32.totalorder %s1512_s11, 31  ;;  %p1517_p10 = scmp.ne.s32.totalorder %s2177_s24, 0 }
  0x25   : > { %s2494_s25 = smov (!%p382_p8, %s2181_s25), 1 }
  0x26   : > { %s2496_s11 = smov (!%p384_p9, %s1512_s11), 31  ;;  %s1513_s17 = sshll.u32 %s2494_s25, 5 }
  0x27   : > { %s1515_s14 = sshll.u32 %s2494_s25, 1  ;;  %s387_s15 = sadd.s32 %s1513_s17, %s2496_s11 }
  0x28   : > { %s394_s13 = scalar_lea.vmem %s2473_s1, %s1515_s14  ;;  %s1514_s16 = sshll.u32 %s387_s15, 2 }
  0x29   : > { %s1516_s19 = sshll.u32 %s2494_s25, 3  ;;  %s389_s21 = scalar_lea.vmem %s2472_s0, %s1514_s16 }
  0x2a   : > { %s2348_s9 = scalar_lea.vmem %s2479_s7, %s1516_s19  ;;  %403 = sbr.rel (%p1517_p10) target bundleno = 49 (0x31), region = 72 }
  0x2f   : > { %v2204_v0 = vmov -inf  }
  0x30   : > { %404 = vst [vmem:[#allocation2] sm:$0xff] %v2204_v0 }
  0x31 PF: > { %v413_v1 = vld [vmem:[%s394_s13] sm:$0x3]  ;;  %vm451_vm0 = vcmask 1040384   ;;  %vm452_vm1 = vcmask 1041408   ;;  %v2205_v2 = vmov 65535   ;;  %v1819_v7 = vld [vmem:[%s389_s21 + $0x10] sm:$0xff] }
  0x32   : > { %v453_v3 = vsel %vm451_vm0, 4294967295, %v2205_v2  ;;  %v1817_v6 = vld [vmem:[%s389_s21] sm:$0xff]  ;;  %vm438_vm2 = vcmask 23552   ;;  %v1818_v8 = vld [vmem:[%s389_s21 + $0x8] sm:$0xff]  ;;  %v1820_v9 = vld [vmem:[%s389_s21 + $0x18] sm:$0xff]  ;;  %vm535_vm3 = vcmask 523264  }
  0x33   : > { %v454_v4 = vsel %vm452_vm1, %v453_v3, 0  ;;  %v1824_v10 = vld [vmem:[#allocation5 + $0x18] sm:$0xff]  ;;  %v1823_v11 = vld [vmem:[#allocation5 + $0x10] sm:$0xff]  ;;  %v1822_v12 = vld [vmem:[#allocation5 + $0x8] sm:$0xff]  ;;  %vm1344_vm4 = vcmask 1042434   ;;  %vm1349_vm5 = vcmask 1046534  }
  0x34   : > { %v456_v5 = vand.u32 %v454_v4, %v413_v1  ;;  %552 = vmatpush.bf16.msra.mxu1 %v1824_v10  ;;  %1890 = vmatpush.bf16.msra.mxu2 %v1824_v10  ;;  %v1821_v13 = vld [vmem:[#allocation5] sm:$0xff]  ;;  %v2353_v15 = vld [vmem:[#allocation3] ss:$0 sm:$0xff]  ;;  %v1792_v23 = vld [vmem:[#allocation8 + $0x1c8] sm:$0xf]  ;;  %vm1347_vm6 = vcmask 1044484  }
  0x35   : > { %v1784_v17 = vld [vmem:[#allocation8 + $0x1c0] sm:$0xf]  ;;  %v1881_v19 = vld [vmem:[#allocation8 + $0x1c4] sm:$0xf]  ;;  %v1886_v24 = vld [vmem:[#allocation8 + $0x1e4] sm:$0xf0] }
  0x36   : > { %465 = vmatpush.bf16.msra.mxu0 %v456_v5  ;;  %1889 = vmatpush.bf16.msra.mxu3 %v456_v5  ;;  %v1885_v18 = vld [vmem:[#allocation8 + $0x1dc] sm:$0xf0]  ;;  %v1786_v22 = vld [vmem:[#allocation8 + $0x1e0] sm:$0xf0]  ;;  %v1793_v27 = vor.u32 %v1886_v24, %v1792_v23  ;;  %v1882_v28 = vld [vmem:[#allocation8 + $0x1cc] sm:$0xf] }
  0x37   : > { %v1785_v21 = vor.u32 %v1885_v18, %v1784_v17  ;;  %v1789_v26 = vor.u32 %v1881_v19, %v1786_v22  ;;  %v1794_v29 = vld [vmem:[#allocation8 + $0x1e8] sm:$0xf0]  ;;  %v1752_v30 = vld [vmem:[#allocation8 + $0x180] sm:$0xf]  ;;  %v1873_v34 = vld [vmem:[#allocation8 + $0x184] sm:$0xf] }
  0x38   : > { %553 = vmatpush.bf16.msra.mxu1 %v1823_v11  ;;  %1891 = vmatpush.bf16.msra.mxu2 %v1823_v11  ;;  %v1797_v32 = vor.u32 %v1882_v28, %v1794_v29  ;;  %v1877_v33 = vld [vmem:[#allocation8 + $0x19c] sm:$0xf0]  ;;  %v1754_v35 = vld [vmem:[#allocation8 + $0x1a0] sm:$0xf0]  ;;  %v1760_v40 = vld [vmem:[#allocation8 + $0x188] sm:$0xf] }
  0x39   : > { %1534 = vmatmul.msk.bf16.vlgmr.msra.gmra.mxu0 %vm438_vm2, %v1817_v6  ;;  %1536 = vmatmul.msk.bf16.vlgmr.msra.gmra.mxu3 %vm438_vm2, %v1819_v7  ;;  %v1753_v38 = vor.u32 %v1877_v33, %v1752_v30  ;;  %v1757_v39 = vor.u32 %v1873_v34, %v1754_v35  ;;  %v1878_v41 = vld [vmem:[#allocation8 + $0x1a4] sm:$0xf0]  ;;  %v1874_v43 = vld [vmem:[#allocation8 + $0x18c] sm:$0xf]  ;;  %v1720_v45 = vld [vmem:[#allocation8 + $0x140] sm:$0xf] }
  0x3a   : > { %1020 = vmatpush.bf16.msrb.mxu3 %v1789_v26  ;;  %1049 = vmatpush.bf16.msrb.mxu0 %v1793_v27  ;;  %v1761_v42 = vor.u32 %v1878_v41, %v1760_v40  ;;  %v1762_v44 = vld [vmem:[#allocation8 + $0x1a8] sm:$0xf0]  ;;  %v1869_v49 = vld [vmem:[#allocation8 + $0x15c] sm:$0xf0]  ;;  %v1865_v50 = vld [vmem:[#allocation8 + $0x144] sm:$0xf] }
  0x3b   : > { %v1765_v48 = vor.u32 %v1874_v43, %v1762_v44  ;;  %v1721_v51 = vor.u32 %v1869_v49, %v1720_v45  ;;  %v1722_v52 = vld [vmem:[#allocation8 + $0x160] sm:$0xf0]  ;;  %v1728_v53 = vld [vmem:[#allocation8 + $0x148] sm:$0xf]  ;;  %v1866_v58 = vld [vmem:[#allocation8 + $0x14c] sm:$0xf] }
  0x3c   : > { %554 = vmatpush.bf16.msra.mxu1 %v1822_v12  ;;  %1892 = vmatpush.bf16.msra.mxu2 %v1822_v12  ;;  %v1870_v54 = vld [vmem:[#allocation8 + $0x164] sm:$0xf0]  ;;  %v1725_v56 = vor.u32 %v1865_v50, %v1722_v52  ;;  %v1730_v59 = vld [vmem:[#allocation8 + $0x168] sm:$0xf0]  ;;  %v1688_v60 = vld [vmem:[#allocation8 + $0x100] sm:$0xf] }
  0x3d   : > { %v1729_v57 = vor.u32 %v1870_v54, %v1728_v53  ;;  %v1733_v62 = vor.u32 %v1866_v58, %v1730_v59  ;;  %v1861_v63 = vld [vmem:[#allocation8 + $0x11c] sm:$0xf0]  ;;  %v1857_v0 = vld [vmem:[#allocation8 + $0x104] sm:$0xf]  ;;  %v1696_v3 = vld [vmem:[#allocation8 + $0x108] sm:$0xf] }
  0x3e   : > { %1021 = vmatpush.bf16.msrb.mxu3 %v1757_v39  ;;  %1050 = vmatpush.bf16.msrb.mxu0 %v1761_v42  ;;  %v1690_v1 = vld [vmem:[#allocation8 + $0x120] sm:$0xf0]  ;;  %v1862_v4 = vld [vmem:[#allocation8 + $0x124] sm:$0xf0]  ;;  %v1858_v5 = vld [vmem:[#allocation8 + $0x10c] sm:$0xf]  ;;  %v1689_v7 = vor.u32 %v1861_v63, %v1688_v60 }
  0x3f   : > { %v1693_v10 = vor.u32 %v1857_v0, %v1690_v1  ;;  %v1656_v11 = vld [vmem:[#allocation8 + $0xc0] sm:$0xf]  ;;  %v1658_v17 = vld [vmem:[#allocation8 + $0xe0] sm:$0xf0]  ;;  %v1664_v34 = vld [vmem:[#allocation8 + $0xc8] sm:$0xf] }
  0x40   : > { %555 = vmatpush.bf16.msra.mxu1 %v1821_v13  ;;  %1893 = vmatpush.bf16.msra.mxu2 %v1821_v13  ;;  %v1853_v12 = vld [vmem:[#allocation8 + $0xdc] sm:$0xf0]  ;;  %v1697_v13 = vor.u32 %v1862_v4, %v1696_v3  ;;  %v1854_v35 = vld [vmem:[#allocation8 + $0xe4] sm:$0xf0]  ;;  %v1841_v42 = vld [vmem:[#allocation8 + $0x84] sm:$0xf] }
  0x41   : > { %v1657_v19 = vor.u32 %v1853_v12, %v1656_v11  ;;  %v1624_v40 = vld [vmem:[#allocation8 + $0x80] sm:$0xf]  ;;  %v1626_v44 = vld [vmem:[#allocation8 + $0xa0] sm:$0xf0]  ;;  %v1632_v45 = vld [vmem:[#allocation8 + $0x88] sm:$0xf] }
  0x42   : > { %1022 = vmatpush.bf16.msrb.mxu3 %v1725_v56  ;;  %1051 = vmatpush.bf16.msrb.mxu0 %v1729_v57  ;;  %v1845_v41 = vld [vmem:[#allocation8 + $0x9c] sm:$0xf0]  ;;  %v1634_v49 = vld [vmem:[#allocation8 + $0xa8] sm:$0xf0]  ;;  %v1833_v53 = vld [vmem:[#allocation8 + $0x44] sm:$0xf] }
  0x43   : > { %v1625_v43 = vor.u32 %v1845_v41, %v1624_v40  ;;  %v1592_v50 = vld [vmem:[#allocation8 + $0x40] sm:$0xf]  ;;  %v1594_v54 = vld [vmem:[#allocation8 + $0x60] sm:$0xf0]  ;;  %v1600_v57 = vld [vmem:[#allocation8 + $0x48] sm:$0xf] }
  0x44   : > { %991 = vmatpush.bf16.msrb.mxu2 %v1785_v21  ;;  %1078 = vmatpush.bf16.msrb.mxu1 %v1797_v32  ;;  %v1837_v52 = vld [vmem:[#allocation8 + $0x5c] sm:$0xf0]  ;;  %v1597_v56 = vor.u32 %v1833_v53, %v1594_v54  ;;  %v1838_v58 = vld [vmem:[#allocation8 + $0x64] sm:$0xf0]  ;;  %v1834_v59 = vld [vmem:[#allocation8 + $0x4c] sm:$0xf] }
  0x45   : > { %v1601_v60 = vor.u32 %v1838_v58, %v1600_v57  ;;  %v1560_v63 = vld [vmem:[#allocation8] sm:$0xf]  ;;  %v1825_v1 = vld [vmem:[#allocation8 + $0x4] sm:$0xf]  ;;  %v1568_v4 = vld [vmem:[#allocation8 + $0x8] sm:$0xf] }
  0x46   : > { %1023 = vmatpush.bf16.msrb.mxu3 %v1693_v10  ;;  %1052 = vmatpush.bf16.msrb.mxu0 %v1697_v13  ;;  %v1829_v0 = vld [vmem:[#allocation8 + $0x1c] sm:$0xf0]  ;;  %v1562_v3 = vld [vmem:[#allocation8 + $0x20] sm:$0xf0]  ;;  %v1800_v11 = vld [vmem:[#allocation8 + $0x1d0] sm:$0xf] }
  0x47   : > { %v1887_v12 = vld [vmem:[#allocation8 + $0x1ec] sm:$0xf0]  ;;  %v1883_v13 = vld [vmem:[#allocation8 + $0x1d4] sm:$0xf]  ;;  %v1712_v58 = vld [vmem:[#allocation8 + $0x118] sm:$0xf] }
  0x48   : > { %992 = vmatpush.bf16.msrb.mxu2 %v1753_v38  ;;  %1079 = vmatpush.bf16.msrb.mxu1 %v1765_v48  ;;  %v1666_v38 = vld [vmem:[#allocation8 + $0xe8] sm:$0xf0]  ;;  %v1738_v41 = vld [vmem:[#allocation8 + $0x170] sm:$0xf0]  ;;  %vm1351_vm7 = vcmask 1045508   ;;  %vm1353_vm8 = vcmask 1043456  }
  0x49   : > { %1535 = vmatmul.msk.bf16.gmra.mxu0 %vm438_vm2, %v1818_v8  ;;  %1537 = vmatmul.msk.bf16.gmra.mxu3 %vm438_vm2, %v1820_v9  ;;  %v1698_v8 = vld [vmem:[#allocation8 + $0x128] sm:$0xf0]  ;;  %v1706_v53 = vld [vmem:[#allocation8 + $0x130] sm:$0xf0]  ;;  %p1814_p11 = scmp.ne.s32.totalorder %s2177_s24, 3 }
  0x4a   : > { %v1842_v48 = vld [vmem:[#allocation8 + $0x8c] sm:$0xf] }
  0x4c   : > { %993 = vmatpush.bf16.msrb.mxu2 %v1721_v51  ;;  %1080 = vmatpush.bf16.msrb.mxu1 %v1733_v62  ;;  %v1637_v51 = vor.u32 %v1842_v48, %v1634_v49  ;;  %v2370_v48 = vld [vmem:[#allocation7] ss:$0 sm:$0xff] }
  0x50   : > { %994 = vmatpush.bf16.msrb.mxu2 %v1689_v7 }
  0x54   : > { %995 = vmatpush.bf16.msrb.mxu2 %v1657_v19  ;;  %v1888_v19 = vld [vmem:[#allocation8 + $0x1f4] sm:$0xf0] }
  0x58   : > { %996 = vmatpush.bf16.msrb.mxu2 %v1625_v43  ;;  %v1872_v43 = vld [vmem:[#allocation8 + $0x174] sm:$0xf0] }
  0xb6   : > { %v467_v14 = vpop.f32.mrf.mxu0 }
  0xb7   : > { %v468_v16 = vadd.f32 %v2353_v15, %v467_v14  ;;  %v1701_v14 = vor.u32 %v1858_v5, %v1698_v8  ;;  %v1830_v5 = vld [vmem:[#allocation8 + $0x24] sm:$0xf0]  ;;  %v1826_v8 = vld [vmem:[#allocation8 + $0xc] sm:$0xf] }
  0xb8   : > { %v1569_v7 = vor.u32 %v1830_v5, %v1568_v4  ;;  %v1672_v4 = vld [vmem:[#allocation8 + $0xd0] sm:$0xf] }
  0xb9   : > { %v487_v36 = vmax.f32 %v468_v16, 0.0  ;;  %v1849_v16 = vld [vmem:[#allocation8 + $0xc4] sm:$0xf]  ;;  %1081 = vmatpush.bf16.msrb.mxu1 %v1701_v14  ;;  %v1801_v14 = vor.u32 %v1887_v12, %v1800_v11  ;;  %v1855_v5 = vld [vmem:[#allocation8 + $0xec] sm:$0xf0] }
  0xbc   : > { %v477_v20 = vpop.f32.mrf.mxu3 }
  0xbd   : > { %v2357_v25 = vadd.f32 %v2353_v15, %v477_v20  ;;  %v1661_v20 = vor.u32 %v1849_v16, %v1658_v17  ;;  %v1802_v16 = vld [vmem:[#allocation8 + $0x1f0] sm:$0xf0] }
  0xbe   : > { %v469_v31 = vpop.f32.mrf.mxu0  ;;  %v1805_v17 = vor.u32 %v1883_v13, %v1802_v16  ;;  %v1852_v13 = vld [vmem:[#allocation8 + $0xdc] sm:$0xf]  ;;  %v1640_v16 = vld [vmem:[#allocation8 + $0x90] sm:$0xf] }
  0xbf   : > { %v470_v37 = vadd.f32 %v2353_v15, %v469_v31  ;;  %v491_v47 = vmax.f32 %v2357_v25, 0.0  ;;  %1024 = vmatpush.bf16.msrb.mxu3 %v1661_v20  ;;  %v1884_v20 = vld [vmem:[#allocation8 + $0x1dc] sm:$0xf] }
  0xc1   : > { %v488_v46 = vmax.f32 %v470_v37, 0.0  ;;  %v1665_v37 = vor.u32 %v1854_v35, %v1664_v34  ;;  %v1778_v34 = vld [vmem:[#allocation8 + $0x1b8] sm:$0xf0] }
  0xc3   : > { %v495_v55 = vpack.c.bf16 %v488_v46, %v487_v36  ;;  %v1850_v36 = vld [vmem:[#allocation8 + $0xcc] sm:$0xf]  ;;  %1053 = vmatpush.bf16.msrb.mxu0 %v1665_v37  ;;  %v1846_v46 = vld [vmem:[#allocation8 + $0xa4] sm:$0xf0]  ;;  %v1736_v37 = vld [vmem:[#allocation8 + $0x150] sm:$0xf] }
  0xc4   : > { %v479_v61 = vpop.f32.mrf.mxu3  ;;  %v1669_v39 = vor.u32 %v1850_v36, %v1666_v38  ;;  %v1871_v38 = vld [vmem:[#allocation8 + $0x16c] sm:$0xf0] }
  0xc5   : > { %1554 = vmatmul.msk.bf16.vlgmr.msra.gmra.mxu1 %vm535_vm3, %v495_v55  ;;  %v480_v2 = vadd.f32 %v2353_v15, %v479_v61  ;;  %v1593_v55 = vor.u32 %v1837_v52, %v1592_v50  ;;  %v1602_v61 = vld [vmem:[#allocation8 + $0x68] sm:$0xf0]  ;;  %v1737_v40 = vor.u32 %v1871_v38, %v1736_v37  ;;  %v1863_v50 = vld [vmem:[#allocation8 + $0x12c] sm:$0xf0] }
  0xc6   : > { %v472_v6 = vpop.f32.mrf.mxu0  ;;  %1082 = vmatpush.bf16.msrb.mxu1 %v1669_v39  ;;  %v1605_v62 = vor.u32 %v1834_v59, %v1602_v61  ;;  %v1867_v39 = vld [vmem:[#allocation8 + $0x154] sm:$0xf]  ;;  %v1864_v59 = vld [vmem:[#allocation8 + $0x134] sm:$0xf0]  ;;  %v1608_v37 = vld [vmem:[#allocation8 + $0x50] sm:$0xf] }
  0xc7   : > { %v492_v9 = vmax.f32 %v480_v2, 0.0  ;;  %v473_v22 = vadd.f32 %v2353_v15, %v472_v6  ;;  %997 = vmatpush.bf16.msrb.mxu2 %v1593_v55  ;;  %v1561_v2 = vor.u32 %v1829_v0, %v1560_v63  ;;  %v1565_v6 = vor.u32 %v1825_v1, %v1562_v3  ;;  %v1839_v38 = vld [vmem:[#allocation8 + $0x6c] sm:$0xf0] }
  0xc8   : > { %v1713_v61 = vor.u32 %v1864_v59, %v1712_v58 }
  0xc9   : > { %v497_v18 = vpack.c.bf16 %v492_v9, %v491_v47  ;;  %v489_v25 = vmax.f32 %v473_v22, 0.0  ;;  %v1633_v47 = vor.u32 %v1846_v46, %v1632_v45  ;;  %v1570_v9 = vld [vmem:[#allocation8 + $0x28] sm:$0xf0]  ;;  %v1810_v22 = vld [vmem:[#allocation8 + $0x1f8] sm:$0xf0] }
  0xca   : > { %1083 = vmatpush.bf16.msrb.mxu1 %v1637_v51  ;;  %v1573_v10 = vor.u32 %v1826_v8, %v1570_v9  ;;  %v1868_v46 = vld [vmem:[#allocation8 + $0x15c] sm:$0xf]  ;;  %v1859_v51 = vld [vmem:[#allocation8 + $0x114] sm:$0xf]  ;;  %v1680_v9 = vld [vmem:[#allocation8 + $0xd8] sm:$0xf] }
  0xcb   : > { %1556 = vmatmul.msk.bf16.vlgmr.msra.gmra.mxu2 %vm535_vm3, %v497_v18  ;;  %1054 = vmatpush.bf16.msrb.mxu0 %v1633_v47  ;;  %v1808_v18 = vld [vmem:[#allocation8 + $0x1d8] sm:$0xf]  ;;  %v1704_v47 = vld [vmem:[#allocation8 + $0x110] sm:$0xf]  ;;  %v1709_v54 = vor.u32 %v1859_v51, %v1706_v53  ;;  %v1674_v8 = vld [vmem:[#allocation8 + $0xf0] sm:$0xf0] }
  0xcc   : > { %v482_v21 = vpop.f32.mrf.mxu3  ;;  %998 = vmatpush.bf16.msrb.mxu2 %v1561_v2  ;;  %v1705_v52 = vor.u32 %v1863_v50, %v1704_v47  ;;  %v1576_v47 = vld [vmem:[#allocation8 + $0x10] sm:$0xf]  ;;  %v1827_v51 = vld [vmem:[#allocation8 + $0x14] sm:$0xf] }
  0xcd   : > { %v483_v27 = vadd.f32 %v2353_v15, %v482_v21  ;;  %v1809_v21 = vor.u32 %v1888_v19, %v1808_v18  ;;  %v1847_v18 = vld [vmem:[#allocation8 + $0xac] sm:$0xf0]  ;;  %v1843_v19 = vld [vmem:[#allocation8 + $0x94] sm:$0xf] }
  0xce   : > { %v474_v23 = vpop.f32.mrf.mxu0  ;;  %1084 = vmatpush.bf16.msrb.mxu1 %v1605_v62  ;;  %v1714_v62 = vld [vmem:[#allocation8 + $0x138] sm:$0xf0]  ;;  %v1831_v50 = vld [vmem:[#allocation8 + $0x2c] sm:$0xf0] }
  0xcf   : > { %v475_v24 = vadd.f32 %v2353_v15, %v474_v23  ;;  %v493_v30 = vmax.f32 %v483_v27, 0.0  ;;  %1055 = vmatpush.bf16.msrb.mxu0 %v1601_v60  ;;  %v1768_v23 = vld [vmem:[#allocation8 + $0x190] sm:$0xf]  ;;  %v1875_v27 = vld [vmem:[#allocation8 + $0x194] sm:$0xf]  ;;  %v1577_v53 = vor.u32 %v1831_v50, %v1576_v47 }
  0xd0   : > { %1107 = vmatpush.bf16.msra.mxu2 %v1801_v14  ;;  %v1860_v60 = vld [vmem:[#allocation8 + $0x11c] sm:$0xf] }
  0xd1   : > { %v490_v26 = vmax.f32 %v475_v24, 0.0  ;;  %v1879_v24 = vld [vmem:[#allocation8 + $0x1ac] sm:$0xf0]  ;;  %v1717_v1 = vor.u32 %v1860_v60, %v1714_v62  ;;  %v1682_v14 = vld [vmem:[#allocation8 + $0xf8] sm:$0xf0] }
  0xd2   : > { %1085 = vmatpush.bf16.msrb.mxu1 %v1573_v10  ;;  %v1856_v10 = vld [vmem:[#allocation8 + $0xf4] sm:$0xf0] }
  0xd3   : > { %v496_v28 = vpack.c.bf16 %v490_v26, %v489_v25  ;;  %1056 = vmatpush.bf16.msrb.mxu0 %v1569_v7  ;;  %v1813_v25 = vor.u32 %v1884_v20, %v1810_v22  ;;  %v1769_v26 = vor.u32 %v1879_v24, %v1768_v23  ;;  %v1673_v7 = vor.u32 %v1855_v5, %v1672_v4  ;;  %v1642_v22 = vld [vmem:[#allocation8 + $0xb0] sm:$0xf0]  ;;  %v1648_v23 = vld [vmem:[#allocation8 + $0x98] sm:$0xf] }
  0xd4   : > { %v484_v29 = vpop.f32.mrf.mxu3  ;;  %v1681_v12 = vor.u32 %v1856_v10, %v1680_v9  ;;  %v1848_v24 = vld [vmem:[#allocation8 + $0xb4] sm:$0xf0] }
  0xd5   : > { %1555 = vmatmul.msk.bf16.gmra.mxu1 %vm535_vm3, %v496_v28  ;;  %v485_v31 = vadd.f32 %v2353_v15, %v484_v29  ;;  %v1629_v15 = vor.u32 %v1841_v42, %v1626_v44  ;;  %v1770_v28 = vld [vmem:[#allocation8 + $0x1b0] sm:$0xf0]  ;;  %1108 = vmatpush.bf16.msra.mxu2 %v1769_v26  ;;  %v1744_v42 = vld [vmem:[#allocation8 + $0x158] sm:$0xf]  ;;  %v1741_v44 = vor.u32 %v1867_v39, %v1738_v41 }
  0xd6   : > { %v1773_v29 = vor.u32 %v1875_v27, %v1770_v28  ;;  %1194 = vmatpush.bf16.msra.mxu1 %v1813_v25  ;;  %v1745_v45 = vor.u32 %v1872_v43, %v1744_v42  ;;  %v1645_v25 = vor.u32 %v1843_v19, %v1642_v22  ;;  %v1649_v26 = vor.u32 %v1848_v24, %v1648_v23  ;;  %v1844_v27 = vld [vmem:[#allocation8 + $0x9c] sm:$0xf]  ;;  %v1835_v39 = vld [vmem:[#allocation8 + $0x54] sm:$0xf]  ;;  %v1616_v42 = vld [vmem:[#allocation8 + $0x58] sm:$0xf] }
  0xd7   : > { %v494_v32 = vmax.f32 %v485_v31, 0.0  ;;  %1025 = vmatpush.bf16.msrb.mxu3 %v1629_v15  ;;  %1165 = vmatpush.bf16.msra.mxu0 %v1809_v21  ;;  %v1880_v31 = vld [vmem:[#allocation8 + $0x1b4] sm:$0xf0]  ;;  %v1746_v15 = vld [vmem:[#allocation8 + $0x178] sm:$0xf0]  ;;  %v1641_v21 = vor.u32 %v1847_v18, %v1640_v16 }
  0xd8   : > { %v1749_v49 = vor.u32 %v1868_v46, %v1746_v15  ;;  %v1650_v28 = vld [vmem:[#allocation8 + $0xb8] sm:$0xf0]  ;;  %v1610_v41 = vld [vmem:[#allocation8 + $0x70] sm:$0xf0]  ;;  %v1840_v43 = vld [vmem:[#allocation8 + $0x74] sm:$0xf0] }
  0xd9   : > { %v498_v33 = vpack.c.bf16 %v494_v32, %v493_v30  ;;  %v1776_v30 = vld [vmem:[#allocation8 + $0x198] sm:$0xf]  ;;  %v1876_v32 = vld [vmem:[#allocation8 + $0x19c] sm:$0xf]  ;;  %1109 = vmatpush.bf16.msra.mxu2 %v1737_v40  ;;  %v1609_v40 = vor.u32 %v1839_v38, %v1608_v37 }
  0xda   : > { %v1781_v35 = vor.u32 %v1876_v32, %v1778_v34  ;;  %v1836_v46 = vld [vmem:[#allocation8 + $0x5c] sm:$0xf] }
  0xdb   : > { %1557 = vmatmul.msk.bf16.gmra.mxu2 %vm535_vm3, %v498_v33  ;;  %1026 = vmatpush.bf16.msrb.mxu3 %v1597_v56  ;;  %v1777_v33 = vor.u32 %v1880_v31, %v1776_v30  ;;  %v1618_v15 = vld [vmem:[#allocation8 + $0x78] sm:$0xf0] }
  0xdc   : > { %1195 = vmatpush.bf16.msra.mxu1 %v1781_v35 }
  0xdd   : > { %1166 = vmatpush.bf16.msra.mxu0 %v1777_v33  ;;  %1110 = vmatpush.bf16.msra.mxu2 %v1705_v52  ;;  %v1578_v52 = vld [vmem:[#allocation8 + $0x30] sm:$0xf0] }
  0xdf   : > { %1027 = vmatpush.bf16.msrb.mxu3 %v1565_v6  ;;  %v1851_v6 = vld [vmem:[#allocation8 + $0xd4] sm:$0xf] }
  0xe0   : > { %1196 = vmatpush.bf16.msra.mxu1 %v1749_v49  ;;  %v1677_v11 = vor.u32 %v1851_v6, %v1674_v8  ;;  %v1621_v49 = vor.u32 %v1836_v46, %v1618_v15 }
  0xe1   : > { %1167 = vmatpush.bf16.msra.mxu0 %v1745_v45  ;;  %1111 = vmatpush.bf16.msra.mxu2 %v1673_v7  ;;  %v1617_v45 = vor.u32 %v1840_v43, %v1616_v42 }
  0xe3   : > { %1136 = vmatpush.bf16.msra.mxu3 %v1805_v17  ;;  %v1685_v17 = vor.u32 %v1852_v13, %v1682_v14 }
  0xe4   : > { %1197 = vmatpush.bf16.msra.mxu1 %v1717_v1 }
  0xe5   : > { %1168 = vmatpush.bf16.msra.mxu0 %v1713_v61  ;;  %1112 = vmatpush.bf16.msra.mxu2 %v1641_v21  ;;  %v1586_v61 = vld [vmem:[#allocation8 + $0x38] sm:$0xf0] }
  0xe7   : > { %1137 = vmatpush.bf16.msra.mxu3 %v1773_v29  ;;  %v1653_v29 = vor.u32 %v1844_v27, %v1650_v28 }
  0xe8   : > { %1198 = vmatpush.bf16.msra.mxu1 %v1685_v17 }
  0xe9   : > { %1169 = vmatpush.bf16.msra.mxu0 %v1681_v12  ;;  %1113 = vmatpush.bf16.msra.mxu2 %v1609_v40 }
  0xeb   : > { %1138 = vmatpush.bf16.msra.mxu3 %v1741_v44  ;;  %v1613_v44 = vor.u32 %v1835_v39, %v1610_v41 }
  0xec   : > { %1199 = vmatpush.bf16.msra.mxu1 %v1653_v29 }
  0xed   : > { %1170 = vmatpush.bf16.msra.mxu0 %v1649_v26  ;;  %1114 = vmatpush.bf16.msra.mxu2 %v1577_v53 }
  0xef   : > { %1139 = vmatpush.bf16.msra.mxu3 %v1709_v54  ;;  %v1581_v54 = vor.u32 %v1827_v51, %v1578_v52 }
  0xf0   : > { %1200 = vmatpush.bf16.msra.mxu1 %v1621_v49 }
  0xf1   : > { %1171 = vmatpush.bf16.msra.mxu0 %v1617_v45 }
  0xf3   : > { %1140 = vmatpush.bf16.msra.mxu3 %v1677_v11  ;;  %v2400_v11 = vld [vmem:[#allocation10] sm:$0xff] }
  0xf4   : > { %v2406_v12 = vperm.slane %v2400_v11, 3  ;;  %v2413_v22 = vperm.slane %v2400_v11, 0  ;;  %v2416_v23 = vperm.slane %v2400_v11, 1 }
  0xf7   : > { %1141 = vmatpush.bf16.msra.mxu3 %v1645_v25 }
  0xfb   : > { %1142 = vmatpush.bf16.msra.mxu3 %v1613_v44 }
  0xff   : > { %1143 = vmatpush.bf16.msra.mxu3 %v1581_v54 }
 0x142   : > { %v557_v36 = vpop.f32.mrf.mxu1 }
 0x143   : > { %v558_v55 = vadd.f32 %v2370_v48, %v557_v36 }
 0x145   : > { %v577_v63 = vmax.f32 %v558_v55, 0.0  ;;  %v1584_v55 = vld [vmem:[#allocation8 + $0x18] sm:$0xf] }
 0x14a   : > { %v559_v56 = vpop.f32.mrf.mxu1 }
 0x14b   : > { %v560_v57 = vadd.f32 %v2370_v48, %v559_v56  ;;  %v1832_v56 = vld [vmem:[#allocation8 + $0x34] sm:$0xf0] }
 0x14c   : > { %v1585_v60 = vor.u32 %v1832_v56, %v1584_v55 }
 0x14d   : > { %v578_v0 = vmax.f32 %v560_v57, 0.0  ;;  %v1828_v57 = vld [vmem:[#allocation8 + $0x1c] sm:$0xf] }
 0x14e   : > { %v567_v20 = vpop.f32.mrf.mxu2  ;;  %v1589_v62 = vor.u32 %v1828_v57, %v1586_v61  ;;  %1172 = vmatpush.bf16.msra.mxu0 %v1585_v60 }
 0x14f   : > { %v2374_v2 = vpack.c.bf16 %v578_v0, %v577_v63  ;;  %v568_v58 = vadd.f32 %v2370_v48, %v567_v20 }
 0x150   : > { %1201 = vmatpush.bf16.msra.mxu1 %v1589_v62 }
 0x151   : > { %999 = vmatmul.bf16.vlgmr.msrb.gmra.mxu2 %v2374_v2  ;;  %1028 = vmatmul.bf16.vlgmr.msrb.gmra.mxu3 %v2374_v2  ;;  %v581_v0 = vmax.f32 %v568_v58, 0.0 }
 0x152   : > { %1057 = vmatmul.bf16.vlgmr.msrb.gmra.mxu0 %v2374_v2  ;;  %1086 = vmatmul.bf16.vlgmr.msrb.gmra.mxu1 %v2374_v2  ;;  %v562_v3 = vpop.f32.mrf.mxu1 }
 0x153   : > { %v563_v30 = vadd.f32 %v2370_v48, %v562_v3 }
 0x155   : > { %v579_v33 = vmax.f32 %v563_v30, 0.0 }
 0x156   : > { %v569_v36 = vpop.f32.mrf.mxu2 }
 0x157   : > { %v570_v59 = vadd.f32 %v2370_v48, %v569_v36 }
 0x159   : > { %v582_v1 = vmax.f32 %v570_v59, 0.0 }
 0x15a   : > { %v564_v31 = vpop.f32.mrf.mxu1 }
 0x15b   : > { %v565_v32 = vadd.f32 %v2370_v48, %v564_v31  ;;  %v587_v3 = vpack.c.bf16 %v582_v1, %v581_v0 }
 0x15d   : > { %v580_v34 = vmax.f32 %v565_v32, 0.0 }
 0x15e   : > { %v572_v63 = vpop.f32.mrf.mxu2 }
 0x15f   : > { %v2382_v35 = vpack.c.bf16 %v580_v34, %v579_v33  ;;  %v573_v5 = vadd.f32 %v2370_v48, %v572_v63 }
 0x161   : > { %1004 = vmatmul.bf16.gmra.mxu2 %v2382_v35  ;;  %1033 = vmatmul.bf16.gmra.mxu3 %v2382_v35  ;;  %v583_v7 = vmax.f32 %v573_v5, 0.0 }
 0x162   : > { %1062 = vmatmul.bf16.gmra.mxu0 %v2382_v35  ;;  %1091 = vmatmul.bf16.gmra.mxu1 %v2382_v35 }
 0x166   : > { %v574_v4 = vpop.f32.mrf.mxu2 }
 0x167   : > { %v575_v6 = vadd.f32 %v2370_v48, %v574_v4 }
 0x169   : > { %v584_v8 = vmax.f32 %v575_v6, 0.0 }
 0x16b   : > { %v588_v9 = vpack.c.bf16 %v584_v8, %v583_v7 }
 0x171   : > { %1009 = vmatmul.bf16.gmra.mxu2 %v587_v3  ;;  %1038 = vmatmul.bf16.gmra.mxu3 %v587_v3 }
 0x172   : > { %1067 = vmatmul.bf16.gmra.mxu0 %v587_v3  ;;  %1096 = vmatmul.bf16.gmra.mxu1 %v587_v3 }
 0x181   : > { %1014 = vmatmul.bf16.gmra.mxu2 %v588_v9  ;;  %1043 = vmatmul.bf16.gmra.mxu3 %v588_v9 }
 0x182   : > { %1072 = vmatmul.bf16.gmra.mxu0 %v588_v9  ;;  %1101 = vmatmul.bf16.gmra.mxu1 %v588_v9 }
 0x191   : > { %1115 = vmatmul.bf16.vlgmr.msra.gmra.mxu2 %v2374_v2  ;;  %1144 = vmatmul.bf16.vlgmr.msra.gmra.mxu3 %v2374_v2 }
 0x192   : > { %1173 = vmatmul.bf16.vlgmr.msra.gmra.mxu0 %v2374_v2  ;;  %1202 = vmatmul.bf16.vlgmr.msra.gmra.mxu1 %v2374_v2  ;;  %v2403_v2 = vperm.slane %v2400_v11, 2 }
 0x1a1   : > { %1120 = vmatmul.bf16.gmra.mxu2 %v2382_v35  ;;  %1149 = vmatmul.bf16.gmra.mxu3 %v2382_v35 }
 0x1a2   : > { %1178 = vmatmul.bf16.gmra.mxu0 %v2382_v35  ;;  %1207 = vmatmul.bf16.gmra.mxu1 %v2382_v35 }
 0x1b1   : > { %1125 = vmatmul.bf16.gmra.mxu2 %v587_v3  ;;  %1154 = vmatmul.bf16.gmra.mxu3 %v587_v3 }
 0x1b2   : > { %1183 = vmatmul.bf16.gmra.mxu0 %v587_v3  ;;  %1212 = vmatmul.bf16.gmra.mxu1 %v587_v3 }
 0x1c1   : > { %1130 = vmatmul.bf16.gmra.mxu2 %v588_v9  ;;  %1159 = vmatmul.bf16.gmra.mxu3 %v588_v9 }
 0x1c2   : > { %1188 = vmatmul.bf16.gmra.mxu0 %v588_v9  ;;  %1217 = vmatmul.bf16.gmra.mxu1 %v588_v9 }
 0x1cf   : > { %v1058_v48 = vpop.f32.mrf.mxu0  ;;  %v1087_v10 = vpop.f32.mrf.mxu1 }
 0x1d0   : > { %v1059_v18 = vadd.f32 %v1058_v48, %v2403_v2  ;;  %v1088_v19 = vadd.f32 %v1087_v10, %v2406_v12 }
 0x1d4   : > { %v1000_v13 = vpop.f32.mrf.mxu2  ;;  %v1029_v14 = vpop.f32.mrf.mxu3 }
 0x1d5   : > { %v1001_v28 = vadd.f32 %v1000_v13, %v2413_v22  ;;  %v1030_v29 = vadd.f32 %v1029_v14, %v2416_v23 }
 0x1d7   : > { %v1060_v16 = vpop.f32.mrf.mxu0  ;;  %v1089_v17 = vpop.f32.mrf.mxu1 }
 0x1d8   : > { %v1061_v20 = vadd.f32 %v1060_v16, %v2403_v2  ;;  %v1090_v21 = vadd.f32 %v1089_v17, %v2406_v12 }
 0x1da   : > { %v1250_v24 = vmax.f32 %v1059_v18, %v1061_v20  ;;  %v1263_v25 = vmax.f32 %v1088_v19, %v1090_v21 }
 0x1dc   : > { %v1002_v26 = vpop.f32.mrf.mxu2  ;;  %v1031_v27 = vpop.f32.mrf.mxu3 }
 0x1dd   : > { %v1003_v30 = vadd.f32 %v1002_v26, %v2413_v22  ;;  %v1032_v31 = vadd.f32 %v1031_v27, %v2416_v23 }
 0x1df   : > { %v1224_v32 = vmax.f32 %v1001_v28, %v1003_v30  ;;  %v1237_v33 = vmax.f32 %v1030_v29, %v1032_v31  ;;  %v1063_v34 = vpop.f32.mrf.mxu0  ;;  %v1092_v35 = vpop.f32.mrf.mxu1 }
 0x1e0   : > { %v1064_v36 = vadd.f32 %v1063_v34, %v2403_v2  ;;  %v1093_v37 = vadd.f32 %v1092_v35, %v2406_v12 }
 0x1e2   : > { %v1251_v38 = vmax.f32 %v1250_v24, %v1064_v36  ;;  %v1264_v39 = vmax.f32 %v1263_v25, %v1093_v37 }
 0x1e4   : > { %v1005_v40 = vpop.f32.mrf.mxu2  ;;  %v1034_v41 = vpop.f32.mrf.mxu3 }
 0x1e5   : > { %v1006_v42 = vadd.f32 %v1005_v40, %v2413_v22  ;;  %v1035_v43 = vadd.f32 %v1034_v41, %v2416_v23 }
 0x1e7   : > { %v1225_v44 = vmax.f32 %v1224_v32, %v1006_v42  ;;  %v1238_v45 = vmax.f32 %v1237_v33, %v1035_v43  ;;  %v1065_v46 = vpop.f32.mrf.mxu0  ;;  %v1094_v15 = vpop.f32.mrf.mxu1 }
 0x1e8   : > { %v1066_v47 = vadd.f32 %v1065_v46, %v2403_v2  ;;  %v1095_v49 = vadd.f32 %v1094_v15, %v2406_v12 }
 0x1ea   : > { %v1252_v50 = vmax.f32 %v1251_v38, %v1066_v47  ;;  %v1265_v51 = vmax.f32 %v1264_v39, %v1095_v49 }
 0x1ec   : > { %v1007_v52 = vpop.f32.mrf.mxu2  ;;  %v1036_v53 = vpop.f32.mrf.mxu3 }
 0x1ed   : > { %v1008_v54 = vadd.f32 %v1007_v52, %v2413_v22  ;;  %v1037_v55 = vadd.f32 %v1036_v53, %v2416_v23 }
 0x1ef   : > { %v1226_v56 = vmax.f32 %v1225_v44, %v1008_v54  ;;  %v1239_v57 = vmax.f32 %v1238_v45, %v1037_v55  ;;  %v1068_v58 = vpop.f32.mrf.mxu0  ;;  %v1097_v59 = vpop.f32.mrf.mxu1 }
 0x1f0   : > { %v1069_v60 = vadd.f32 %v1068_v58, %v2403_v2  ;;  %v1098_v61 = vadd.f32 %v1097_v59, %v2406_v12 }
 0x1f2   : > { %v1253_v62 = vmax.f32 %v1252_v50, %v1069_v60  ;;  %v1266_v63 = vmax.f32 %v1265_v51, %v1098_v61 }
 0x1f4   : > { %v1010_v0 = vpop.f32.mrf.mxu2  ;;  %v1039_v1 = vpop.f32.mrf.mxu3 }
 0x1f5   : > { %v1011_v3 = vadd.f32 %v1010_v0, %v2413_v22  ;;  %v1040_v4 = vadd.f32 %v1039_v1, %v2416_v23 }
 0x1f7   : > { %v1227_v5 = vmax.f32 %v1226_v56, %v1011_v3  ;;  %v1240_v6 = vmax.f32 %v1239_v57, %v1040_v4  ;;  %v1070_v7 = vpop.f32.mrf.mxu0  ;;  %v1099_v8 = vpop.f32.mrf.mxu1 }
 0x1f8   : > { %v1071_v9 = vadd.f32 %v1070_v7, %v2403_v2  ;;  %v1100_v48 = vadd.f32 %v1099_v8, %v2406_v12 }
 0x1fa   : > { %v1254_v10 = vmax.f32 %v1253_v62, %v1071_v9  ;;  %v1267_v13 = vmax.f32 %v1266_v63, %v1100_v48 }
 0x1fc   : > { %v1012_v14 = vpop.f32.mrf.mxu2  ;;  %v1041_v16 = vpop.f32.mrf.mxu3 }
 0x1fd   : > { %v1013_v17 = vadd.f32 %v1012_v14, %v2413_v22  ;;  %v1042_v18 = vadd.f32 %v1041_v16, %v2416_v23 }
 0x1ff   : > { %v1228_v19 = vmax.f32 %v1227_v5, %v1013_v17  ;;  %v1241_v20 = vmax.f32 %v1240_v6, %v1042_v18  ;;  %v1073_v21 = vpop.f32.mrf.mxu0  ;;  %v1102_v24 = vpop.f32.mrf.mxu1 }
 0x200   : > { %v1074_v25 = vadd.f32 %v1073_v21, %v2403_v2  ;;  %v1103_v26 = vadd.f32 %v1102_v24, %v2406_v12 }
 0x202   : > { %v1255_v27 = vmax.f32 %v1254_v10, %v1074_v25  ;;  %v1268_v28 = vmax.f32 %v1267_v13, %v1103_v26 }
 0x204   : > { %v1015_v29 = vpop.f32.mrf.mxu2  ;;  %v1044_v30 = vpop.f32.mrf.mxu3 }
 0x205   : > { %v1016_v31 = vadd.f32 %v1015_v29, %v2413_v22  ;;  %v1045_v32 = vadd.f32 %v1044_v30, %v2416_v23 }
 0x207   : > { %v1229_v33 = vmax.f32 %v1228_v19, %v1016_v31  ;;  %v1242_v34 = vmax.f32 %v1241_v20, %v1045_v32  ;;  %v1075_v35 = vpop.f32.mrf.mxu0  ;;  %v1104_v36 = vpop.f32.mrf.mxu1 }
 0x208   : > { %v1076_v37 = vadd.f32 %v1075_v35, %v2403_v2  ;;  %v1105_v38 = vadd.f32 %v1104_v36, %v2406_v12  ;;  %v661_v36 = vperm.slane %v2400_v11, 6 }
 0x20a   : > { %v1256_v39 = vmax.f32 %v1255_v27, %v1076_v37  ;;  %v1269_v40 = vmax.f32 %v1268_v28, %v1105_v38  ;;  %v662_v37 = vperm.slane %v2400_v11, 7 }
 0x20c   : > { %v1257_v41 = vrot.slane %v1256_v39, 4  ;;  %v1270_v42 = vrot.slane %v1269_v40, 4  ;;  %v1017_v43 = vpop.f32.mrf.mxu2  ;;  %v1046_v44 = vpop.f32.mrf.mxu3 }
 0x20d   : > { %v1018_v45 = vadd.f32 %v1017_v43, %v2413_v22  ;;  %v1047_v46 = vadd.f32 %v1046_v44, %v2416_v23 }
 0x20e   : > { %v1258_v15 = vmax.f32 %v1256_v39, %v1257_v41  ;;  %v1271_v47 = vmax.f32 %v1269_v40, %v1270_v42 }
 0x20f   : > { %v1230_v49 = vmax.f32 %v1229_v33, %v1018_v45  ;;  %v1243_v50 = vmax.f32 %v1242_v34, %v1047_v46  ;;  %v1174_v51 = vpop.f32.mrf.mxu0  ;;  %v1203_v52 = vpop.f32.mrf.mxu1  ;;  %v659_v46 = vperm.slane %v2400_v11, 4 }
 0x210   : > { %v1259_v53 = vrot.slane %v1258_v15, 2  ;;  %v1272_v2 = vrot.slane %v1271_v47, 2  ;;  %v1175_v40 = vadd.f32 %v1174_v51, %v661_v36  ;;  %v1204_v41 = vadd.f32 %v1203_v52, %v662_v37 }
 0x211   : > { %v1231_v54 = vrot.slane %v1230_v49, 4  ;;  %v1244_v12 = vrot.slane %v1243_v50, 4 }
 0x212   : > { %v1260_v55 = vmax.f32 %v1258_v15, %v1259_v53  ;;  %v1273_v56 = vmax.f32 %v1271_v47, %v1272_v2  ;;  %v660_v15 = vperm.slane %v2400_v11, 5 }
 0x213   : > { %v1232_v57 = vmax.f32 %v1230_v49, %v1231_v54  ;;  %v1245_v58 = vmax.f32 %v1243_v50, %v1244_v12 }
 0x214   : > { %v1261_v59 = vrot.slane %v1260_v55, 1  ;;  %v1274_v60 = vrot.slane %v1273_v56, 1  ;;  %v1116_v61 = vpop.f32.mrf.mxu2  ;;  %v1145_v22 = vpop.f32.mrf.mxu3 }
 0x215   : > { %v1233_v62 = vrot.slane %v1232_v57, 2  ;;  %v1246_v23 = vrot.slane %v1245_v58, 2 }
 0x216   : > { %v1262_v63 = vmax.f32 %v1260_v55, %v1261_v59  ;;  %v1275_v0 = vmax.f32 %v1273_v56, %v1274_v60  ;;  %v1146_v59 = vadd.f32 %v1145_v22, %v660_v15 }
 0x217   : > { %v1234_v1 = vmax.f32 %v1232_v57, %v1233_v62  ;;  %v1247_v3 = vmax.f32 %v1245_v58, %v1246_v23  ;;  %v1176_v4 = vpop.f32.mrf.mxu0  ;;  %v1205_v5 = vpop.f32.mrf.mxu1  ;;  %v1117_v58 = vadd.f32 %v1116_v61, %v659_v46 }
 0x218   : > { %v1337_v6 = vrot.slane %v1262_v63, 6  ;;  %v1338_v7 = vrot.slane %v1275_v0, 5  ;;  %v1177_v38 = vadd.f32 %v1176_v4, %v661_v36  ;;  %v1206_v39 = vadd.f32 %v1205_v5, %v662_v37 }
 0x219   : > { %v1235_v8 = vrot.slane %v1234_v1, 1  ;;  %v1248_v9 = vrot.slane %v1247_v3, 1 }
 0x21a   : > { %v1345_v48 = vsel %vm1344_vm4, %v1337_v6, %v1338_v7  ;;  %v1302_v47 = vmax.f32 %v1175_v40, %v1177_v38  ;;  %v1315_v49 = vmax.f32 %v1204_v41, %v1206_v39 }
 0x21b   : > { %v1249_v10 = vmax.f32 %v1247_v3, %v1248_v9  ;;  %v1236_v16 = vmax.f32 %v1234_v1, %v1235_v8 }
 0x21c   : > { %v1118_v13 = vpop.f32.mrf.mxu2  ;;  %v1147_v14 = vpop.f32.mrf.mxu3 }
 0x21d   : > { %v1336_v17 = vrot.slane %v1249_v10, 7  ;;  %v1119_v2 = vadd.f32 %v1118_v13, %v659_v46  ;;  %v1148_v54 = vadd.f32 %v1147_v14, %v660_v15 }
 0x21f   : > { %v1343_v18 = vsel %vm451_vm0, %v1236_v16, %v1336_v17  ;;  %v1179_v19 = vpop.f32.mrf.mxu0  ;;  %v1208_v20 = vpop.f32.mrf.mxu1  ;;  %v1276_v1 = vmax.f32 %v1117_v58, %v1119_v2  ;;  %v1289_v3 = vmax.f32 %v1146_v59, %v1148_v54 }
 0x220   : > { %v2448_v21 = vsel %vm452_vm1, %v1343_v18, %v1345_v48  ;;  %v1180_v42 = vadd.f32 %v1179_v19, %v661_v36  ;;  %v1209_v43 = vadd.f32 %v1208_v20, %v662_v37 }
 0x222   : > { %v1303_v56 = vmax.f32 %v1302_v47, %v1180_v42  ;;  %v1316_v57 = vmax.f32 %v1315_v49, %v1209_v43 }
 0x224   : > { %v1121_v24 = vpop.f32.mrf.mxu2  ;;  %v1150_v25 = vpop.f32.mrf.mxu3 }
 0x225   : > { %v1122_v60 = vadd.f32 %v1121_v24, %v659_v46  ;;  %v1151_v62 = vadd.f32 %v1150_v25, %v660_v15 }
 0x227   : > { %v1181_v26 = vpop.f32.mrf.mxu0  ;;  %v1210_v27 = vpop.f32.mrf.mxu1  ;;  %v1277_v13 = vmax.f32 %v1276_v1, %v1122_v60  ;;  %v1290_v14 = vmax.f32 %v1289_v3, %v1151_v62 }
 0x228   : > { %v1182_v50 = vadd.f32 %v1181_v26, %v661_v36  ;;  %v1211_v53 = vadd.f32 %v1210_v27, %v662_v37 }
 0x22a   : > { %v1304_v23 = vmax.f32 %v1303_v56, %v1182_v50  ;;  %v1317_v63 = vmax.f32 %v1316_v57, %v1211_v53 }
 0x22c   : > { %v1123_v28 = vpop.f32.mrf.mxu2  ;;  %v1152_v29 = vpop.f32.mrf.mxu3 }
 0x22d   : > { %v1124_v4 = vadd.f32 %v1123_v28, %v659_v46  ;;  %v1153_v5 = vadd.f32 %v1152_v29, %v660_v15 }
 0x22f   : > { %v1184_v30 = vpop.f32.mrf.mxu0  ;;  %v1213_v31 = vpop.f32.mrf.mxu1  ;;  %v1278_v18 = vmax.f32 %v1277_v13, %v1124_v4  ;;  %v1291_v19 = vmax.f32 %v1290_v14, %v1153_v5 }
 0x230   : > { %v1185_v51 = vadd.f32 %v1184_v30, %v661_v36  ;;  %v1214_v52 = vadd.f32 %v1213_v31, %v662_v37 }
 0x232   : > { %v1305_v6 = vmax.f32 %v1304_v23, %v1185_v51  ;;  %v1318_v7 = vmax.f32 %v1317_v63, %v1214_v52 }
 0x234   : > { %v1126_v32 = vpop.f32.mrf.mxu2  ;;  %v1155_v33 = vpop.f32.mrf.mxu3 }
 0x235   : > { %v1127_v61 = vadd.f32 %v1126_v32, %v659_v46  ;;  %v1156_v22 = vadd.f32 %v1155_v33, %v660_v15 }
 0x237   : > { %v1186_v34 = vpop.f32.mrf.mxu0  ;;  %v1215_v35 = vpop.f32.mrf.mxu1  ;;  %v1279_v31 = vmax.f32 %v1278_v18, %v1127_v61 }
 0x238   : > { %v1187_v0 = vadd.f32 %v1186_v34, %v661_v36  ;;  %v1216_v11 = vadd.f32 %v1215_v35, %v662_v37  ;;  %v1292_v34 = vmax.f32 %v1291_v19, %v1156_v22 }
 0x23a   : > { %v1306_v16 = vmax.f32 %v1305_v6, %v1187_v0  ;;  %v1319_v17 = vmax.f32 %v1318_v7, %v1216_v11 }
 0x23c   : > { %v1128_v44 = vpop.f32.mrf.mxu2  ;;  %v1157_v45 = vpop.f32.mrf.mxu3 }
 0x23d   : > { %v1129_v20 = vadd.f32 %v1128_v44, %v659_v46  ;;  %v1158_v24 = vadd.f32 %v1157_v45, %v660_v15 }
 0x23f   : > { %v1189_v12 = vpop.f32.mrf.mxu0  ;;  %v1218_v55 = vpop.f32.mrf.mxu1  ;;  %v1280_v32 = vmax.f32 %v1279_v31, %v1129_v20  ;;  %v1293_v33 = vmax.f32 %v1292_v34, %v1158_v24 }
 0x240   : > { %v1190_v8 = vadd.f32 %v1189_v12, %v661_v36  ;;  %v1219_v9 = vadd.f32 %v1218_v55, %v662_v37 }
 0x242   : > { %v1307_v27 = vmax.f32 %v1306_v16, %v1190_v8  ;;  %v1320_v28 = vmax.f32 %v1319_v17, %v1219_v9 }
 0x244   : > { %v1131_v48 = vpop.f32.mrf.mxu2  ;;  %v1160_v10 = vpop.f32.mrf.mxu3 }
 0x245   : > { %v1132_v35 = vadd.f32 %v1131_v48, %v659_v46  ;;  %v1161_v38 = vadd.f32 %v1160_v10, %v660_v15  ;;  %v1223_v48 = vld [vmem:[#allocation2] sm:$0xff] }
 0x247   : > { %v1191_v25 = vpop.f32.mrf.mxu0  ;;  %v1220_v26 = vpop.f32.mrf.mxu1  ;;  %v1281_v44 = vmax.f32 %v1280_v32, %v1132_v35  ;;  %v1294_v45 = vmax.f32 %v1293_v33, %v1161_v38 }
 0x248   : > { %v1192_v29 = vadd.f32 %v1191_v25, %v661_v36  ;;  %v1221_v30 = vadd.f32 %v1220_v26, %v662_v37 }
 0x24a   : > { %v1308_v39 = vmax.f32 %v1307_v27, %v1192_v29  ;;  %v1321_v40 = vmax.f32 %v1320_v28, %v1221_v30 }
 0x24c   : > { %v1309_v41 = vrot.slane %v1308_v39, 4  ;;  %v1322_v42 = vrot.slane %v1321_v40, 4  ;;  %v1133_v43 = vpop.f32.mrf.mxu2  ;;  %v1162_v47 = vpop.f32.mrf.mxu3 }
 0x24d   : > { %v1134_v49 = vadd.f32 %v1133_v43, %v659_v46  ;;  %v1163_v50 = vadd.f32 %v1162_v47, %v660_v15 }
 0x24e   : > { %v1310_v53 = vmax.f32 %v1308_v39, %v1309_v41  ;;  %v1323_v2 = vmax.f32 %v1321_v40, %v1322_v42 }
 0x24f   : > { %v1282_v36 = vmax.f32 %v1281_v44, %v1134_v49  ;;  %v1295_v37 = vmax.f32 %v1294_v45, %v1163_v50 }
 0x250   : > { %v1311_v54 = vrot.slane %v1310_v53, 2  ;;  %v1324_v12 = vrot.slane %v1323_v2, 2 }
 0x251   : > { %v1283_v55 = vrot.slane %v1282_v36, 4  ;;  %v1296_v56 = vrot.slane %v1295_v37, 4 }
 0x252   : > { %v1312_v57 = vmax.f32 %v1310_v53, %v1311_v54  ;;  %v1325_v51 = vmax.f32 %v1323_v2, %v1324_v12 }
 0x253   : > { %v1284_v52 = vmax.f32 %v1282_v36, %v1283_v55  ;;  %v1297_v58 = vmax.f32 %v1295_v37, %v1296_v56 }
 0x254   : > { %v1313_v59 = vrot.slane %v1312_v57, 1  ;;  %v1326_v60 = vrot.slane %v1325_v51, 1 }
 0x255   : > { %v1285_v62 = vrot.slane %v1284_v52, 2  ;;  %v1298_v23 = vrot.slane %v1297_v58, 2 }
 0x256   : > { %v1314_v63 = vmax.f32 %v1312_v57, %v1313_v59  ;;  %v1327_v0 = vmax.f32 %v1325_v51, %v1326_v60 }
 0x257   : > { %v1286_v46 = vmax.f32 %v1284_v52, %v1285_v62  ;;  %v1299_v15 = vmax.f32 %v1297_v58, %v1298_v23 }
 0x258   : > { %v1341_v3 = vrot.slane %v1314_v63, 2  ;;  %v1342_v4 = vrot.slane %v1327_v0, 1 }
 0x259   : > { %v1287_v11 = vrot.slane %v1286_v46, 1  ;;  %v1300_v1 = vrot.slane %v1299_v15, 1 }
 0x25a   : > { %v1350_v9 = vsel %vm1349_vm5, %v1341_v3, %v1342_v4 }
 0x25b   : > { %v1288_v5 = vmax.f32 %v1286_v46, %v1287_v11  ;;  %v1301_v6 = vmax.f32 %v1299_v15, %v1300_v1 }
 0x25d   : > { %v1339_v7 = vrot.slane %v1288_v5, 4  ;;  %v1340_v8 = vrot.slane %v1301_v6, 3 }
 0x25f   : > { %v1348_v10 = vsel %vm1347_vm6, %v1339_v7, %v1340_v8 }
 0x260   : > { %v1352_v13 = vsel %vm1351_vm7, %v1348_v10, %v1350_v9  ;;  %1361 = sbr.rel (%p1814_p11) target bundleno = 621 (0x26d), region = 76 }
 0x261   : > { %v1354_v14 = vsel %vm1353_vm8, %v2448_v21, %v1352_v13 }
 0x262   : > { %v1356_v61 = vmax.f32 %v1223_v48, %v1354_v14 }
 0x264   : > { %1357 = vst [vmem:[#allocation2] sm:$0xff] %v1356_v61 }
 0x26b   : > { %v1362_v22 = vld [vmem:[#allocation2] sm:$0xff] }
 0x26c   : > { %1363 = vst [vmem:[%s2348_s9] sm:$0xff] %v1362_v22 }
 0x26d PF: > { %s20_s28 = sadd.s32 1, %s2193_s28   ;;  %s2483_s24 = smov %s2185_s26 }
 0x26e   : > { %p17_p12 = scmp.ge.s32.totalorder %s20_s28, 10   ;;  %s2484_s25 = smov %s2189_s27 }
 0x26f   : > { %s2485_s26 = smov %s2488_s29  ;;  %s2486_s27 = smov %s2492_s30 }
 0x270   :  { %19 = sbr.rel (!%p17_p12) target bundleno = 5 (0x5), region = 110 }
 0x275   :  { %1383 = vsyncpa [#allocation4], 1 }
 0x276   :  { %1385 = vsyncpa [#allocation4 + $0x1], 1 }
 0x277   :  { %1386 = vsyncpa [#allocation6], 1 }
 0x278   :  { %1387 = vsyncpa [#allocation9], 1 }

// kernel: pointnetfeat_forward.4
= control target key start
LH: loop header
LB: loop body
LE: loop exit
PB: predicated region body
PF: predicated region fallthrough
CT: control target
= control target key end

     0   :  { %12 = vsyncpa [#allocation3], 0  ;;  %s2098_s0 = inlined_call_operand.vmem [shape: f32[8,1024], index: 0, kind: input, shape index: {}]   ;;  %s2099_s1 = inlined_call_operand.hbm [shape: f32[1024,512], index: 1, kind: input, shape index: {}]   ;;  %s2100_s2 = inlined_call_operand.hbm [shape: f32[1,512], index: 2, kind: input, shape index: {}]   ;;  %s2101_s3 = inlined_call_operand.hbm [shape: f32[512,256], index: 3, kind: input, shape index: {}]   ;;  %s2102_s4 = inlined_call_operand.hbm [shape: f32[1,256], index: 4, kind: input, shape index: {}]   ;;  %s2103_s5 = inlined_call_operand.vmem [shape: f32[256,9], index: 5, kind: input, shape index: {}]   ;;  %s2104_s6 = inlined_call_operand.hbm [shape: f32[1,9], index: 6, kind: input, shape index: {}]   ;;  %s2105_s7 = inlined_call_operand.vmem [shape: f32[8,9], index: 7, kind: output, shape index: {}]  }
   0x1   :  { %13 = vsyncpa [#allocation5], 0  ;;  %s35_s26 = sshll.u32 %s2100_s2, 4  ;;  %s36_s26 = int_to_ptr.hbm [resolvable:$true] %s35_s26 }
   0x2   :  { %14 = vsyncpa [#allocation8], 0  ;;  %s1797_s27 = smov [#allocation4]   ;;  %s59_s8 = sshll.u32 %s2102_s4, 4  ;;  %s60_s8 = int_to_ptr.hbm [resolvable:$true] %s59_s8 }
   0x3   :  { %s37_s28 = sshll.u32 %s1797_s27, 4  ;;  %s1798_s9 = smov [#allocation7]   ;;  %s38_s28 = int_to_ptr.vmem [resolvable:$true] %s37_s28 }
   0x4   :  { %40 = dma.hbm_to_vmem [thread:$0]  %s36_s26, 64, %s38_s28, [#allocation5]  }
   0x5   :  { %s61_s10 = sshll.u32 %s1798_s9, 4  ;;  %s21_s13 = sshll.u32 %s2099_s1, 4  ;;  %s62_s10 = int_to_ptr.vmem [resolvable:$true] %s61_s10  ;;  %s22_s13 = int_to_ptr.hbm [resolvable:$true] %s21_s13 }
   0x6   :  { %64 = dma.hbm_to_vmem [thread:$0]  %s60_s8, 32, %s62_s10, [#allocation8]  }
   0x7   :  { %s1799_s2 = smov [#allocation2]   ;;  %s45_s17 = sshll.u32 %s2101_s3, 4  ;;  %s46_s17 = int_to_ptr.hbm [resolvable:$true] %s45_s17 }
   0x8   :  { %s23_s14 = sshll.u32 %s1799_s2, 4  ;;  %s1800_s18 = smov 512   ;;  %s24_s14 = int_to_ptr.vmem [resolvable:$true] %s23_s14 }
   0x9   :  { %s1801_s4 = smov 32   ;;  %s1802_s19 = smov [#allocation6]  }
   0xa   :  { %29 = dma.hbm_to_vmem [thread:$0]  %s22_s13, 65536, %s24_s14, [#allocation3], %s1800_s18, %s1800_s18, %s1801_s4  }
   0xb   :  { %s47_s20 = sshll.u32 %s1802_s19, 4  ;;  %s1803_s21 = smov 256   ;;  %s48_s20 = int_to_ptr.vmem [resolvable:$true] %s47_s20 }
   0xc   :  { %s1804_s22 = smov 16   ;;  %s72_s24 = sshll.u32 %s2104_s6, 4  ;;  %s73_s24 = int_to_ptr.hbm [resolvable:$true] %s72_s24 }
   0xd   :  { %53 = dma.hbm_to_vmem [thread:$0]  %s46_s17, 16384, %s48_s20, [#allocation5], %s1803_s21, %s1803_s21, %s1804_s22  }
   0xe   :  { %s1805_s25 = smov [#allocation9]  }
   0xf   :  { %s74_s26 = sshll.u32 %s1805_s25, 4  ;;  %s75_s26 = int_to_ptr.vmem [resolvable:$true] %s74_s26 }
  0x10   :  { %77 = dma.hbm_to_vmem [thread:$0]  %s73_s24, 16, %s75_s26, [#allocation8]  }
  0x11   :  { %1791 = dma.done.wait [#allocation3], 65536  }
  0x12   :  { %1792 = vsyncadd [#allocation3], 4294901760 }
  0x13   :  { %1793 = dma.done.wait [#allocation5], 16448  }
  0x14   :  { %1794 = vsyncadd [#allocation5], 4294950848 }
  0x15   :  { %1795 = dma.done.wait [#allocation8], 48  }
  0x16   :  { %1796 = vsyncadd [#allocation8], 4294967248  ;;  %v166_v0 = vld [vmem:[#allocation2 + $0x1e0] sm:$0xff]  ;;  %vm1644_vm0 = vcmask 72704  }
  0x17   :  { %v230_v1 = vld [vmem:[#allocation2 + $0x3e0] sm:$0xff]  ;;  %628 = vmatpush.msra.mxu0 %v166_v0 }
  0x18   :  { %v294_v2 = vld [vmem:[#allocation2 + $0x5e0] sm:$0xff]  ;;  %648 = vmatpush.msra.mxu1 %v230_v1 }
  0x19   :  { %v162_v3 = vld [vmem:[#allocation2 + $0x1c0] sm:$0xff]  ;;  %668 = vmatpush.msra.mxu2 %v294_v2 }
  0x1a   :  { %v226_v4 = vld [vmem:[#allocation2 + $0x3c0] sm:$0xff]  ;;  %629 = vmatpush.msra.mxu0 %v162_v3 }
  0x1b   :  { %v290_v5 = vld [vmem:[#allocation2 + $0x5c0] sm:$0xff]  ;;  %649 = vmatpush.msra.mxu1 %v226_v4 }
  0x1c   :  { %v358_v6 = vld [vmem:[#allocation2 + $0x7e0] sm:$0xff]  ;;  %669 = vmatpush.msra.mxu2 %v290_v5 }
  0x1d   :  { %v158_v7 = vld [vmem:[#allocation2 + $0x1a0] sm:$0xff]  ;;  %688 = vmatpush.msra.mxu3 %v358_v6 }
  0x1e   :  { %v222_v8 = vld [vmem:[#allocation2 + $0x3a0] sm:$0xff]  ;;  %630 = vmatpush.msra.mxu0 %v158_v7 }
  0x1f   :  { %v286_v9 = vld [vmem:[#allocation2 + $0x5a0] sm:$0xff]  ;;  %650 = vmatpush.msra.mxu1 %v222_v8 }
  0x20   :  { %v354_v10 = vld [vmem:[#allocation2 + $0x7c0] sm:$0xff]  ;;  %670 = vmatpush.msra.mxu2 %v286_v9 }
  0x21   :  { %v154_v11 = vld [vmem:[#allocation2 + $0x180] sm:$0xff]  ;;  %689 = vmatpush.msra.mxu3 %v354_v10 }
  0x22   :  { %v218_v12 = vld [vmem:[#allocation2 + $0x380] sm:$0xff]  ;;  %631 = vmatpush.msra.mxu0 %v154_v11 }
  0x23   :  { %v282_v13 = vld [vmem:[#allocation2 + $0x580] sm:$0xff]  ;;  %651 = vmatpush.msra.mxu1 %v218_v12 }
  0x24   :  { %v350_v14 = vld [vmem:[#allocation2 + $0x7a0] sm:$0xff]  ;;  %671 = vmatpush.msra.mxu2 %v282_v13 }
  0x25   :  { %v150_v15 = vld [vmem:[#allocation2 + $0x160] sm:$0xff]  ;;  %690 = vmatpush.msra.mxu3 %v350_v14 }
  0x26   :  { %v214_v16 = vld [vmem:[#allocation2 + $0x360] sm:$0xff]  ;;  %632 = vmatpush.msra.mxu0 %v150_v15 }
  0x27   :  { %v278_v17 = vld [vmem:[#allocation2 + $0x560] sm:$0xff]  ;;  %652 = vmatpush.msra.mxu1 %v214_v16 }
  0x28   :  { %v346_v18 = vld [vmem:[#allocation2 + $0x780] sm:$0xff]  ;;  %672 = vmatpush.msra.mxu2 %v278_v17 }
  0x29   :  { %v146_v19 = vld [vmem:[#allocation2 + $0x140] sm:$0xff]  ;;  %691 = vmatpush.msra.mxu3 %v346_v18 }
  0x2a   :  { %v210_v20 = vld [vmem:[#allocation2 + $0x340] sm:$0xff]  ;;  %633 = vmatpush.msra.mxu0 %v146_v19 }
  0x2b   :  { %v274_v21 = vld [vmem:[#allocation2 + $0x540] sm:$0xff]  ;;  %653 = vmatpush.msra.mxu1 %v210_v20 }
  0x2c   :  { %v342_v22 = vld [vmem:[#allocation2 + $0x760] sm:$0xff]  ;;  %673 = vmatpush.msra.mxu2 %v274_v21 }
  0x2d   :  { %v142_v23 = vld [vmem:[#allocation2 + $0x120] sm:$0xff]  ;;  %692 = vmatpush.msra.mxu3 %v342_v22 }
  0x2e   :  { %v206_v24 = vld [vmem:[#allocation2 + $0x320] sm:$0xff]  ;;  %634 = vmatpush.msra.mxu0 %v142_v23 }
  0x2f   :  { %v270_v25 = vld [vmem:[#allocation2 + $0x520] sm:$0xff]  ;;  %654 = vmatpush.msra.mxu1 %v206_v24 }
  0x30   :  { %v338_v26 = vld [vmem:[#allocation2 + $0x740] sm:$0xff]  ;;  %674 = vmatpush.msra.mxu2 %v270_v25 }
  0x31   :  { %v138_v27 = vld [vmem:[#allocation2 + $0x100] sm:$0xff]  ;;  %693 = vmatpush.msra.mxu3 %v338_v26 }
  0x32   :  { %v202_v28 = vld [vmem:[#allocation2 + $0x300] sm:$0xff]  ;;  %635 = vmatpush.msra.mxu0 %v138_v27 }
  0x33   :  { %v266_v29 = vld [vmem:[#allocation2 + $0x500] sm:$0xff]  ;;  %655 = vmatpush.msra.mxu1 %v202_v28 }
  0x34   :  { %v334_v30 = vld [vmem:[#allocation2 + $0x720] sm:$0xff]  ;;  %675 = vmatpush.msra.mxu2 %v266_v29 }
  0x35   :  { %v134_v31 = vld [vmem:[#allocation2 + $0xe0] sm:$0xff]  ;;  %694 = vmatpush.msra.mxu3 %v334_v30 }
  0x36   :  { %v198_v32 = vld [vmem:[#allocation2 + $0x2e0] sm:$0xff]  ;;  %636 = vmatpush.msra.mxu0 %v134_v31 }
  0x37   :  { %v262_v33 = vld [vmem:[#allocation2 + $0x4e0] sm:$0xff]  ;;  %656 = vmatpush.msra.mxu1 %v198_v32 }
  0x38   :  { %v330_v34 = vld [vmem:[#allocation2 + $0x700] sm:$0xff]  ;;  %676 = vmatpush.msra.mxu2 %v262_v33 }
  0x39   :  { %v130_v35 = vld [vmem:[#allocation2 + $0xc0] sm:$0xff]  ;;  %695 = vmatpush.msra.mxu3 %v330_v34 }
  0x3a   :  { %v194_v36 = vld [vmem:[#allocation2 + $0x2c0] sm:$0xff]  ;;  %637 = vmatpush.msra.mxu0 %v130_v35 }
  0x3b   :  { %v258_v37 = vld [vmem:[#allocation2 + $0x4c0] sm:$0xff]  ;;  %657 = vmatpush.msra.mxu1 %v194_v36 }
  0x3c   :  { %v326_v38 = vld [vmem:[#allocation2 + $0x6e0] sm:$0xff]  ;;  %677 = vmatpush.msra.mxu2 %v258_v37 }
  0x3d   :  { %v126_v39 = vld [vmem:[#allocation2 + $0xa0] sm:$0xff]  ;;  %696 = vmatpush.msra.mxu3 %v326_v38 }
  0x3e   :  { %v190_v40 = vld [vmem:[#allocation2 + $0x2a0] sm:$0xff]  ;;  %638 = vmatpush.msra.mxu0 %v126_v39 }
  0x3f   :  { %v254_v41 = vld [vmem:[#allocation2 + $0x4a0] sm:$0xff]  ;;  %658 = vmatpush.msra.mxu1 %v190_v40 }
  0x40   :  { %v322_v42 = vld [vmem:[#allocation2 + $0x6c0] sm:$0xff]  ;;  %678 = vmatpush.msra.mxu2 %v254_v41 }
  0x41   :  { %v122_v43 = vld [vmem:[#allocation2 + $0x80] sm:$0xff]  ;;  %697 = vmatpush.msra.mxu3 %v322_v42 }
  0x42   :  { %v186_v44 = vld [vmem:[#allocation2 + $0x280] sm:$0xff]  ;;  %639 = vmatpush.msra.mxu0 %v122_v43 }
  0x43   :  { %v250_v45 = vld [vmem:[#allocation2 + $0x480] sm:$0xff]  ;;  %659 = vmatpush.msra.mxu1 %v186_v44 }
  0x44   :  { %v318_v46 = vld [vmem:[#allocation2 + $0x6a0] sm:$0xff]  ;;  %679 = vmatpush.msra.mxu2 %v250_v45 }
  0x45   :  { %v118_v47 = vld [vmem:[#allocation2 + $0x60] sm:$0xff]  ;;  %698 = vmatpush.msra.mxu3 %v318_v46 }
  0x46   :  { %v182_v48 = vld [vmem:[#allocation2 + $0x260] sm:$0xff]  ;;  %640 = vmatpush.msra.mxu0 %v118_v47 }
  0x47   :  { %v246_v49 = vld [vmem:[#allocation2 + $0x460] sm:$0xff]  ;;  %660 = vmatpush.msra.mxu1 %v182_v48 }
  0x48   :  { %v314_v50 = vld [vmem:[#allocation2 + $0x680] sm:$0xff]  ;;  %680 = vmatpush.msra.mxu2 %v246_v49 }
  0x49   :  { %v114_v51 = vld [vmem:[#allocation2 + $0x40] sm:$0xff]  ;;  %699 = vmatpush.msra.mxu3 %v314_v50 }
  0x4a   :  { %v178_v52 = vld [vmem:[#allocation2 + $0x240] sm:$0xff]  ;;  %641 = vmatpush.msra.mxu0 %v114_v51 }
  0x4b   :  { %v242_v53 = vld [vmem:[#allocation2 + $0x440] sm:$0xff]  ;;  %661 = vmatpush.msra.mxu1 %v178_v52 }
  0x4c   :  { %v310_v54 = vld [vmem:[#allocation2 + $0x660] sm:$0xff]  ;;  %681 = vmatpush.msra.mxu2 %v242_v53 }
  0x4d   :  { %v110_v55 = vld [vmem:[#allocation2 + $0x20] sm:$0xff]  ;;  %700 = vmatpush.msra.mxu3 %v310_v54 }
  0x4e   :  { %v174_v56 = vld [vmem:[#allocation2 + $0x220] sm:$0xff]  ;;  %642 = vmatpush.msra.mxu0 %v110_v55 }
  0x4f   :  { %v238_v57 = vld [vmem:[#allocation2 + $0x420] sm:$0xff]  ;;  %662 = vmatpush.msra.mxu1 %v174_v56 }
  0x50   :  { %v306_v58 = vld [vmem:[#allocation2 + $0x640] sm:$0xff]  ;;  %682 = vmatpush.msra.mxu2 %v238_v57 }
  0x51   :  { %v106_v59 = vld [vmem:[#allocation2] sm:$0xff]  ;;  %701 = vmatpush.msra.mxu3 %v306_v58 }
  0x52   :  { %v170_v60 = vld [vmem:[#allocation2 + $0x200] sm:$0xff]  ;;  %643 = vmatpush.msra.mxu0 %v106_v59 }
  0x53   :  { %v234_v61 = vld [vmem:[#allocation2 + $0x400] sm:$0xff]  ;;  %663 = vmatpush.msra.mxu1 %v170_v60 }
  0x54   :  { %v302_v62 = vld [vmem:[#allocation2 + $0x620] sm:$0xff]  ;;  %683 = vmatpush.msra.mxu2 %v234_v61 }
  0x55   :  { %v422_v63 = vld [vmem:[#allocation2 + $0x9e0] sm:$0xff]  ;;  %702 = vmatpush.msra.mxu3 %v302_v62 }
  0x56   :  { %v486_v0 = vld [vmem:[#allocation2 + $0xbe0] sm:$0xff]  ;;  %708 = vmatpush.msrb.mxu0 %v422_v63 }
  0x57   :  { %v550_v1 = vld [vmem:[#allocation2 + $0xde0] sm:$0xff]  ;;  %728 = vmatpush.msrb.mxu1 %v486_v0  ;;  %v1869_v0 = vld [vmem:[%s2098_s0 + $0x8] sm:$0xff] }
  0x58   :  { %v298_v2 = vld [vmem:[#allocation2 + $0x600] sm:$0xff]  ;;  %748 = vmatpush.msrb.mxu2 %v550_v1  ;;  %v1874_v1 = vld [vmem:[%s2098_s0 + $0x10] sm:$0xff]  ;;  %664 = vmatmul.f32.vlgmr.msra.gmra.mxu1 %v1869_v0 }
  0x59   :  { %v418_v3 = vld [vmem:[#allocation2 + $0x9c0] sm:$0xff]  ;;  %703 = vmatpush.msra.mxu3 %v298_v2  ;;  %v167_v2 = vld [vmem:[#allocation2 + $0x1e8] sm:$0xff]  ;;  %684 = vmatmul.f32.vlgmr.msra.gmra.mxu2 %v1874_v1 }
  0x5a   :  { %v482_v4 = vld [vmem:[#allocation2 + $0xbc0] sm:$0xff]  ;;  %709 = vmatpush.msrb.mxu0 %v418_v3  ;;  %v231_v3 = vld [vmem:[#allocation2 + $0x3e8] sm:$0xff] }
  0x5b   :  { %v546_v5 = vld [vmem:[#allocation2 + $0xdc0] sm:$0xff]  ;;  %729 = vmatpush.msrb.mxu1 %v482_v4  ;;  %v295_v4 = vld [vmem:[#allocation2 + $0x5e8] sm:$0xff] }
  0x5c   :  { %v614_v6 = vld [vmem:[#allocation2 + $0xfe0] sm:$0xff]  ;;  %749 = vmatpush.msrb.mxu2 %v546_v5 }
  0x5d   :  { %v414_v7 = vld [vmem:[#allocation2 + $0x9a0] sm:$0xff]  ;;  %768 = vmatpush.msrb.mxu3 %v614_v6  ;;  %v163_v6 = vld [vmem:[#allocation2 + $0x1c8] sm:$0xff] }
  0x5e   :  { %v478_v8 = vld [vmem:[#allocation2 + $0xba0] sm:$0xff]  ;;  %710 = vmatpush.msrb.mxu0 %v414_v7  ;;  %v1882_v7 = vld [vmem:[%s2098_s0 + $0x18] sm:$0xff] }
  0x5f   :  { %v542_v9 = vld [vmem:[#allocation2 + $0xda0] sm:$0xff]  ;;  %730 = vmatpush.msrb.mxu1 %v478_v8  ;;  %v227_v8 = vld [vmem:[#allocation2 + $0x3c8] sm:$0xff]  ;;  %704 = vmatmul.f32.vlgmr.msra.gmra.mxu3 %v1882_v7 }
  0x60   :  { %v610_v10 = vld [vmem:[#allocation2 + $0xfc0] sm:$0xff]  ;;  %750 = vmatpush.msrb.mxu2 %v542_v9  ;;  %v291_v9 = vld [vmem:[#allocation2 + $0x5c8] sm:$0xff] }
  0x61   :  { %v410_v11 = vld [vmem:[#allocation2 + $0x980] sm:$0xff]  ;;  %769 = vmatpush.msrb.mxu3 %v610_v10  ;;  %v359_v10 = vld [vmem:[#allocation2 + $0x7e8] sm:$0xff] }
  0x62   :  { %v474_v12 = vld [vmem:[#allocation2 + $0xb80] sm:$0xff]  ;;  %711 = vmatpush.msrb.mxu0 %v410_v11  ;;  %v159_v11 = vld [vmem:[#allocation2 + $0x1a8] sm:$0xff] }
  0x63   :  { %v538_v13 = vld [vmem:[#allocation2 + $0xd80] sm:$0xff]  ;;  %731 = vmatpush.msrb.mxu1 %v474_v12  ;;  %v223_v12 = vld [vmem:[#allocation2 + $0x3a8] sm:$0xff] }
  0x64   :  { %v606_v14 = vld [vmem:[#allocation2 + $0xfa0] sm:$0xff]  ;;  %751 = vmatpush.msrb.mxu2 %v538_v13  ;;  %v287_v13 = vld [vmem:[#allocation2 + $0x5a8] sm:$0xff] }
  0x65   :  { %v406_v15 = vld [vmem:[#allocation2 + $0x960] sm:$0xff]  ;;  %770 = vmatpush.msrb.mxu3 %v606_v14  ;;  %v355_v14 = vld [vmem:[#allocation2 + $0x7c8] sm:$0xff] }
  0x66   :  { %v470_v16 = vld [vmem:[#allocation2 + $0xb60] sm:$0xff]  ;;  %712 = vmatpush.msrb.mxu0 %v406_v15  ;;  %v155_v15 = vld [vmem:[#allocation2 + $0x188] sm:$0xff] }
  0x67   :  { %v534_v17 = vld [vmem:[#allocation2 + $0xd60] sm:$0xff]  ;;  %732 = vmatpush.msrb.mxu1 %v470_v16  ;;  %v219_v16 = vld [vmem:[#allocation2 + $0x388] sm:$0xff] }
  0x68   :  { %v602_v18 = vld [vmem:[#allocation2 + $0xf80] sm:$0xff]  ;;  %752 = vmatpush.msrb.mxu2 %v534_v17  ;;  %v283_v17 = vld [vmem:[#allocation2 + $0x588] sm:$0xff] }
  0x69   :  { %v402_v19 = vld [vmem:[#allocation2 + $0x940] sm:$0xff]  ;;  %771 = vmatpush.msrb.mxu3 %v602_v18  ;;  %v351_v18 = vld [vmem:[#allocation2 + $0x7a8] sm:$0xff] }
  0x6a   :  { %v466_v20 = vld [vmem:[#allocation2 + $0xb40] sm:$0xff]  ;;  %713 = vmatpush.msrb.mxu0 %v402_v19  ;;  %v1888_v19 = vld [vmem:[%s2098_s0 + $0x30] sm:$0xff] }
  0x6b   :  { %v530_v21 = vld [vmem:[#allocation2 + $0xd40] sm:$0xff]  ;;  %733 = vmatpush.msrb.mxu1 %v466_v20  ;;  %v151_v20 = vld [vmem:[#allocation2 + $0x168] sm:$0xff] }
  0x6c   :  { %v598_v22 = vld [vmem:[#allocation2 + $0xf60] sm:$0xff]  ;;  %753 = vmatpush.msrb.mxu2 %v530_v21  ;;  %v215_v21 = vld [vmem:[#allocation2 + $0x368] sm:$0xff] }
  0x6d   :  { %v398_v23 = vld [vmem:[#allocation2 + $0x920] sm:$0xff]  ;;  %772 = vmatpush.msrb.mxu3 %v598_v22  ;;  %v279_v22 = vld [vmem:[#allocation2 + $0x568] sm:$0xff] }
  0x6e   :  { %v462_v24 = vld [vmem:[#allocation2 + $0xb20] sm:$0xff]  ;;  %714 = vmatpush.msrb.mxu0 %v398_v23  ;;  %v347_v23 = vld [vmem:[#allocation2 + $0x788] sm:$0xff] }
  0x6f   :  { %v526_v25 = vld [vmem:[#allocation2 + $0xd20] sm:$0xff]  ;;  %734 = vmatpush.msrb.mxu1 %v462_v24 }
  0x70   :  { %v594_v26 = vld [vmem:[#allocation2 + $0xf40] sm:$0xff]  ;;  %754 = vmatpush.msrb.mxu2 %v526_v25  ;;  %v1899_v25 = vld [vmem:[%s2098_s0 + $0x38] sm:$0xff] }
  0x71   :  { %v394_v27 = vld [vmem:[#allocation2 + $0x900] sm:$0xff]  ;;  %773 = vmatpush.msrb.mxu3 %v594_v26  ;;  %v147_v26 = vld [vmem:[#allocation2 + $0x148] sm:$0xff] }
  0x72   :  { %v458_v28 = vld [vmem:[#allocation2 + $0xb00] sm:$0xff]  ;;  %715 = vmatpush.msrb.mxu0 %v394_v27  ;;  %v211_v27 = vld [vmem:[#allocation2 + $0x348] sm:$0xff] }
  0x73   :  { %v522_v29 = vld [vmem:[#allocation2 + $0xd00] sm:$0xff]  ;;  %735 = vmatpush.msrb.mxu1 %v458_v28  ;;  %v275_v28 = vld [vmem:[#allocation2 + $0x548] sm:$0xff] }
  0x74   :  { %v590_v30 = vld [vmem:[#allocation2 + $0xf20] sm:$0xff]  ;;  %755 = vmatpush.msrb.mxu2 %v522_v29  ;;  %v343_v29 = vld [vmem:[#allocation2 + $0x768] sm:$0xff] }
  0x75   :  { %v390_v31 = vld [vmem:[#allocation2 + $0x8e0] sm:$0xff]  ;;  %774 = vmatpush.msrb.mxu3 %v590_v30  ;;  %v1905_v30 = vld [vmem:[%s2098_s0 + $0x28] sm:$0xff] }
  0x76   :  { %v454_v32 = vld [vmem:[#allocation2 + $0xae0] sm:$0xff]  ;;  %716 = vmatpush.msrb.mxu0 %v390_v31  ;;  %v143_v31 = vld [vmem:[#allocation2 + $0x128] sm:$0xff] }
  0x77   :  { %v518_v33 = vld [vmem:[#allocation2 + $0xce0] sm:$0xff]  ;;  %736 = vmatpush.msrb.mxu1 %v454_v32  ;;  %v207_v32 = vld [vmem:[#allocation2 + $0x328] sm:$0xff] }
  0x78   :  { %v586_v34 = vld [vmem:[#allocation2 + $0xf00] sm:$0xff]  ;;  %756 = vmatpush.msrb.mxu2 %v518_v33  ;;  %v271_v33 = vld [vmem:[#allocation2 + $0x528] sm:$0xff] }
  0x79   :  { %v386_v35 = vld [vmem:[#allocation2 + $0x8c0] sm:$0xff]  ;;  %775 = vmatpush.msrb.mxu3 %v586_v34  ;;  %v339_v34 = vld [vmem:[#allocation2 + $0x748] sm:$0xff] }
  0x7a   :  { %v450_v36 = vld [vmem:[#allocation2 + $0xac0] sm:$0xff]  ;;  %717 = vmatpush.msrb.mxu0 %v386_v35  ;;  %v139_v35 = vld [vmem:[#allocation2 + $0x108] sm:$0xff] }
  0x7b   :  { %v514_v37 = vld [vmem:[#allocation2 + $0xcc0] sm:$0xff]  ;;  %737 = vmatpush.msrb.mxu1 %v450_v36  ;;  %v203_v36 = vld [vmem:[#allocation2 + $0x308] sm:$0xff] }
  0x7c   :  { %v582_v38 = vld [vmem:[#allocation2 + $0xee0] sm:$0xff]  ;;  %757 = vmatpush.msrb.mxu2 %v514_v37  ;;  %v267_v37 = vld [vmem:[#allocation2 + $0x508] sm:$0xff] }
  0x7d   :  { %v382_v39 = vld [vmem:[#allocation2 + $0x8a0] sm:$0xff]  ;;  %776 = vmatpush.msrb.mxu3 %v582_v38  ;;  %v335_v38 = vld [vmem:[#allocation2 + $0x728] sm:$0xff] }
  0x7e   :  { %v446_v40 = vld [vmem:[#allocation2 + $0xaa0] sm:$0xff]  ;;  %718 = vmatpush.msrb.mxu0 %v382_v39  ;;  %v135_v39 = vld [vmem:[#allocation2 + $0xe8] sm:$0xff] }
  0x7f   :  { %v510_v41 = vld [vmem:[#allocation2 + $0xca0] sm:$0xff]  ;;  %738 = vmatpush.msrb.mxu1 %v446_v40  ;;  %v199_v40 = vld [vmem:[#allocation2 + $0x2e8] sm:$0xff] }
  0x80   :  { %v578_v42 = vld [vmem:[#allocation2 + $0xec0] sm:$0xff]  ;;  %758 = vmatpush.msrb.mxu2 %v510_v41  ;;  %v263_v41 = vld [vmem:[#allocation2 + $0x4e8] sm:$0xff] }
  0x81   :  { %v378_v43 = vld [vmem:[#allocation2 + $0x880] sm:$0xff]  ;;  %777 = vmatpush.msrb.mxu3 %v578_v42  ;;  %v331_v42 = vld [vmem:[#allocation2 + $0x708] sm:$0xff] }
  0x82   :  { %v442_v44 = vld [vmem:[#allocation2 + $0xa80] sm:$0xff]  ;;  %719 = vmatpush.msrb.mxu0 %v378_v43  ;;  %v131_v43 = vld [vmem:[#allocation2 + $0xc8] sm:$0xff] }
  0x83   :  { %v506_v45 = vld [vmem:[#allocation2 + $0xc80] sm:$0xff]  ;;  %739 = vmatpush.msrb.mxu1 %v442_v44  ;;  %v195_v44 = vld [vmem:[#allocation2 + $0x2c8] sm:$0xff] }
  0x84   :  { %v574_v46 = vld [vmem:[#allocation2 + $0xea0] sm:$0xff]  ;;  %759 = vmatpush.msrb.mxu2 %v506_v45  ;;  %v259_v45 = vld [vmem:[#allocation2 + $0x4c8] sm:$0xff] }
  0x85   :  { %v374_v47 = vld [vmem:[#allocation2 + $0x860] sm:$0xff]  ;;  %778 = vmatpush.msrb.mxu3 %v574_v46  ;;  %v327_v46 = vld [vmem:[#allocation2 + $0x6e8] sm:$0xff] }
  0x86   :  { %v438_v48 = vld [vmem:[#allocation2 + $0xa60] sm:$0xff]  ;;  %720 = vmatpush.msrb.mxu0 %v374_v47  ;;  %v127_v47 = vld [vmem:[#allocation2 + $0xa8] sm:$0xff] }
  0x87   :  { %v502_v49 = vld [vmem:[#allocation2 + $0xc60] sm:$0xff]  ;;  %740 = vmatpush.msrb.mxu1 %v438_v48  ;;  %v191_v48 = vld [vmem:[#allocation2 + $0x2a8] sm:$0xff] }
  0x88   :  { %v570_v50 = vld [vmem:[#allocation2 + $0xe80] sm:$0xff]  ;;  %760 = vmatpush.msrb.mxu2 %v502_v49  ;;  %v255_v49 = vld [vmem:[#allocation2 + $0x4a8] sm:$0xff] }
  0x89   :  { %v370_v51 = vld [vmem:[#allocation2 + $0x840] sm:$0xff]  ;;  %779 = vmatpush.msrb.mxu3 %v570_v50  ;;  %v323_v50 = vld [vmem:[#allocation2 + $0x6c8] sm:$0xff] }
  0x8a   :  { %v434_v52 = vld [vmem:[#allocation2 + $0xa40] sm:$0xff]  ;;  %721 = vmatpush.msrb.mxu0 %v370_v51  ;;  %v123_v51 = vld [vmem:[#allocation2 + $0x88] sm:$0xff] }
  0x8b   :  { %v498_v53 = vld [vmem:[#allocation2 + $0xc40] sm:$0xff]  ;;  %741 = vmatpush.msrb.mxu1 %v434_v52  ;;  %v187_v52 = vld [vmem:[#allocation2 + $0x288] sm:$0xff] }
  0x8c   :  { %v566_v54 = vld [vmem:[#allocation2 + $0xe60] sm:$0xff]  ;;  %761 = vmatpush.msrb.mxu2 %v498_v53  ;;  %v251_v53 = vld [vmem:[#allocation2 + $0x488] sm:$0xff] }
  0x8d   :  { %v366_v55 = vld [vmem:[#allocation2 + $0x820] sm:$0xff]  ;;  %780 = vmatpush.msrb.mxu3 %v566_v54  ;;  %v319_v54 = vld [vmem:[#allocation2 + $0x6a8] sm:$0xff] }
  0x8e   :  { %v430_v56 = vld [vmem:[#allocation2 + $0xa20] sm:$0xff]  ;;  %722 = vmatpush.msrb.mxu0 %v366_v55  ;;  %v119_v55 = vld [vmem:[#allocation2 + $0x68] sm:$0xff] }
  0x8f   :  { %v494_v57 = vld [vmem:[#allocation2 + $0xc20] sm:$0xff]  ;;  %742 = vmatpush.msrb.mxu1 %v430_v56  ;;  %v183_v56 = vld [vmem:[#allocation2 + $0x268] sm:$0xff] }
  0x90   :  { %v562_v58 = vld [vmem:[#allocation2 + $0xe40] sm:$0xff]  ;;  %762 = vmatpush.msrb.mxu2 %v494_v57  ;;  %v247_v57 = vld [vmem:[#allocation2 + $0x468] sm:$0xff] }
  0x91   :  { %v362_v59 = vld [vmem:[#allocation2 + $0x800] sm:$0xff]  ;;  %781 = vmatpush.msrb.mxu3 %v562_v58  ;;  %v315_v58 = vld [vmem:[#allocation2 + $0x688] sm:$0xff] }
  0x92   :  { %v426_v60 = vld [vmem:[#allocation2 + $0xa00] sm:$0xff]  ;;  %723 = vmatpush.msrb.mxu0 %v362_v59  ;;  %v115_v59 = vld [vmem:[#allocation2 + $0x48] sm:$0xff] }
  0x93   :  { %v490_v61 = vld [vmem:[#allocation2 + $0xc00] sm:$0xff]  ;;  %743 = vmatpush.msrb.mxu1 %v426_v60  ;;  %v179_v60 = vld [vmem:[#allocation2 + $0x248] sm:$0xff] }
  0x94   :  { %v558_v62 = vld [vmem:[#allocation2 + $0xe20] sm:$0xff]  ;;  %763 = vmatpush.msrb.mxu2 %v490_v61  ;;  %744 = vmatmul.f32.vlgmr.msrb.gmra.mxu1 %v1905_v30  ;;  %v243_v61 = vld [vmem:[#allocation2 + $0x448] sm:$0xff] }
  0x95   :  { %v1864_v63 = vld [vmem:[%s2098_s0] sm:$0xff]  ;;  %782 = vmatpush.msrb.mxu3 %v558_v62  ;;  %808 = vmatpush.msra.mxu1 %v231_v3  ;;  %v311_v62 = vld [vmem:[#allocation2 + $0x668] sm:$0xff] }
  0x96   :  { %644 = vmatmul.f32.vlgmr.msra.gmra.mxu0 %v1864_v63  ;;  %v554_v5 = vld [vmem:[#allocation2 + $0xe00] sm:$0xff]  ;;  %828 = vmatpush.msra.mxu2 %v295_v4  ;;  %v175_v3 = vld [vmem:[#allocation2 + $0x228] sm:$0xff] }
  0x97   :  { %788 = vmatpush.msra.mxu0 %v167_v2  ;;  %783 = vmatpush.msrb.mxu3 %v554_v5  ;;  %v1893_v24 = vld [vmem:[%s2098_s0 + $0x20] sm:$0xff]  ;;  %v111_v2 = vld [vmem:[#allocation2 + $0x28] sm:$0xff] }
  0x98   :  { %809 = vmatpush.msra.mxu1 %v227_v8  ;;  %829 = vmatpush.msra.mxu2 %v291_v9  ;;  %v239_v4 = vld [vmem:[#allocation2 + $0x428] sm:$0xff] }
  0x99   :  { %789 = vmatpush.msra.mxu0 %v163_v6  ;;  %848 = vmatpush.msra.mxu3 %v359_v10  ;;  %v307_v5 = vld [vmem:[#allocation2 + $0x648] sm:$0xff] }
  0x9a   :  { %810 = vmatpush.msra.mxu1 %v223_v12  ;;  %830 = vmatpush.msra.mxu2 %v287_v13  ;;  %v107_v6 = vld [vmem:[#allocation2 + $0x8] sm:$0xff] }
  0x9b   :  { %790 = vmatpush.msra.mxu0 %v159_v11  ;;  %849 = vmatpush.msra.mxu3 %v355_v14  ;;  %v171_v8 = vld [vmem:[#allocation2 + $0x208] sm:$0xff] }
  0x9c   :  { %811 = vmatpush.msra.mxu1 %v219_v16  ;;  %831 = vmatpush.msra.mxu2 %v283_v17  ;;  %v235_v9 = vld [vmem:[#allocation2 + $0x408] sm:$0xff] }
  0x9d   :  { %791 = vmatpush.msra.mxu0 %v155_v15  ;;  %850 = vmatpush.msra.mxu3 %v351_v18  ;;  %v303_v10 = vld [vmem:[#allocation2 + $0x628] sm:$0xff] }
  0x9e   :  { %764 = vmatmul.f32.vlgmr.msrb.gmra.mxu2 %v1888_v19  ;;  %812 = vmatpush.msra.mxu1 %v215_v21  ;;  %v423_v11 = vld [vmem:[#allocation2 + $0x9e8] sm:$0xff] }
  0x9f   :  { %792 = vmatpush.msra.mxu0 %v151_v20  ;;  %832 = vmatpush.msra.mxu2 %v279_v22  ;;  %v487_v12 = vld [vmem:[#allocation2 + $0xbe8] sm:$0xff] }
  0xa0   :  { %851 = vmatpush.msra.mxu3 %v347_v23  ;;  %724 = vmatmul.f32.vlgmr.msrb.gmra.mxu0 %v1893_v24  ;;  %v551_v13 = vld [vmem:[#allocation2 + $0xde8] sm:$0xff] }
  0xa1   :  { %784 = vmatmul.f32.vlgmr.msrb.gmra.mxu3 %v1899_v25  ;;  %793 = vmatpush.msra.mxu0 %v147_v26  ;;  %v299_v14 = vld [vmem:[#allocation2 + $0x608] sm:$0xff] }
  0xa2   :  { %813 = vmatpush.msra.mxu1 %v211_v27  ;;  %833 = vmatpush.msra.mxu2 %v275_v28  ;;  %v419_v15 = vld [vmem:[#allocation2 + $0x9c8] sm:$0xff] }
  0xa3   :  { %852 = vmatpush.msra.mxu3 %v343_v29  ;;  %794 = vmatpush.msra.mxu0 %v143_v31  ;;  %v483_v16 = vld [vmem:[#allocation2 + $0xbc8] sm:$0xff] }
  0xa4   :  { %814 = vmatpush.msra.mxu1 %v207_v32  ;;  %834 = vmatpush.msra.mxu2 %v271_v33  ;;  %v547_v17 = vld [vmem:[#allocation2 + $0xdc8] sm:$0xff] }
  0xa5   :  { %853 = vmatpush.msra.mxu3 %v339_v34  ;;  %795 = vmatpush.msra.mxu0 %v139_v35  ;;  %v615_v18 = vld [vmem:[#allocation2 + $0xfe8] sm:$0xff] }
  0xa6   :  { %815 = vmatpush.msra.mxu1 %v203_v36  ;;  %835 = vmatpush.msra.mxu2 %v267_v37  ;;  %v415_v20 = vld [vmem:[#allocation2 + $0x9a8] sm:$0xff] }
  0xa7   :  { %854 = vmatpush.msra.mxu3 %v335_v38  ;;  %796 = vmatpush.msra.mxu0 %v135_v39  ;;  %v479_v21 = vld [vmem:[#allocation2 + $0xba8] sm:$0xff] }
  0xa8   :  { %816 = vmatpush.msra.mxu1 %v199_v40  ;;  %836 = vmatpush.msra.mxu2 %v263_v41  ;;  %v543_v22 = vld [vmem:[#allocation2 + $0xda8] sm:$0xff] }
  0xa9   :  { %855 = vmatpush.msra.mxu3 %v331_v42  ;;  %797 = vmatpush.msra.mxu0 %v131_v43  ;;  %v611_v23 = vld [vmem:[#allocation2 + $0xfc8] sm:$0xff] }
  0xaa   :  { %817 = vmatpush.msra.mxu1 %v195_v44  ;;  %837 = vmatpush.msra.mxu2 %v259_v45  ;;  %v411_v26 = vld [vmem:[#allocation2 + $0x988] sm:$0xff] }
  0xab   :  { %856 = vmatpush.msra.mxu3 %v327_v46  ;;  %798 = vmatpush.msra.mxu0 %v127_v47  ;;  %v475_v27 = vld [vmem:[#allocation2 + $0xb88] sm:$0xff] }
  0xac   :  { %818 = vmatpush.msra.mxu1 %v191_v48  ;;  %838 = vmatpush.msra.mxu2 %v255_v49  ;;  %v539_v28 = vld [vmem:[#allocation2 + $0xd88] sm:$0xff] }
  0xad   :  { %857 = vmatpush.msra.mxu3 %v323_v50  ;;  %799 = vmatpush.msra.mxu0 %v123_v51  ;;  %v607_v29 = vld [vmem:[#allocation2 + $0xfa8] sm:$0xff] }
  0xae   :  { %819 = vmatpush.msra.mxu1 %v187_v52  ;;  %839 = vmatpush.msra.mxu2 %v251_v53  ;;  %v407_v31 = vld [vmem:[#allocation2 + $0x968] sm:$0xff] }
  0xaf   :  { %858 = vmatpush.msra.mxu3 %v319_v54  ;;  %800 = vmatpush.msra.mxu0 %v119_v55  ;;  %v471_v32 = vld [vmem:[#allocation2 + $0xb68] sm:$0xff] }
  0xb0   :  { %820 = vmatpush.msra.mxu1 %v183_v56  ;;  %840 = vmatpush.msra.mxu2 %v247_v57  ;;  %v535_v33 = vld [vmem:[#allocation2 + $0xd68] sm:$0xff] }
  0xb1   :  { %859 = vmatpush.msra.mxu3 %v315_v58  ;;  %801 = vmatpush.msra.mxu0 %v115_v59  ;;  %v603_v34 = vld [vmem:[#allocation2 + $0xf88] sm:$0xff] }
  0xb2   :  { %821 = vmatpush.msra.mxu1 %v179_v60  ;;  %841 = vmatpush.msra.mxu2 %v243_v61  ;;  %v403_v35 = vld [vmem:[#allocation2 + $0x948] sm:$0xff] }
  0xb3   :  { %860 = vmatpush.msra.mxu3 %v311_v62  ;;  %802 = vmatpush.msra.mxu0 %v111_v2  ;;  %v467_v36 = vld [vmem:[#allocation2 + $0xb48] sm:$0xff] }
  0xb4   :  { %822 = vmatpush.msra.mxu1 %v175_v3  ;;  %842 = vmatpush.msra.mxu2 %v239_v4  ;;  %v531_v37 = vld [vmem:[#allocation2 + $0xd48] sm:$0xff] }
  0xb5   :  { %861 = vmatpush.msra.mxu3 %v307_v5  ;;  %803 = vmatpush.msra.mxu0 %v107_v6  ;;  %v599_v38 = vld [vmem:[#allocation2 + $0xf68] sm:$0xff] }
  0xb6   :  { %823 = vmatpush.msra.mxu1 %v171_v8  ;;  %843 = vmatpush.msra.mxu2 %v235_v9  ;;  %v399_v39 = vld [vmem:[#allocation2 + $0x928] sm:$0xff] }
  0xb7   :  { %862 = vmatpush.msra.mxu3 %v303_v10  ;;  %868 = vmatpush.msrb.mxu0 %v423_v11  ;;  %v463_v40 = vld [vmem:[#allocation2 + $0xb28] sm:$0xff] }
  0xb8   :  { %888 = vmatpush.msrb.mxu1 %v487_v12  ;;  %908 = vmatpush.msrb.mxu2 %v551_v13  ;;  %v527_v41 = vld [vmem:[#allocation2 + $0xd28] sm:$0xff] }
  0xb9   :  { %863 = vmatpush.msra.mxu3 %v299_v14  ;;  %869 = vmatpush.msrb.mxu0 %v419_v15  ;;  %v595_v42 = vld [vmem:[#allocation2 + $0xf48] sm:$0xff] }
  0xba   :  { %889 = vmatpush.msrb.mxu1 %v483_v16  ;;  %909 = vmatpush.msrb.mxu2 %v547_v17  ;;  %v395_v43 = vld [vmem:[#allocation2 + $0x908] sm:$0xff] }
  0xbb   :  { %928 = vmatpush.msrb.mxu3 %v615_v18  ;;  %870 = vmatpush.msrb.mxu0 %v415_v20  ;;  %v459_v44 = vld [vmem:[#allocation2 + $0xb08] sm:$0xff]  ;;  %v168_v20 = vld [vmem:[#allocation2 + $0x1f0] sm:$0xff] }
  0xbc   :  { %890 = vmatpush.msrb.mxu1 %v479_v21  ;;  %910 = vmatpush.msrb.mxu2 %v543_v22  ;;  %v523_v45 = vld [vmem:[#allocation2 + $0xd08] sm:$0xff]  ;;  %v232_v21 = vld [vmem:[#allocation2 + $0x3f0] sm:$0xff] }
  0xbd   :  { %929 = vmatpush.msrb.mxu3 %v611_v23  ;;  %871 = vmatpush.msrb.mxu0 %v411_v26  ;;  %v591_v46 = vld [vmem:[#allocation2 + $0xf28] sm:$0xff]  ;;  %v296_v22 = vld [vmem:[#allocation2 + $0x5f0] sm:$0xff] }
  0xbe   :  { %891 = vmatpush.msrb.mxu1 %v475_v27  ;;  %911 = vmatpush.msrb.mxu2 %v539_v28  ;;  %v391_v47 = vld [vmem:[#allocation2 + $0x8e8] sm:$0xff]  ;;  %v164_v26 = vld [vmem:[#allocation2 + $0x1d0] sm:$0xff] }
  0xbf   :  { %930 = vmatpush.msrb.mxu3 %v607_v29  ;;  %872 = vmatpush.msrb.mxu0 %v407_v31  ;;  %v455_v48 = vld [vmem:[#allocation2 + $0xae8] sm:$0xff]  ;;  %v228_v27 = vld [vmem:[#allocation2 + $0x3d0] sm:$0xff] }
  0xc0   :  { %892 = vmatpush.msrb.mxu1 %v471_v32  ;;  %912 = vmatpush.msrb.mxu2 %v535_v33  ;;  %v519_v49 = vld [vmem:[#allocation2 + $0xce8] sm:$0xff]  ;;  %v292_v28 = vld [vmem:[#allocation2 + $0x5d0] sm:$0xff] }
  0xc1   :  { %931 = vmatpush.msrb.mxu3 %v603_v34  ;;  %873 = vmatpush.msrb.mxu0 %v403_v35  ;;  %v587_v50 = vld [vmem:[#allocation2 + $0xf08] sm:$0xff]  ;;  %v360_v29 = vld [vmem:[#allocation2 + $0x7f0] sm:$0xff] }
  0xc2   :  { %893 = vmatpush.msrb.mxu1 %v467_v36  ;;  %913 = vmatpush.msrb.mxu2 %v531_v37  ;;  %v387_v51 = vld [vmem:[#allocation2 + $0x8c8] sm:$0xff]  ;;  %v160_v31 = vld [vmem:[#allocation2 + $0x1b0] sm:$0xff] }
  0xc3   :  { %932 = vmatpush.msrb.mxu3 %v599_v38  ;;  %874 = vmatpush.msrb.mxu0 %v399_v39  ;;  %v451_v52 = vld [vmem:[#allocation2 + $0xac8] sm:$0xff]  ;;  %v224_v32 = vld [vmem:[#allocation2 + $0x3b0] sm:$0xff] }
  0xc4   :  { %894 = vmatpush.msrb.mxu1 %v463_v40  ;;  %914 = vmatpush.msrb.mxu2 %v527_v41  ;;  %v515_v53 = vld [vmem:[#allocation2 + $0xcc8] sm:$0xff]  ;;  %v356_v33 = vld [vmem:[#allocation2 + $0x7d0] sm:$0xff] }
  0xc5   :  { %933 = vmatpush.msrb.mxu3 %v595_v42  ;;  %875 = vmatpush.msrb.mxu0 %v395_v43  ;;  %v583_v54 = vld [vmem:[#allocation2 + $0xee8] sm:$0xff]  ;;  %v220_v34 = vld [vmem:[#allocation2 + $0x390] sm:$0xff] }
  0xc6   :  { %895 = vmatpush.msrb.mxu1 %v459_v44  ;;  %915 = vmatpush.msrb.mxu2 %v523_v45  ;;  %v383_v55 = vld [vmem:[#allocation2 + $0x8a8] sm:$0xff]  ;;  %v284_v35 = vld [vmem:[#allocation2 + $0x590] sm:$0xff] }
  0xc7   :  { %934 = vmatpush.msrb.mxu3 %v591_v46  ;;  %876 = vmatpush.msrb.mxu0 %v391_v47  ;;  %v447_v56 = vld [vmem:[#allocation2 + $0xaa8] sm:$0xff]  ;;  %v352_v36 = vld [vmem:[#allocation2 + $0x7b0] sm:$0xff] }
  0xc8   :  { %896 = vmatpush.msrb.mxu1 %v455_v48  ;;  %916 = vmatpush.msrb.mxu2 %v519_v49  ;;  %v511_v57 = vld [vmem:[#allocation2 + $0xca8] sm:$0xff]  ;;  %v152_v37 = vld [vmem:[#allocation2 + $0x170] sm:$0xff] }
  0xc9   :  { %935 = vmatpush.msrb.mxu3 %v587_v50  ;;  %877 = vmatpush.msrb.mxu0 %v387_v51  ;;  %v579_v58 = vld [vmem:[#allocation2 + $0xec8] sm:$0xff]  ;;  %v216_v38 = vld [vmem:[#allocation2 + $0x370] sm:$0xff] }
  0xca   :  { %897 = vmatpush.msrb.mxu1 %v451_v52  ;;  %917 = vmatpush.msrb.mxu2 %v515_v53  ;;  %v379_v59 = vld [vmem:[#allocation2 + $0x888] sm:$0xff]  ;;  %v280_v39 = vld [vmem:[#allocation2 + $0x570] sm:$0xff] }
  0xcb   :  { %936 = vmatpush.msrb.mxu3 %v583_v54  ;;  %v443_v60 = vld [vmem:[#allocation2 + $0xa88] sm:$0xff]  ;;  %878 = vmatpush.msrb.mxu0 %v383_v55  ;;  %v348_v40 = vld [vmem:[#allocation2 + $0x790] sm:$0xff] }
  0xcc   :  { %898 = vmatpush.msrb.mxu1 %v447_v56  ;;  %v507_v61 = vld [vmem:[#allocation2 + $0xc88] sm:$0xff]  ;;  %918 = vmatpush.msrb.mxu2 %v511_v57  ;;  %v148_v41 = vld [vmem:[#allocation2 + $0x150] sm:$0xff] }
  0xcd   :  { %v575_v62 = vld [vmem:[#allocation2 + $0xea8] sm:$0xff]  ;;  %937 = vmatpush.msrb.mxu3 %v579_v58  ;;  %879 = vmatpush.msrb.mxu0 %v379_v59  ;;  %v212_v42 = vld [vmem:[#allocation2 + $0x350] sm:$0xff] }
  0xce   :  { %v375_v2 = vld [vmem:[#allocation2 + $0x868] sm:$0xff]  ;;  %899 = vmatpush.msrb.mxu1 %v443_v60  ;;  %919 = vmatpush.msrb.mxu2 %v507_v61  ;;  %v276_v43 = vld [vmem:[#allocation2 + $0x550] sm:$0xff] }
  0xcf   :  { %v439_v3 = vld [vmem:[#allocation2 + $0xa68] sm:$0xff]  ;;  %938 = vmatpush.msrb.mxu3 %v575_v62  ;;  %880 = vmatpush.msrb.mxu0 %v375_v2  ;;  %v344_v44 = vld [vmem:[#allocation2 + $0x770] sm:$0xff] }
  0xd0   :  { %v503_v4 = vld [vmem:[#allocation2 + $0xc68] sm:$0xff]  ;;  %900 = vmatpush.msrb.mxu1 %v439_v3  ;;  %804 = vmatmul.f32.vlgmr.msra.gmra.mxu0 %v1864_v63  ;;  %v288_v63 = vld [vmem:[#allocation2 + $0x5b0] sm:$0xff] }
  0xd1   :  { %v571_v5 = vld [vmem:[#allocation2 + $0xe88] sm:$0xff]  ;;  %920 = vmatpush.msrb.mxu2 %v503_v4  ;;  %824 = vmatmul.f32.vlgmr.msra.gmra.mxu1 %v1869_v0  ;;  %v156_v0 = vld [vmem:[#allocation2 + $0x190] sm:$0xff] }
  0xd2   :  { %v371_v6 = vld [vmem:[#allocation2 + $0x848] sm:$0xff]  ;;  %939 = vmatpush.msrb.mxu3 %v571_v5  ;;  %844 = vmatmul.f32.vlgmr.msra.gmra.mxu2 %v1874_v1  ;;  %v144_v45 = vld [vmem:[#allocation2 + $0x130] sm:$0xff] }
  0xd3   :  { %v435_v8 = vld [vmem:[#allocation2 + $0xa48] sm:$0xff]  ;;  %881 = vmatpush.msrb.mxu0 %v371_v6  ;;  %864 = vmatmul.f32.vlgmr.msra.gmra.mxu3 %v1882_v7  ;;  %v208_v46 = vld [vmem:[#allocation2 + $0x330] sm:$0xff] }
  0xd4   :  { %v499_v9 = vld [vmem:[#allocation2 + $0xc48] sm:$0xff]  ;;  %901 = vmatpush.msrb.mxu1 %v435_v8  ;;  %v272_v47 = vld [vmem:[#allocation2 + $0x530] sm:$0xff] }
  0xd5   :  { %v567_v10 = vld [vmem:[#allocation2 + $0xe68] sm:$0xff]  ;;  %921 = vmatpush.msrb.mxu2 %v499_v9  ;;  %v340_v48 = vld [vmem:[#allocation2 + $0x750] sm:$0xff] }
  0xd6   :  { %v367_v11 = vld [vmem:[#allocation2 + $0x828] sm:$0xff]  ;;  %940 = vmatpush.msrb.mxu3 %v567_v10  ;;  %v140_v49 = vld [vmem:[#allocation2 + $0x110] sm:$0xff] }
  0xd7   :  { %v431_v12 = vld [vmem:[#allocation2 + $0xa28] sm:$0xff]  ;;  %882 = vmatpush.msrb.mxu0 %v367_v11  ;;  %v204_v50 = vld [vmem:[#allocation2 + $0x310] sm:$0xff] }
  0xd8   :  { %v495_v13 = vld [vmem:[#allocation2 + $0xc28] sm:$0xff]  ;;  %902 = vmatpush.msrb.mxu1 %v431_v12  ;;  %v268_v51 = vld [vmem:[#allocation2 + $0x510] sm:$0xff] }
  0xd9   :  { %v563_v14 = vld [vmem:[#allocation2 + $0xe48] sm:$0xff]  ;;  %922 = vmatpush.msrb.mxu2 %v495_v13  ;;  %v336_v52 = vld [vmem:[#allocation2 + $0x730] sm:$0xff] }
  0xda   :  { %v363_v15 = vld [vmem:[#allocation2 + $0x808] sm:$0xff]  ;;  %941 = vmatpush.msrb.mxu3 %v563_v14  ;;  %v136_v53 = vld [vmem:[#allocation2 + $0xf0] sm:$0xff] }
  0xdb   :  { %v427_v16 = vld [vmem:[#allocation2 + $0xa08] sm:$0xff]  ;;  %883 = vmatpush.msrb.mxu0 %v363_v15  ;;  %v200_v54 = vld [vmem:[#allocation2 + $0x2f0] sm:$0xff] }
  0xdc   :  { %v491_v17 = vld [vmem:[#allocation2 + $0xc08] sm:$0xff]  ;;  %903 = vmatpush.msrb.mxu1 %v427_v16  ;;  %884 = vmatmul.f32.vlgmr.msrb.gmra.mxu0 %v1893_v24  ;;  %v264_v55 = vld [vmem:[#allocation2 + $0x4f0] sm:$0xff] }
  0xdd   :  { %v559_v18 = vld [vmem:[#allocation2 + $0xe28] sm:$0xff]  ;;  %923 = vmatpush.msrb.mxu2 %v491_v17  ;;  %948 = vmatpush.msra.mxu0 %v168_v20  ;;  %v332_v56 = vld [vmem:[#allocation2 + $0x710] sm:$0xff] }
  0xde   :  { %942 = vmatpush.msrb.mxu3 %v559_v18  ;;  %v555_v23 = vld [vmem:[#allocation2 + $0xe08] sm:$0xff]  ;;  %968 = vmatpush.msra.mxu1 %v232_v21  ;;  %v132_v57 = vld [vmem:[#allocation2 + $0xd0] sm:$0xff] }
  0xdf   :  { %988 = vmatpush.msra.mxu2 %v296_v22  ;;  %949 = vmatpush.msra.mxu0 %v164_v26  ;;  %v196_v58 = vld [vmem:[#allocation2 + $0x2d0] sm:$0xff] }
  0xe0   :  { %943 = vmatpush.msrb.mxu3 %v555_v23  ;;  %969 = vmatpush.msra.mxu1 %v228_v27  ;;  %v260_v59 = vld [vmem:[#allocation2 + $0x4d0] sm:$0xff] }
  0xe1   :  { %989 = vmatpush.msra.mxu2 %v292_v28  ;;  %950 = vmatpush.msra.mxu0 %v160_v31  ;;  %v328_v60 = vld [vmem:[#allocation2 + $0x6f0] sm:$0xff] }
  0xe2   :  { %1008 = vmatpush.msra.mxu3 %v360_v29  ;;  %970 = vmatpush.msra.mxu1 %v224_v32  ;;  %v128_v61 = vld [vmem:[#allocation2 + $0xb0] sm:$0xff] }
  0xe3   :  { %990 = vmatpush.msra.mxu2 %v288_v63  ;;  %951 = vmatpush.msra.mxu0 %v156_v0  ;;  %v192_v62 = vld [vmem:[#allocation2 + $0x2b0] sm:$0xff] }
  0xe4   :  { %1009 = vmatpush.msra.mxu3 %v356_v33  ;;  %971 = vmatpush.msra.mxu1 %v220_v34  ;;  %v256_v2 = vld [vmem:[#allocation2 + $0x4b0] sm:$0xff] }
  0xe5   :  { %991 = vmatpush.msra.mxu2 %v284_v35  ;;  %952 = vmatpush.msra.mxu0 %v152_v37  ;;  %v324_v3 = vld [vmem:[#allocation2 + $0x6d0] sm:$0xff] }
  0xe6   :  { %1010 = vmatpush.msra.mxu3 %v352_v36  ;;  %924 = vmatmul.f32.vlgmr.msrb.gmra.mxu2 %v1888_v19  ;;  %v124_v4 = vld [vmem:[#allocation2 + $0x90] sm:$0xff] }
  0xe7   :  { %972 = vmatpush.msra.mxu1 %v216_v38  ;;  %992 = vmatpush.msra.mxu2 %v280_v39  ;;  %v188_v5 = vld [vmem:[#allocation2 + $0x290] sm:$0xff] }
  0xe8   :  { %1011 = vmatpush.msra.mxu3 %v348_v40  ;;  %953 = vmatpush.msra.mxu0 %v148_v41  ;;  %v252_v6 = vld [vmem:[#allocation2 + $0x490] sm:$0xff] }
  0xe9   :  { %944 = vmatmul.f32.vlgmr.msrb.gmra.mxu3 %v1899_v25  ;;  %973 = vmatpush.msra.mxu1 %v212_v42  ;;  %v320_v8 = vld [vmem:[#allocation2 + $0x6b0] sm:$0xff] }
  0xea   :  { %993 = vmatpush.msra.mxu2 %v276_v43  ;;  %1012 = vmatpush.msra.mxu3 %v344_v44  ;;  %v120_v9 = vld [vmem:[#allocation2 + $0x70] sm:$0xff] }
  0xeb   :  { %904 = vmatmul.f32.vlgmr.msrb.gmra.mxu1 %v1905_v30  ;;  %954 = vmatpush.msra.mxu0 %v144_v45  ;;  %v184_v10 = vld [vmem:[#allocation2 + $0x270] sm:$0xff] }
  0xec   :  { %974 = vmatpush.msra.mxu1 %v208_v46  ;;  %994 = vmatpush.msra.mxu2 %v272_v47  ;;  %v248_v11 = vld [vmem:[#allocation2 + $0x470] sm:$0xff] }
  0xed   :  { %1013 = vmatpush.msra.mxu3 %v340_v48  ;;  %955 = vmatpush.msra.mxu0 %v140_v49  ;;  %v316_v12 = vld [vmem:[#allocation2 + $0x690] sm:$0xff] }
  0xee   :  { %975 = vmatpush.msra.mxu1 %v204_v50  ;;  %995 = vmatpush.msra.mxu2 %v268_v51  ;;  %v116_v13 = vld [vmem:[#allocation2 + $0x50] sm:$0xff] }
  0xef   :  { %1014 = vmatpush.msra.mxu3 %v336_v52  ;;  %956 = vmatpush.msra.mxu0 %v136_v53  ;;  %v180_v14 = vld [vmem:[#allocation2 + $0x250] sm:$0xff] }
  0xf0   :  { %976 = vmatpush.msra.mxu1 %v200_v54  ;;  %996 = vmatpush.msra.mxu2 %v264_v55  ;;  %v244_v15 = vld [vmem:[#allocation2 + $0x450] sm:$0xff] }
  0xf1   :  { %1015 = vmatpush.msra.mxu3 %v332_v56  ;;  %957 = vmatpush.msra.mxu0 %v132_v57  ;;  %v312_v16 = vld [vmem:[#allocation2 + $0x670] sm:$0xff] }
  0xf2   :  { %977 = vmatpush.msra.mxu1 %v196_v58  ;;  %997 = vmatpush.msra.mxu2 %v260_v59  ;;  %v112_v17 = vld [vmem:[#allocation2 + $0x30] sm:$0xff] }
  0xf3   :  { %1016 = vmatpush.msra.mxu3 %v328_v60  ;;  %958 = vmatpush.msra.mxu0 %v128_v61  ;;  %v176_v18 = vld [vmem:[#allocation2 + $0x230] sm:$0xff] }
  0xf4   :  { %978 = vmatpush.msra.mxu1 %v192_v62  ;;  %998 = vmatpush.msra.mxu2 %v256_v2  ;;  %v240_v20 = vld [vmem:[#allocation2 + $0x430] sm:$0xff] }
  0xf5   :  { %1017 = vmatpush.msra.mxu3 %v324_v3  ;;  %959 = vmatpush.msra.mxu0 %v124_v4  ;;  %v308_v21 = vld [vmem:[#allocation2 + $0x650] sm:$0xff] }
  0xf6   :  { %979 = vmatpush.msra.mxu1 %v188_v5  ;;  %999 = vmatpush.msra.mxu2 %v252_v6  ;;  %v108_v22 = vld [vmem:[#allocation2 + $0x10] sm:$0xff] }
  0xf7   :  { %1018 = vmatpush.msra.mxu3 %v320_v8  ;;  %960 = vmatpush.msra.mxu0 %v120_v9  ;;  %v172_v23 = vld [vmem:[#allocation2 + $0x210] sm:$0xff] }
  0xf8   :  { %980 = vmatpush.msra.mxu1 %v184_v10  ;;  %1000 = vmatpush.msra.mxu2 %v248_v11  ;;  %v236_v26 = vld [vmem:[#allocation2 + $0x410] sm:$0xff] }
  0xf9   :  { %1019 = vmatpush.msra.mxu3 %v316_v12  ;;  %961 = vmatpush.msra.mxu0 %v116_v13  ;;  %v304_v27 = vld [vmem:[#allocation2 + $0x630] sm:$0xff] }
  0xfa   :  { %981 = vmatpush.msra.mxu1 %v180_v14  ;;  %1001 = vmatpush.msra.mxu2 %v244_v15  ;;  %v424_v28 = vld [vmem:[#allocation2 + $0x9f0] sm:$0xff] }
  0xfb   :  { %1020 = vmatpush.msra.mxu3 %v312_v16  ;;  %962 = vmatpush.msra.mxu0 %v112_v17  ;;  %v488_v29 = vld [vmem:[#allocation2 + $0xbf0] sm:$0xff] }
  0xfc   :  { %982 = vmatpush.msra.mxu1 %v176_v18  ;;  %1002 = vmatpush.msra.mxu2 %v240_v20  ;;  %v552_v31 = vld [vmem:[#allocation2 + $0xdf0] sm:$0xff] }
  0xfd   :  { %1021 = vmatpush.msra.mxu3 %v308_v21  ;;  %963 = vmatpush.msra.mxu0 %v108_v22  ;;  %v300_v32 = vld [vmem:[#allocation2 + $0x610] sm:$0xff] }
  0xfe   :  { %983 = vmatpush.msra.mxu1 %v172_v23  ;;  %1003 = vmatpush.msra.mxu2 %v236_v26  ;;  %v420_v63 = vld [vmem:[#allocation2 + $0x9d0] sm:$0xff]  ;;  %v1921_v23 = vld [vmem:[%s2098_s0] sm:$0xff] }
  0xff   :  { %1022 = vmatpush.msra.mxu3 %v304_v27  ;;  %v484_v33 = vld [vmem:[#allocation2 + $0xbd0] sm:$0xff]  ;;  %1028 = vmatpush.msrb.mxu0 %v424_v28 }
 0x100   :  { %1048 = vmatpush.msrb.mxu1 %v488_v29  ;;  %v548_v0 = vld [vmem:[#allocation2 + $0xdd0] sm:$0xff]  ;;  %1068 = vmatpush.msrb.mxu2 %v552_v31  ;;  %v1928_v31 = vld [vmem:[%s2098_s0 + $0x8] sm:$0xff] }
 0x101   :  { %v616_v34 = vld [vmem:[#allocation2 + $0xff0] sm:$0xff]  ;;  %1023 = vmatpush.msra.mxu3 %v300_v32  ;;  %1029 = vmatpush.msrb.mxu0 %v420_v63 }
 0x102   :  { %v416_v35 = vld [vmem:[#allocation2 + $0x9b0] sm:$0xff]  ;;  %1049 = vmatpush.msrb.mxu1 %v484_v33  ;;  %1069 = vmatpush.msrb.mxu2 %v548_v0  ;;  %v169_v0 = vld [vmem:[#allocation2 + $0x1f8] sm:$0xff] }
 0x103   :  { %v480_v36 = vld [vmem:[#allocation2 + $0xbb0] sm:$0xff]  ;;  %1088 = vmatpush.msrb.mxu3 %v616_v34  ;;  %1030 = vmatpush.msrb.mxu0 %v416_v35  ;;  %v233_v34 = vld [vmem:[#allocation2 + $0x3f8] sm:$0xff] }
 0x104   :  { %v544_v37 = vld [vmem:[#allocation2 + $0xdb0] sm:$0xff]  ;;  %1050 = vmatpush.msrb.mxu1 %v480_v36  ;;  %1004 = vmatmul.f32.vlgmr.msra.gmra.mxu2 %v1874_v1  ;;  %v297_v35 = vld [vmem:[#allocation2 + $0x5f8] sm:$0xff] }
 0x105   :  { %v612_v38 = vld [vmem:[#allocation2 + $0xfd0] sm:$0xff]  ;;  %1070 = vmatpush.msrb.mxu2 %v544_v37  ;;  %964 = vmatmul.f32.vlgmr.msra.gmra.mxu0 %v1921_v23  ;;  %v165_v37 = vld [vmem:[#allocation2 + $0x1d8] sm:$0xff] }
 0x106   :  { %v412_v39 = vld [vmem:[#allocation2 + $0x990] sm:$0xff]  ;;  %1089 = vmatpush.msrb.mxu3 %v612_v38  ;;  %984 = vmatmul.f32.vlgmr.msra.gmra.mxu1 %v1928_v31  ;;  %v229_v38 = vld [vmem:[#allocation2 + $0x3d8] sm:$0xff] }
 0x107   :  { %v476_v40 = vld [vmem:[#allocation2 + $0xb90] sm:$0xff]  ;;  %1031 = vmatpush.msrb.mxu0 %v412_v39  ;;  %1024 = vmatmul.f32.vlgmr.msra.gmra.mxu3 %v1882_v7  ;;  %v293_v39 = vld [vmem:[#allocation2 + $0x5d8] sm:$0xff] }
 0x108   :  { %v540_v41 = vld [vmem:[#allocation2 + $0xd90] sm:$0xff]  ;;  %1051 = vmatpush.msrb.mxu1 %v476_v40  ;;  %v361_v40 = vld [vmem:[#allocation2 + $0x7f8] sm:$0xff] }
 0x109   :  { %v608_v42 = vld [vmem:[#allocation2 + $0xfb0] sm:$0xff]  ;;  %1071 = vmatpush.msrb.mxu2 %v540_v41  ;;  %v161_v41 = vld [vmem:[#allocation2 + $0x1b8] sm:$0xff] }
 0x10a   :  { %v408_v43 = vld [vmem:[#allocation2 + $0x970] sm:$0xff]  ;;  %1090 = vmatpush.msrb.mxu3 %v608_v42  ;;  %v225_v42 = vld [vmem:[#allocation2 + $0x3b8] sm:$0xff] }
 0x10b   :  { %v472_v44 = vld [vmem:[#allocation2 + $0xb70] sm:$0xff]  ;;  %1032 = vmatpush.msrb.mxu0 %v408_v43  ;;  %v289_v43 = vld [vmem:[#allocation2 + $0x5b8] sm:$0xff] }
 0x10c   :  { %v536_v45 = vld [vmem:[#allocation2 + $0xd70] sm:$0xff]  ;;  %1052 = vmatpush.msrb.mxu1 %v472_v44  ;;  %v357_v44 = vld [vmem:[#allocation2 + $0x7d8] sm:$0xff] }
 0x10d   :  { %v604_v46 = vld [vmem:[#allocation2 + $0xf90] sm:$0xff]  ;;  %1072 = vmatpush.msrb.mxu2 %v536_v45  ;;  %v221_v45 = vld [vmem:[#allocation2 + $0x398] sm:$0xff] }
 0x10e   :  { %v404_v47 = vld [vmem:[#allocation2 + $0x950] sm:$0xff]  ;;  %1091 = vmatpush.msrb.mxu3 %v604_v46  ;;  %v285_v46 = vld [vmem:[#allocation2 + $0x598] sm:$0xff] }
 0x10f   :  { %v468_v48 = vld [vmem:[#allocation2 + $0xb50] sm:$0xff]  ;;  %1033 = vmatpush.msrb.mxu0 %v404_v47  ;;  %v353_v47 = vld [vmem:[#allocation2 + $0x7b8] sm:$0xff] }
 0x110   :  { %v532_v49 = vld [vmem:[#allocation2 + $0xd50] sm:$0xff]  ;;  %1053 = vmatpush.msrb.mxu1 %v468_v48  ;;  %v281_v48 = vld [vmem:[#allocation2 + $0x578] sm:$0xff] }
 0x111   :  { %v600_v50 = vld [vmem:[#allocation2 + $0xf70] sm:$0xff]  ;;  %1073 = vmatpush.msrb.mxu2 %v532_v49  ;;  %v349_v49 = vld [vmem:[#allocation2 + $0x798] sm:$0xff] }
 0x112   :  { %v400_v51 = vld [vmem:[#allocation2 + $0x930] sm:$0xff]  ;;  %1092 = vmatpush.msrb.mxu3 %v600_v50  ;;  %v149_v50 = vld [vmem:[#allocation2 + $0x158] sm:$0xff] }
 0x113   :  { %v464_v52 = vld [vmem:[#allocation2 + $0xb30] sm:$0xff]  ;;  %1034 = vmatpush.msrb.mxu0 %v400_v51  ;;  %v213_v51 = vld [vmem:[#allocation2 + $0x358] sm:$0xff] }
 0x114   :  { %v528_v53 = vld [vmem:[#allocation2 + $0xd30] sm:$0xff]  ;;  %1054 = vmatpush.msrb.mxu1 %v464_v52  ;;  %v345_v52 = vld [vmem:[#allocation2 + $0x778] sm:$0xff] }
 0x115   :  { %v596_v54 = vld [vmem:[#allocation2 + $0xf50] sm:$0xff]  ;;  %1074 = vmatpush.msrb.mxu2 %v528_v53  ;;  %v145_v53 = vld [vmem:[#allocation2 + $0x138] sm:$0xff] }
 0x116   :  { %v396_v55 = vld [vmem:[#allocation2 + $0x910] sm:$0xff]  ;;  %1093 = vmatpush.msrb.mxu3 %v596_v54  ;;  %v209_v54 = vld [vmem:[#allocation2 + $0x338] sm:$0xff] }
 0x117   :  { %v460_v56 = vld [vmem:[#allocation2 + $0xb10] sm:$0xff]  ;;  %1035 = vmatpush.msrb.mxu0 %v396_v55  ;;  %v273_v55 = vld [vmem:[#allocation2 + $0x538] sm:$0xff] }
 0x118   :  { %v524_v57 = vld [vmem:[#allocation2 + $0xd10] sm:$0xff]  ;;  %1055 = vmatpush.msrb.mxu1 %v460_v56  ;;  %v341_v56 = vld [vmem:[#allocation2 + $0x758] sm:$0xff] }
 0x119   :  { %v592_v58 = vld [vmem:[#allocation2 + $0xf30] sm:$0xff]  ;;  %1075 = vmatpush.msrb.mxu2 %v524_v57  ;;  %v141_v57 = vld [vmem:[#allocation2 + $0x118] sm:$0xff] }
 0x11a   :  { %v392_v59 = vld [vmem:[#allocation2 + $0x8f0] sm:$0xff]  ;;  %1094 = vmatpush.msrb.mxu3 %v592_v58  ;;  %v205_v58 = vld [vmem:[#allocation2 + $0x318] sm:$0xff] }
 0x11b   :  { %v456_v60 = vld [vmem:[#allocation2 + $0xaf0] sm:$0xff]  ;;  %1036 = vmatpush.msrb.mxu0 %v392_v59  ;;  %v269_v59 = vld [vmem:[#allocation2 + $0x518] sm:$0xff] }
 0x11c   :  { %v520_v61 = vld [vmem:[#allocation2 + $0xcf0] sm:$0xff]  ;;  %1056 = vmatpush.msrb.mxu1 %v456_v60  ;;  %v337_v60 = vld [vmem:[#allocation2 + $0x738] sm:$0xff] }
 0x11d   :  { %v588_v62 = vld [vmem:[#allocation2 + $0xf10] sm:$0xff]  ;;  %1076 = vmatpush.msrb.mxu2 %v520_v61  ;;  %v137_v61 = vld [vmem:[#allocation2 + $0xf8] sm:$0xff] }
 0x11e   :  { %v388_v2 = vld [vmem:[#allocation2 + $0x8d0] sm:$0xff]  ;;  %1095 = vmatpush.msrb.mxu3 %v588_v62  ;;  %v201_v62 = vld [vmem:[#allocation2 + $0x2f8] sm:$0xff] }
 0x11f   :  { %v452_v3 = vld [vmem:[#allocation2 + $0xad0] sm:$0xff]  ;;  %1037 = vmatpush.msrb.mxu0 %v388_v2  ;;  %v265_v2 = vld [vmem:[#allocation2 + $0x4f8] sm:$0xff] }
 0x120   :  { %v516_v4 = vld [vmem:[#allocation2 + $0xcd0] sm:$0xff]  ;;  %1057 = vmatpush.msrb.mxu1 %v452_v3  ;;  %v333_v3 = vld [vmem:[#allocation2 + $0x718] sm:$0xff] }
 0x121   :  { %v584_v5 = vld [vmem:[#allocation2 + $0xef0] sm:$0xff]  ;;  %1077 = vmatpush.msrb.mxu2 %v516_v4  ;;  %v133_v4 = vld [vmem:[#allocation2 + $0xd8] sm:$0xff] }
 0x122   :  { %v384_v6 = vld [vmem:[#allocation2 + $0x8b0] sm:$0xff]  ;;  %1096 = vmatpush.msrb.mxu3 %v584_v5  ;;  %v197_v5 = vld [vmem:[#allocation2 + $0x2d8] sm:$0xff] }
 0x123   :  { %v448_v8 = vld [vmem:[#allocation2 + $0xab0] sm:$0xff]  ;;  %1038 = vmatpush.msrb.mxu0 %v384_v6  ;;  %v261_v6 = vld [vmem:[#allocation2 + $0x4d8] sm:$0xff] }
 0x124   :  { %v512_v9 = vld [vmem:[#allocation2 + $0xcb0] sm:$0xff]  ;;  %1058 = vmatpush.msrb.mxu1 %v448_v8  ;;  %v329_v8 = vld [vmem:[#allocation2 + $0x6f8] sm:$0xff] }
 0x125   :  { %v580_v10 = vld [vmem:[#allocation2 + $0xed0] sm:$0xff]  ;;  %1078 = vmatpush.msrb.mxu2 %v512_v9  ;;  %v129_v9 = vld [vmem:[#allocation2 + $0xb8] sm:$0xff] }
 0x126   :  { %v380_v11 = vld [vmem:[#allocation2 + $0x890] sm:$0xff]  ;;  %1097 = vmatpush.msrb.mxu3 %v580_v10  ;;  %v193_v10 = vld [vmem:[#allocation2 + $0x2b8] sm:$0xff] }
 0x127   :  { %v444_v12 = vld [vmem:[#allocation2 + $0xa90] sm:$0xff]  ;;  %1039 = vmatpush.msrb.mxu0 %v380_v11  ;;  %v257_v11 = vld [vmem:[#allocation2 + $0x4b8] sm:$0xff] }
 0x128   :  { %v508_v13 = vld [vmem:[#allocation2 + $0xc90] sm:$0xff]  ;;  %1059 = vmatpush.msrb.mxu1 %v444_v12  ;;  %v325_v12 = vld [vmem:[#allocation2 + $0x6d8] sm:$0xff] }
 0x129   :  { %v576_v14 = vld [vmem:[#allocation2 + $0xeb0] sm:$0xff]  ;;  %1079 = vmatpush.msrb.mxu2 %v508_v13  ;;  %v125_v13 = vld [vmem:[#allocation2 + $0x98] sm:$0xff] }
 0x12a   :  { %v376_v15 = vld [vmem:[#allocation2 + $0x870] sm:$0xff]  ;;  %1098 = vmatpush.msrb.mxu3 %v576_v14  ;;  %v189_v14 = vld [vmem:[#allocation2 + $0x298] sm:$0xff] }
 0x12b   :  { %v440_v16 = vld [vmem:[#allocation2 + $0xa70] sm:$0xff]  ;;  %1040 = vmatpush.msrb.mxu0 %v376_v15  ;;  %v253_v15 = vld [vmem:[#allocation2 + $0x498] sm:$0xff] }
 0x12c   :  { %v504_v17 = vld [vmem:[#allocation2 + $0xc70] sm:$0xff]  ;;  %1060 = vmatpush.msrb.mxu1 %v440_v16  ;;  %v321_v16 = vld [vmem:[#allocation2 + $0x6b8] sm:$0xff] }
 0x12d   :  { %v572_v18 = vld [vmem:[#allocation2 + $0xe90] sm:$0xff]  ;;  %1080 = vmatpush.msrb.mxu2 %v504_v17  ;;  %v121_v17 = vld [vmem:[#allocation2 + $0x78] sm:$0xff] }
 0x12e   :  { %v372_v20 = vld [vmem:[#allocation2 + $0x850] sm:$0xff]  ;;  %1099 = vmatpush.msrb.mxu3 %v572_v18  ;;  %v185_v18 = vld [vmem:[#allocation2 + $0x278] sm:$0xff] }
 0x12f   :  { %v436_v21 = vld [vmem:[#allocation2 + $0xa50] sm:$0xff]  ;;  %1041 = vmatpush.msrb.mxu0 %v372_v20  ;;  %v249_v20 = vld [vmem:[#allocation2 + $0x478] sm:$0xff] }
 0x130   :  { %v500_v22 = vld [vmem:[#allocation2 + $0xc50] sm:$0xff]  ;;  %1061 = vmatpush.msrb.mxu1 %v436_v21  ;;  %v317_v21 = vld [vmem:[#allocation2 + $0x698] sm:$0xff] }
 0x131   :  { %v568_v26 = vld [vmem:[#allocation2 + $0xe70] sm:$0xff]  ;;  %1081 = vmatpush.msrb.mxu2 %v500_v22  ;;  %v117_v22 = vld [vmem:[#allocation2 + $0x58] sm:$0xff] }
 0x132   :  { %v368_v27 = vld [vmem:[#allocation2 + $0x830] sm:$0xff]  ;;  %1100 = vmatpush.msrb.mxu3 %v568_v26  ;;  %v181_v26 = vld [vmem:[#allocation2 + $0x258] sm:$0xff] }
 0x133   :  { %v432_v1 = vld [vmem:[#allocation2 + $0xa30] sm:$0xff]  ;;  %1042 = vmatpush.msrb.mxu0 %v368_v27  ;;  %v245_v27 = vld [vmem:[#allocation2 + $0x458] sm:$0xff] }
 0x134   :  { %v496_v28 = vld [vmem:[#allocation2 + $0xc30] sm:$0xff]  ;;  %1062 = vmatpush.msrb.mxu1 %v432_v1  ;;  %v313_v1 = vld [vmem:[#allocation2 + $0x678] sm:$0xff] }
 0x135   :  { %v564_v29 = vld [vmem:[#allocation2 + $0xe50] sm:$0xff]  ;;  %1082 = vmatpush.msrb.mxu2 %v496_v28  ;;  %v113_v28 = vld [vmem:[#allocation2 + $0x38] sm:$0xff] }
 0x136   :  { %v364_v32 = vld [vmem:[#allocation2 + $0x810] sm:$0xff]  ;;  %1101 = vmatpush.msrb.mxu3 %v564_v29  ;;  %v177_v29 = vld [vmem:[#allocation2 + $0x238] sm:$0xff] }
 0x137   :  { %v428_v63 = vld [vmem:[#allocation2 + $0xa10] sm:$0xff]  ;;  %1043 = vmatpush.msrb.mxu0 %v364_v32  ;;  %v241_v32 = vld [vmem:[#allocation2 + $0x438] sm:$0xff] }
 0x138   :  { %v492_v7 = vld [vmem:[#allocation2 + $0xc10] sm:$0xff]  ;;  %1063 = vmatpush.msrb.mxu1 %v428_v63  ;;  %1044 = vmatmul.f32.vlgmr.msrb.gmra.mxu0 %v1893_v24  ;;  %v153_v24 = vld [vmem:[#allocation2 + $0x178] sm:$0xff] }
 0x139   :  { %v560_v33 = vld [vmem:[#allocation2 + $0xe30] sm:$0xff]  ;;  %1083 = vmatpush.msrb.mxu2 %v492_v7  ;;  %1108 = vmatpush.msra.mxu0 %v169_v0  ;;  %v309_v63 = vld [vmem:[#allocation2 + $0x658] sm:$0xff] }
 0x13a   :  { %1102 = vmatpush.msrb.mxu3 %v560_v33  ;;  %v556_v36 = vld [vmem:[#allocation2 + $0xe10] sm:$0xff]  ;;  %1084 = vmatmul.f32.vlgmr.msrb.gmra.mxu2 %v1888_v19  ;;  %v157_v19 = vld [vmem:[#allocation2 + $0x198] sm:$0xff] }
 0x13b   :  { %1128 = vmatpush.msra.mxu1 %v233_v34  ;;  %1148 = vmatpush.msra.mxu2 %v297_v35  ;;  %v109_v7 = vld [vmem:[#allocation2 + $0x18] sm:$0xff] }
 0x13c   :  { %1103 = vmatpush.msrb.mxu3 %v556_v36  ;;  %1109 = vmatpush.msra.mxu0 %v165_v37  ;;  %v173_v33 = vld [vmem:[#allocation2 + $0x218] sm:$0xff] }
 0x13d   :  { %1104 = vmatmul.f32.vlgmr.msrb.gmra.mxu3 %v1899_v25  ;;  %1129 = vmatpush.msra.mxu1 %v229_v38  ;;  %v217_v25 = vld [vmem:[#allocation2 + $0x378] sm:$0xff] }
 0x13e   :  { %1149 = vmatpush.msra.mxu2 %v293_v39  ;;  %1168 = vmatpush.msra.mxu3 %v361_v40  ;;  %v237_v0 = vld [vmem:[#allocation2 + $0x418] sm:$0xff] }
 0x13f   :  { %1064 = vmatmul.f32.vlgmr.msrb.gmra.mxu1 %v1905_v30  ;;  %1110 = vmatpush.msra.mxu0 %v161_v41  ;;  %v277_v30 = vld [vmem:[#allocation2 + $0x558] sm:$0xff] }
 0x140   :  { %1130 = vmatpush.msra.mxu1 %v225_v42  ;;  %1150 = vmatpush.msra.mxu2 %v289_v43  ;;  %v305_v34 = vld [vmem:[#allocation2 + $0x638] sm:$0xff] }
 0x141   :  { %1169 = vmatpush.msra.mxu3 %v357_v44  ;;  %1111 = vmatpush.msra.mxu0 %v157_v19  ;;  %v425_v35 = vld [vmem:[#allocation2 + $0x9f8] sm:$0xff] }
 0x142   :  { %1131 = vmatpush.msra.mxu1 %v221_v45  ;;  %1151 = vmatpush.msra.mxu2 %v285_v46  ;;  %v489_v36 = vld [vmem:[#allocation2 + $0xbf8] sm:$0xff] }
 0x143   :  { %1170 = vmatpush.msra.mxu3 %v353_v47  ;;  %1112 = vmatpush.msra.mxu0 %v153_v24  ;;  %v553_v37 = vld [vmem:[#allocation2 + $0xdf8] sm:$0xff] }
 0x144   :  { %1132 = vmatpush.msra.mxu1 %v217_v25  ;;  %1152 = vmatpush.msra.mxu2 %v281_v48  ;;  %v301_v38 = vld [vmem:[#allocation2 + $0x618] sm:$0xff] }
 0x145   :  { %1171 = vmatpush.msra.mxu3 %v349_v49  ;;  %1113 = vmatpush.msra.mxu0 %v149_v50  ;;  %v421_v39 = vld [vmem:[#allocation2 + $0x9d8] sm:$0xff] }
 0x146   :  { %1133 = vmatpush.msra.mxu1 %v213_v51  ;;  %1153 = vmatpush.msra.mxu2 %v277_v30  ;;  %v485_v40 = vld [vmem:[#allocation2 + $0xbd8] sm:$0xff] }
 0x147   :  { %1172 = vmatpush.msra.mxu3 %v345_v52  ;;  %1114 = vmatpush.msra.mxu0 %v145_v53  ;;  %v549_v41 = vld [vmem:[#allocation2 + $0xdd8] sm:$0xff] }
 0x148   :  { %1134 = vmatpush.msra.mxu1 %v209_v54  ;;  %1154 = vmatpush.msra.mxu2 %v273_v55  ;;  %v617_v42 = vld [vmem:[#allocation2 + $0xff8] sm:$0xff] }
 0x149   :  { %1173 = vmatpush.msra.mxu3 %v341_v56  ;;  %1115 = vmatpush.msra.mxu0 %v141_v57  ;;  %v417_v43 = vld [vmem:[#allocation2 + $0x9b8] sm:$0xff] }
 0x14a   :  { %1135 = vmatpush.msra.mxu1 %v205_v58  ;;  %1155 = vmatpush.msra.mxu2 %v269_v59  ;;  %v481_v44 = vld [vmem:[#allocation2 + $0xbb8] sm:$0xff]  ;;  %v1935_v59 = vpop.f32.mrf.mxu0 }
 0x14b   :  { %1174 = vmatpush.msra.mxu3 %v337_v60  ;;  %1116 = vmatpush.msra.mxu0 %v137_v61  ;;  %v545_v19 = vld [vmem:[#allocation2 + $0xdb8] sm:$0xff] }
 0x14c   :  { %1136 = vmatpush.msra.mxu1 %v201_v62  ;;  %1156 = vmatpush.msra.mxu2 %v265_v2  ;;  %v613_v45 = vld [vmem:[#allocation2 + $0xfd8] sm:$0xff] }
 0x14d   :  { %1175 = vmatpush.msra.mxu3 %v333_v3  ;;  %1117 = vmatpush.msra.mxu0 %v133_v4  ;;  %v413_v46 = vld [vmem:[#allocation2 + $0x998] sm:$0xff] }
 0x14e   :  { %1137 = vmatpush.msra.mxu1 %v197_v5  ;;  %1157 = vmatpush.msra.mxu2 %v261_v6  ;;  %v477_v47 = vld [vmem:[#allocation2 + $0xb98] sm:$0xff] }
 0x14f   :  { %1176 = vmatpush.msra.mxu3 %v329_v8  ;;  %1118 = vmatpush.msra.mxu0 %v129_v9  ;;  %v541_v24 = vld [vmem:[#allocation2 + $0xd98] sm:$0xff]  ;;  %v1937_v8 = vpop.f32.mrf.mxu1 }
 0x150   :  { %1138 = vmatpush.msra.mxu1 %v193_v10  ;;  %1158 = vmatpush.msra.mxu2 %v257_v11  ;;  %v609_v25 = vld [vmem:[#allocation2 + $0xfb8] sm:$0xff] }
 0x151   :  { %1177 = vmatpush.msra.mxu3 %v325_v12  ;;  %1119 = vmatpush.msra.mxu0 %v125_v13  ;;  %v409_v48 = vld [vmem:[#allocation2 + $0x978] sm:$0xff] }
 0x152   :  { %1139 = vmatpush.msra.mxu1 %v189_v14  ;;  %1159 = vmatpush.msra.mxu2 %v253_v15  ;;  %v473_v49 = vld [vmem:[#allocation2 + $0xb78] sm:$0xff] }
 0x153   :  { %1178 = vmatpush.msra.mxu3 %v321_v16  ;;  %1120 = vmatpush.msra.mxu0 %v121_v17  ;;  %v537_v50 = vld [vmem:[#allocation2 + $0xd78] sm:$0xff]  ;;  %v1939_v17 = vpop.f32.mrf.mxu2 }
 0x154   :  { %1140 = vmatpush.msra.mxu1 %v185_v18  ;;  %1160 = vmatpush.msra.mxu2 %v249_v20  ;;  %v605_v51 = vld [vmem:[#allocation2 + $0xf98] sm:$0xff] }
 0x155   :  { %1179 = vmatpush.msra.mxu3 %v317_v21  ;;  %1121 = vmatpush.msra.mxu0 %v117_v22  ;;  %v405_v30 = vld [vmem:[#allocation2 + $0x958] sm:$0xff] }
 0x156   :  { %1141 = vmatpush.msra.mxu1 %v181_v26  ;;  %1161 = vmatpush.msra.mxu2 %v245_v27  ;;  %v469_v52 = vld [vmem:[#allocation2 + $0xb58] sm:$0xff]  ;;  %v1941_v26 = vpop.f32.mrf.mxu0 }
 0x157   :  { %1180 = vmatpush.msra.mxu3 %v313_v1  ;;  %1122 = vmatpush.msra.mxu0 %v113_v28  ;;  %v533_v53 = vld [vmem:[#allocation2 + $0xd58] sm:$0xff] }
 0x158   :  { %1142 = vmatpush.msra.mxu1 %v177_v29  ;;  %1162 = vmatpush.msra.mxu2 %v241_v32  ;;  %v601_v54 = vld [vmem:[#allocation2 + $0xf78] sm:$0xff]  ;;  %v1943_v29 = vpop.f32.mrf.mxu3 }
 0x159   :  { %1181 = vmatpush.msra.mxu3 %v309_v63  ;;  %1123 = vmatpush.msra.mxu0 %v109_v7  ;;  %v401_v55 = vld [vmem:[#allocation2 + $0x938] sm:$0xff]  ;;  %v1665_v63 = vld [vmem:[%s2098_s0 + $0x10] sm:$0xff] }
 0x15a   :  { %1143 = vmatpush.msra.mxu1 %v173_v33  ;;  %1163 = vmatpush.msra.mxu2 %v237_v0  ;;  %v465_v56 = vld [vmem:[#allocation2 + $0xb38] sm:$0xff]  ;;  %v1948_v33 = vld [vmem:[#allocation4] sm:$0xf]  ;;  %v1950_v0 = vpop.f32.mrf.mxu1 }
 0x15b   :  { %1182 = vmatpush.msra.mxu3 %v305_v34  ;;  %1188 = vmatpush.msrb.mxu0 %v425_v35  ;;  %v529_v57 = vld [vmem:[#allocation2 + $0xd38] sm:$0xff] }
 0x15c   :  { %1208 = vmatpush.msrb.mxu1 %v489_v36  ;;  %1228 = vmatpush.msrb.mxu2 %v553_v37  ;;  %v597_v58 = vld [vmem:[#allocation2 + $0xf58] sm:$0xff] }
 0x15d   :  { %1183 = vmatpush.msra.mxu3 %v301_v38  ;;  %1189 = vmatpush.msrb.mxu0 %v421_v39  ;;  %v397_v60 = vld [vmem:[#allocation2 + $0x918] sm:$0xff] }
 0x15e   :  { %1209 = vmatpush.msrb.mxu1 %v485_v40  ;;  %1229 = vmatpush.msrb.mxu2 %v549_v41  ;;  %v461_v61 = vld [vmem:[#allocation2 + $0xb18] sm:$0xff]  ;;  %v620_v40 = vperm.slane %v1948_v33, 0 }
 0x15f   :  { %1248 = vmatpush.msrb.mxu3 %v617_v42  ;;  %1190 = vmatpush.msrb.mxu0 %v417_v43  ;;  %v525_v62 = vld [vmem:[#allocation2 + $0xd18] sm:$0xff]  ;;  %v621_v43 = vperm.slane %v1948_v33, 1 }
 0x160   :  { %1210 = vmatpush.msrb.mxu1 %v481_v44  ;;  %1230 = vmatpush.msrb.mxu2 %v545_v19  ;;  %v593_v2 = vld [vmem:[#allocation2 + $0xf38] sm:$0xff]  ;;  %v1958_v44 = vpop.f32.mrf.mxu2 }
 0x161   :  { %1249 = vmatpush.msrb.mxu3 %v613_v45  ;;  %1191 = vmatpush.msrb.mxu0 %v413_v46  ;;  %v393_v3 = vld [vmem:[#allocation2 + $0x8f8] sm:$0xff]  ;;  %v805_v45 = vpop.f32.mrf.mxu0 }
 0x162   :  { %1211 = vmatpush.msrb.mxu1 %v477_v47  ;;  %1231 = vmatpush.msrb.mxu2 %v541_v24  ;;  %v457_v4 = vld [vmem:[#allocation2 + $0xaf8] sm:$0xff] }
 0x163   :  { %1250 = vmatpush.msrb.mxu3 %v609_v25  ;;  %1192 = vmatpush.msrb.mxu0 %v409_v48  ;;  %v521_v5 = vld [vmem:[#allocation2 + $0xcf8] sm:$0xff]  ;;  %v646_v25 = vadd.f32 %v1935_v59, %v620_v40 }
 0x164   :  { %1212 = vmatpush.msrb.mxu1 %v473_v49  ;;  %1232 = vmatpush.msrb.mxu2 %v537_v50  ;;  %v589_v6 = vld [vmem:[#allocation2 + $0xf18] sm:$0xff]  ;;  %v806_v50 = vadd.f32 %v805_v45, %v621_v43  ;;  %v1348_v43 = vld [vmem:[#allocation6 + $0x260] sm:$0xff] }
 0x165   :  { %1251 = vmatpush.msrb.mxu3 %v605_v51  ;;  %1193 = vmatpush.msrb.mxu0 %v405_v30  ;;  %v389_v9 = vld [vmem:[#allocation2 + $0x8d8] sm:$0xff]  ;;  %v1962_v51 = vpop.f32.mrf.mxu3  ;;  %v1667_v30 = vld [vmem:[%s2098_s0 + $0x30] sm:$0xff] }
 0x166   :  { %1213 = vmatpush.msrb.mxu1 %v469_v52  ;;  %1233 = vmatpush.msrb.mxu2 %v533_v53  ;;  %v453_v10 = vld [vmem:[#allocation2 + $0xad8] sm:$0xff]  ;;  %v1300_v52 = vld [vmem:[#allocation6 + $0xe0] sm:$0xff] }
 0x167   :  { %1252 = vmatpush.msrb.mxu3 %v601_v54  ;;  %1194 = vmatpush.msrb.mxu0 %v401_v55  ;;  %v517_v11 = vld [vmem:[#allocation2 + $0xcd8] sm:$0xff]  ;;  %v1332_v53 = vld [vmem:[#allocation6 + $0x1e0] sm:$0xff]  ;;  %v666_v55 = vadd.f32 %v1937_v8, %v646_v25 }
 0x168   :  { %1214 = vmatpush.msrb.mxu1 %v465_v56  ;;  %1234 = vmatpush.msrb.mxu2 %v529_v57  ;;  %v585_v12 = vld [vmem:[#allocation2 + $0xef8] sm:$0xff]  ;;  %v1668_v56 = vld [vmem:[%s2098_s0 + $0x20] sm:$0xff] }
 0x169   :  { %1253 = vmatpush.msrb.mxu3 %v597_v58  ;;  %1195 = vmatpush.msrb.mxu0 %v397_v60  ;;  %v385_v13 = vld [vmem:[#allocation2 + $0x8b8] sm:$0xff] }
 0x16a   :  { %1215 = vmatpush.msrb.mxu1 %v461_v61  ;;  %1235 = vmatpush.msrb.mxu2 %v525_v62  ;;  %v449_v14 = vld [vmem:[#allocation2 + $0xab8] sm:$0xff]  ;;  %v845_v61 = vpop.f32.mrf.mxu2  ;;  %v1364_v62 = vld [vmem:[#allocation6 + $0x2e0] sm:$0xff] }
 0x16b   :  { %1254 = vmatpush.msrb.mxu3 %v593_v2  ;;  %1196 = vmatpush.msrb.mxu0 %v393_v3  ;;  %v513_v15 = vld [vmem:[#allocation2 + $0xcb8] sm:$0xff]  ;;  %v1670_v2 = vld [vmem:[%s2098_s0 + $0x28] sm:$0xff] }
 0x16c   :  { %1216 = vmatpush.msrb.mxu1 %v457_v4  ;;  %1236 = vmatpush.msrb.mxu2 %v521_v5  ;;  %v581_v16 = vld [vmem:[#allocation2 + $0xed8] sm:$0xff]  ;;  %v1296_v3 = vld [vmem:[#allocation6 + $0xc0] sm:$0xff] }
 0x16d   :  { %1255 = vmatpush.msrb.mxu3 %v589_v6  ;;  %1197 = vmatpush.msrb.mxu0 %v389_v9  ;;  %v381_v18 = vld [vmem:[#allocation2 + $0x898] sm:$0xff]  ;;  %v1328_v4 = vld [vmem:[#allocation6 + $0x1c0] sm:$0xff]  ;;  %v686_v6 = vadd.f32 %v1939_v17, %v666_v55  ;;  %v885_v17 = vpop.f32.mrf.mxu0 }
 0x16e   :  { %1217 = vmatpush.msrb.mxu1 %v453_v10  ;;  %1237 = vmatpush.msrb.mxu2 %v517_v11  ;;  %v445_v20 = vld [vmem:[#allocation2 + $0xa98] sm:$0xff]  ;;  %v865_v11 = vpop.f32.mrf.mxu3  ;;  %v1272_v55 = vld [vmem:[#allocation6] sm:$0xff] }
 0x16f   :  { %1256 = vmatpush.msrb.mxu3 %v585_v12  ;;  %1198 = vmatpush.msrb.mxu0 %v385_v13  ;;  %v509_v21 = vld [vmem:[#allocation2 + $0xc98] sm:$0xff]  ;;  %v1360_v12 = vld [vmem:[#allocation6 + $0x2c0] sm:$0xff] }
 0x170   :  { %1218 = vmatpush.msrb.mxu1 %v449_v14  ;;  %v577_v22 = vld [vmem:[#allocation2 + $0xeb8] sm:$0xff]  ;;  %1238 = vmatpush.msrb.mxu2 %v513_v15  ;;  %v1292_v13 = vld [vmem:[#allocation6 + $0xa0] sm:$0xff] }
 0x171   :  { %1257 = vmatpush.msrb.mxu3 %v581_v16  ;;  %v377_v27 = vld [vmem:[#allocation2 + $0x878] sm:$0xff]  ;;  %1199 = vmatpush.msrb.mxu0 %v381_v18  ;;  %v1324_v14 = vld [vmem:[#allocation6 + $0x1a0] sm:$0xff]  ;;  %v706_v16 = vadd.f32 %v1943_v29, %v686_v6  ;;  %v1297_v6 = vld [vmem:[#allocation6 + $0xc8] sm:$0xff] }
 0x172   :  { %1219 = vmatpush.msrb.mxu1 %v445_v20  ;;  %v441_v1 = vld [vmem:[#allocation2 + $0xa78] sm:$0xff]  ;;  %1239 = vmatpush.msrb.mxu2 %v509_v21 }
 0x173   :  { %v505_v28 = vld [vmem:[#allocation2 + $0xc78] sm:$0xff]  ;;  %1258 = vmatpush.msrb.mxu3 %v577_v22  ;;  %1164 = vmatmul.f32.vlgmr.msra.gmra.mxu2 %v1665_v63  ;;  %v1356_v22 = vld [vmem:[#allocation6 + $0x2a0] sm:$0xff] }
 0x174   :  { %v573_v32 = vld [vmem:[#allocation2 + $0xe98] sm:$0xff]  ;;  %1200 = vmatpush.msrb.mxu0 %v377_v27  ;;  %1220 = vmatpush.msrb.mxu1 %v441_v1  ;;  %v1288_v27 = vld [vmem:[#allocation6 + $0x80] sm:$0xff] }
 0x175   :  { %v373_v7 = vld [vmem:[#allocation2 + $0x858] sm:$0xff]  ;;  %1240 = vmatpush.msrb.mxu2 %v505_v28  ;;  %1259 = vmatpush.msrb.mxu3 %v573_v32  ;;  %v1320_v1 = vld [vmem:[#allocation6 + $0x180] sm:$0xff]  ;;  %v726_v32 = vadd.f32 %v1941_v26, %v706_v16  ;;  %v925_v26 = vpop.f32.mrf.mxu2  ;;  %v1361_v16 = vld [vmem:[#allocation6 + $0x2c8] sm:$0xff] }
 0x176   :  { %v437_v34 = vld [vmem:[#allocation2 + $0xa58] sm:$0xff]  ;;  %1124 = vmatmul.f32.vlgmr.msra.gmra.mxu0 %v1921_v23  ;;  %1144 = vmatmul.f32.vlgmr.msra.gmra.mxu1 %v1928_v31  ;;  %v825_v31 = vpop.f32.mrf.mxu1 }
 0x177   :  { %v501_v35 = vld [vmem:[#allocation2 + $0xc58] sm:$0xff]  ;;  %1201 = vmatpush.msrb.mxu0 %v373_v7  ;;  %1221 = vmatpush.msrb.mxu1 %v437_v34  ;;  %v826_v60 = vadd.f32 %v825_v31, %v806_v50  ;;  %v1308_v50 = vld [vmem:[#allocation6 + $0x120] sm:$0xff] }
 0x178   :  { %v569_v36 = vld [vmem:[#allocation2 + $0xe78] sm:$0xff]  ;;  %1241 = vmatpush.msrb.mxu2 %v501_v35  ;;  %v1352_v35 = vld [vmem:[#allocation6 + $0x280] sm:$0xff] }
 0x179   :  { %v1666_v37 = vld [vmem:[%s2098_s0 + $0x18] sm:$0xff]  ;;  %1260 = vmatpush.msrb.mxu3 %v569_v36  ;;  %v846_v8 = vadd.f32 %v845_v61, %v826_v60  ;;  %v1284_v36 = vld [vmem:[#allocation6 + $0x60] sm:$0xff]  ;;  %v1301_v61 = vld [vmem:[#allocation6 + $0xe8] sm:$0xff] }
 0x17a   :  { %1184 = vmatmul.f32.vlgmr.msra.gmra.mxu3 %v1666_v37  ;;  %v369_v38 = vld [vmem:[#allocation2 + $0x838] sm:$0xff]  ;;  %v1316_v37 = vld [vmem:[#allocation6 + $0x160] sm:$0xff] }
 0x17b   :  { %v433_v39 = vld [vmem:[#allocation2 + $0xa38] sm:$0xff]  ;;  %1202 = vmatpush.msrb.mxu0 %v369_v38  ;;  %v866_v18 = vadd.f32 %v865_v11, %v846_v8  ;;  %v1329_v8 = vld [vmem:[#allocation6 + $0x1c8] sm:$0xff] }
 0x17c   :  { %v497_v41 = vld [vmem:[#allocation2 + $0xc38] sm:$0xff]  ;;  %1222 = vmatpush.msrb.mxu1 %v433_v39  ;;  %v746_v39 = vadd.f32 %v1950_v0, %v726_v32  ;;  %v945_v0 = vpop.f32.mrf.mxu3  ;;  %v622_v32 = vperm.slane %v1948_v33, 2 }
 0x17d   :  { %v565_v42 = vld [vmem:[#allocation2 + $0xe58] sm:$0xff]  ;;  %1242 = vmatpush.msrb.mxu2 %v497_v41  ;;  %v886_v63 = vadd.f32 %v885_v17, %v866_v18  ;;  %v1289_v17 = vld [vmem:[#allocation6 + $0x88] sm:$0xff] }
 0x17e   :  { %v365_v23 = vld [vmem:[#allocation2 + $0x818] sm:$0xff]  ;;  %1261 = vmatpush.msrb.mxu3 %v565_v42  ;;  %v905_v29 = vpop.f32.mrf.mxu1 }
 0x17f   :  { %v429_v19 = vld [vmem:[#allocation2 + $0xa18] sm:$0xff]  ;;  %1203 = vmatpush.msrb.mxu0 %v365_v23  ;;  %v906_v40 = vadd.f32 %v905_v29, %v886_v63  ;;  %v1280_v23 = vld [vmem:[#allocation6 + $0x40] sm:$0xff]  ;;  %v1285_v29 = vld [vmem:[#allocation6 + $0x68] sm:$0xff] }
 0x180   :  { %v493_v46 = vld [vmem:[#allocation2 + $0xc18] sm:$0xff]  ;;  %1223 = vmatpush.msrb.mxu1 %v429_v19  ;;  %1204 = vmatmul.f32.vlgmr.msrb.gmra.mxu0 %v1668_v56  ;;  %v1312_v19 = vld [vmem:[#allocation6 + $0x140] sm:$0xff] }
 0x181   :  { %v561_v47 = vld [vmem:[#allocation2 + $0xe38] sm:$0xff]  ;;  %1243 = vmatpush.msrb.mxu2 %v493_v46  ;;  %1224 = vmatmul.f32.vlgmr.msrb.gmra.mxu1 %v1670_v2  ;;  %v766_v46 = vadd.f32 %v1958_v44, %v746_v39  ;;  %v1304_v56 = vld [vmem:[#allocation6 + $0x100] sm:$0xff] }
 0x182   :  { %v1302_v24 = vld [vmem:[#allocation6 + $0xf0] sm:$0xff]  ;;  %1262 = vmatpush.msrb.mxu3 %v561_v47  ;;  %1244 = vmatmul.f32.vlgmr.msrb.gmra.mxu2 %v1667_v30  ;;  %v926_v47 = vadd.f32 %v925_v26, %v906_v40  ;;  %v1336_v2 = vld [vmem:[#allocation6 + $0x200] sm:$0xff]  ;;  %v1327_v11 = vld [vmem:[#allocation6 + $0x1b8] sm:$0xff] }
 0x183   :  { %v1334_v48 = vld [vmem:[#allocation6 + $0x1f0] sm:$0xff]  ;;  %1406 = vmatpush.msra.mxu0 %v1302_v24  ;;  %v1983_v30 = vadd.f32 %v1962_v51, %v766_v46  ;;  %v1335_v51 = vld [vmem:[#allocation6 + $0x1f8] sm:$0xff] }
 0x184   :  { %v557_v49 = vld [vmem:[#allocation2 + $0xe18] sm:$0xff]  ;;  %1426 = vmatpush.msra.mxu1 %v1334_v48  ;;  %v1344_v48 = vld [vmem:[#allocation6 + $0x240] sm:$0xff] }
 0x185   :  { %1263 = vmatpush.msrb.mxu3 %v557_v49  ;;  %v1366_v54 = vld [vmem:[#allocation6 + $0x2f0] sm:$0xff]  ;;  %1407 = vmatpush.msra.mxu0 %v1300_v52  ;;  %v1276_v49 = vld [vmem:[#allocation6 + $0x20] sm:$0xff]  ;;  %v1985_v52 = vadd.f32 %v945_v0, %v926_v47  ;;  %v1291_v18 = vld [vmem:[#allocation6 + $0x98] sm:$0xff] }
 0x186   :  { %v1669_v57 = vld [vmem:[%s2098_s0 + $0x38] sm:$0xff]  ;;  %1427 = vmatpush.msra.mxu1 %v1332_v53  ;;  %1446 = vmatpush.msra.mxu2 %v1366_v54  ;;  %v1340_v54 = vld [vmem:[#allocation6 + $0x220] sm:$0xff]  ;;  %v1349_v47 = vld [vmem:[#allocation6 + $0x268] sm:$0xff] }
 0x187   :  { %1264 = vmatmul.f32.vlgmr.msrb.gmra.mxu3 %v1669_v57  ;;  %v1298_v58 = vld [vmem:[#allocation6 + $0xd0] sm:$0xff]  ;;  %v1268_v57 = vmax.f32 %v1983_v30, 0.0  ;;  %v1355_v63 = vld [vmem:[#allocation6 + $0x298] sm:$0xff]  ;;  %v1005_v46 = vpop.f32.mrf.mxu2  ;;  %v1372_v30 = vld [vmem:[#allocation6 + $0x320] sm:$0xff] }
 0x188   :  { %v1330_v59 = vld [vmem:[#allocation6 + $0x1d0] sm:$0xff]  ;;  %1408 = vmatpush.msra.mxu0 %v1298_v58  ;;  %1447 = vmatpush.msra.mxu2 %v1364_v62  ;;  %v1269_v58 = vmax.f32 %v1985_v52, 0.0  ;;  %v1333_v62 = vld [vmem:[#allocation6 + $0x1e8] sm:$0xff]  ;;  %v1283_v39 = vld [vmem:[#allocation6 + $0x58] sm:$0xff] }
 0x189   :  { %1428 = vmatpush.msra.mxu1 %v1330_v59  ;;  %v1362_v5 = vld [vmem:[#allocation6 + $0x2d0] sm:$0xff]  ;;  %v1303_v59 = vld [vmem:[#allocation6 + $0xf8] sm:$0xff] }
 0x18a   :  { %v1294_v9 = vld [vmem:[#allocation6 + $0xb0] sm:$0xff]  ;;  %1409 = vmatpush.msra.mxu0 %v1296_v3  ;;  %1448 = vmatpush.msra.mxu2 %v1362_v5  ;;  %v1299_v3 = vld [vmem:[#allocation6 + $0xd8] sm:$0xff] }
 0x18b   :  { %v1326_v10 = vld [vmem:[#allocation6 + $0x1b0] sm:$0xff]  ;;  %1429 = vmatpush.msra.mxu1 %v1328_v4  ;;  %v1331_v4 = vld [vmem:[#allocation6 + $0x1d8] sm:$0xff] }
 0x18c   :  { %1410 = vmatpush.msra.mxu0 %v1294_v9  ;;  %v1358_v15 = vld [vmem:[#allocation6 + $0x2b0] sm:$0xff]  ;;  %1449 = vmatpush.msra.mxu2 %v1360_v12  ;;  %v1367_v5 = vld [vmem:[#allocation6 + $0x2f8] sm:$0xff]  ;;  %v1365_v9 = vld [vmem:[#allocation6 + $0x2e8] sm:$0xff] }
 0x18d   :  { %1430 = vmatpush.msra.mxu1 %v1326_v10  ;;  %v1290_v20 = vld [vmem:[#allocation6 + $0x90] sm:$0xff]  ;;  %v1295_v10 = vld [vmem:[#allocation6 + $0xb8] sm:$0xff] }
 0x18e   :  { %v1322_v21 = vld [vmem:[#allocation6 + $0x190] sm:$0xff]  ;;  %1411 = vmatpush.msra.mxu0 %v1292_v13  ;;  %1450 = vmatpush.msra.mxu2 %v1358_v15  ;;  %v1363_v12 = vld [vmem:[#allocation6 + $0x2d8] sm:$0xff]  ;;  %v1293_v13 = vld [vmem:[#allocation6 + $0xa8] sm:$0xff] }
 0x18f   :  { %1431 = vmatpush.msra.mxu1 %v1324_v14  ;;  %v1354_v28 = vld [vmem:[#allocation6 + $0x290] sm:$0xff]  ;;  %v1325_v14 = vld [vmem:[#allocation6 + $0x1a8] sm:$0xff]  ;;  %v1315_v40 = vld [vmem:[#allocation6 + $0x158] sm:$0xff] }
 0x190   :  { %1412 = vmatpush.msra.mxu0 %v1290_v20  ;;  %v1286_v7 = vld [vmem:[#allocation6 + $0x70] sm:$0xff]  ;;  %1451 = vmatpush.msra.mxu2 %v1356_v22  ;;  %v1323_v20 = vld [vmem:[#allocation6 + $0x198] sm:$0xff]  ;;  %v1321_v22 = vld [vmem:[#allocation6 + $0x188] sm:$0xff] }
 0x191   :  { %1432 = vmatpush.msra.mxu1 %v1322_v21  ;;  %v1318_v34 = vld [vmem:[#allocation6 + $0x170] sm:$0xff]  ;;  %v1359_v21 = vld [vmem:[#allocation6 + $0x2b8] sm:$0xff] }
 0x192   :  { %1413 = vmatpush.msra.mxu0 %v1288_v27  ;;  %1452 = vmatpush.msra.mxu2 %v1354_v28  ;;  %v1350_v38 = vld [vmem:[#allocation6 + $0x270] sm:$0xff]  ;;  %v1357_v27 = vld [vmem:[#allocation6 + $0x2a8] sm:$0xff]  ;;  %v1319_v28 = vld [vmem:[#allocation6 + $0x178] sm:$0xff] }
 0x193   :  { %1433 = vmatpush.msra.mxu1 %v1320_v1  ;;  %v1282_v41 = vld [vmem:[#allocation6 + $0x50] sm:$0xff]  ;;  %v1287_v1 = vld [vmem:[#allocation6 + $0x78] sm:$0xff] }
 0x194   :  { %1414 = vmatpush.msra.mxu0 %v1286_v7  ;;  %v1314_v42 = vld [vmem:[#allocation6 + $0x150] sm:$0xff]  ;;  %1453 = vmatpush.msra.mxu2 %v1352_v35  ;;  %v1396_v7 = vld [vmem:[#allocation6 + $0x3e0] sm:$0xff]  ;;  %v1317_v35 = vld [vmem:[#allocation6 + $0x168] sm:$0xff] }
 0x195   :  { %1434 = vmatpush.msra.mxu1 %v1318_v34  ;;  %v1346_v45 = vld [vmem:[#allocation6 + $0x250] sm:$0xff]  ;;  %v1311_v0 = vld [vmem:[#allocation6 + $0x138] sm:$0xff] }
 0x196   :  { %1415 = vmatpush.msra.mxu0 %v1284_v36  ;;  %1454 = vmatpush.msra.mxu2 %v1350_v38  ;;  %v1278_v24 = vld [vmem:[#allocation6 + $0x30] sm:$0xff]  ;;  %v965_v36 = vpop.f32.mrf.mxu0  ;;  %v1392_v38 = vld [vmem:[#allocation6 + $0x3c0] sm:$0xff] }
 0x197   :  { %1435 = vmatpush.msra.mxu1 %v1316_v37  ;;  %v1310_v25 = vld [vmem:[#allocation6 + $0x130] sm:$0xff]  ;;  %v1353_v37 = vld [vmem:[#allocation6 + $0x288] sm:$0xff] }
 0x198   :  { %1416 = vmatpush.msra.mxu0 %v1282_v41  ;;  %1455 = vmatpush.msra.mxu2 %v1348_v43  ;;  %v1342_v31 = vld [vmem:[#allocation6 + $0x230] sm:$0xff]  ;;  %v966_v41 = vadd.f32 %v965_v36, %v622_v32  ;;  %v1281_v43 = vld [vmem:[#allocation6 + $0x48] sm:$0xff]  ;;  %v1387_v32 = vld [vmem:[#allocation6 + $0x398] sm:$0xff] }
 0x199   :  { %1436 = vmatpush.msra.mxu1 %v1314_v42  ;;  %v1274_v44 = vld [vmem:[#allocation6 + $0x10] sm:$0xff]  ;;  %v1351_v42 = vld [vmem:[#allocation6 + $0x278] sm:$0xff] }
 0x19a   :  { %1417 = vmatpush.msra.mxu0 %v1280_v23  ;;  %1456 = vmatpush.msra.mxu2 %v1346_v45  ;;  %v1306_v53 = vld [vmem:[#allocation6 + $0x110] sm:$0xff]  ;;  %v1313_v23 = vld [vmem:[#allocation6 + $0x148] sm:$0xff]  ;;  %v1375_v36 = vld [vmem:[#allocation6 + $0x338] sm:$0xff] }
 0x19b   :  { %1437 = vmatpush.msra.mxu1 %v1312_v19  ;;  %v1338_v60 = vld [vmem:[#allocation6 + $0x210] sm:$0xff]  ;;  %v985_v19 = vpop.f32.mrf.mxu1 }
 0x19c   :  { %1418 = vmatpush.msra.mxu0 %v1278_v24  ;;  %1457 = vmatpush.msra.mxu2 %v1344_v48  ;;  %v1398_v15 = vld [vmem:[#allocation6 + $0x3f0] sm:$0xff]  ;;  %v986_v45 = vadd.f32 %v985_v19, %v966_v41  ;;  %v1388_v24 = vld [vmem:[#allocation6 + $0x3a0] sm:$0xff] }
 0x19d   :  { %1438 = vmatpush.msra.mxu1 %v1310_v25  ;;  %1466 = vmatpush.msra.mxu3 %v1398_v15  ;;  %v1394_v34 = vld [vmem:[#allocation6 + $0x3d0] sm:$0xff]  ;;  %v1279_v25 = vld [vmem:[#allocation6 + $0x38] sm:$0xff]  ;;  %v1337_v15 = vld [vmem:[#allocation6 + $0x208] sm:$0xff] }
 0x19e   :  { %1419 = vmatpush.msra.mxu0 %v1276_v49  ;;  %1458 = vmatpush.msra.mxu2 %v1342_v31  ;;  %v1390_v26 = vld [vmem:[#allocation6 + $0x3b0] sm:$0xff]  ;;  %v1006_v48 = vadd.f32 %v1005_v46, %v986_v45  ;;  %v1347_v49 = vld [vmem:[#allocation6 + $0x258] sm:$0xff]  ;;  %v1277_v31 = vld [vmem:[#allocation6 + $0x28] sm:$0xff] }
 0x19f   :  { %1439 = vmatpush.msra.mxu1 %v1308_v50  ;;  %1467 = vmatpush.msra.mxu3 %v1396_v7  ;;  %v1386_v50 = vld [vmem:[#allocation6 + $0x390] sm:$0xff]  ;;  %v1383_v7 = vld [vmem:[#allocation6 + $0x378] sm:$0xff] }
 0x1a0   :  { %1420 = vmatpush.msra.mxu0 %v1274_v44  ;;  %1459 = vmatpush.msra.mxu2 %v1340_v54  ;;  %v1309_v44 = vld [vmem:[#allocation6 + $0x128] sm:$0xff]  ;;  %v1370_v52 = vld [vmem:[#allocation6 + $0x310] sm:$0xff] }
 0x1a1   :  { %1440 = vmatpush.msra.mxu1 %v1306_v53  ;;  %1468 = vmatpush.msra.mxu3 %v1394_v34  ;;  %v1025_v53 = vpop.f32.mrf.mxu3  ;;  %v1381_v34 = vld [vmem:[#allocation6 + $0x368] sm:$0xff] }
 0x1a2   :  { %1421 = vmatpush.msra.mxu0 %v1272_v55  ;;  %1460 = vmatpush.msra.mxu2 %v1338_v60  ;;  %v1026_v54 = vadd.f32 %v1025_v53, %v1006_v48  ;;  %v1345_v55 = vld [vmem:[#allocation6 + $0x248] sm:$0xff] }
 0x1a3   :  { %1441 = vmatpush.msra.mxu1 %v1304_v56  ;;  %1422 = vmatmul.f32.vlgmr.msra.gmra.mxu0 %v1268_v57  ;;  %v1384_v56 = vld [vmem:[#allocation6 + $0x380] sm:$0xff]  ;;  %v1582_v53 = vld [vmem:[%s2103_s5 + $0x70] sm:$0xff] }
 0x1a4   :  { %1442 = vmatmul.f32.vlgmr.msra.gmra.mxu1 %v1269_v58  ;;  %1486 = vmatpush.msrb.mxu0 %v1303_v59  ;;  %v1275_v59 = vld [vmem:[#allocation6 + $0x18] sm:$0xff] }
 0x1a5   :  { %1506 = vmatpush.msrb.mxu1 %v1335_v51  ;;  %1461 = vmatpush.msra.mxu2 %v1336_v2  ;;  %v1307_v51 = vld [vmem:[#allocation6 + $0x118] sm:$0xff]  ;;  %v1273_v2 = vld [vmem:[#allocation6 + $0x8] sm:$0xff] }
 0x1a6   :  { %1487 = vmatpush.msrb.mxu0 %v1301_v61  ;;  %1469 = vmatpush.msra.mxu3 %v1392_v38  ;;  %v1343_v61 = vld [vmem:[#allocation6 + $0x238] sm:$0xff] }
 0x1a7   :  { %1507 = vmatpush.msrb.mxu1 %v1333_v62  ;;  %1526 = vmatpush.msrb.mxu2 %v1367_v5  ;;  %v1382_v62 = vld [vmem:[#allocation6 + $0x370] sm:$0xff]  ;;  %v1371_v38 = vld [vmem:[#allocation6 + $0x318] sm:$0xff] }
 0x1a8   :  { %1488 = vmatpush.msrb.mxu0 %v1299_v3  ;;  %1470 = vmatpush.msra.mxu3 %v1390_v26  ;;  %v1305_v3 = vld [vmem:[#allocation6 + $0x108] sm:$0xff] }
 0x1a9   :  { %1508 = vmatpush.msrb.mxu1 %v1331_v4  ;;  %1527 = vmatpush.msrb.mxu2 %v1365_v9 }
 0x1aa   :  { %1489 = vmatpush.msrb.mxu0 %v1297_v6  ;;  %1471 = vmatpush.msra.mxu3 %v1388_v24  ;;  %v1341_v6 = vld [vmem:[#allocation6 + $0x228] sm:$0xff] }
 0x1ab   :  { %1509 = vmatpush.msrb.mxu1 %v1329_v8  ;;  %1528 = vmatpush.msrb.mxu2 %v1363_v12  ;;  %v1380_v8 = vld [vmem:[#allocation6 + $0x360] sm:$0xff]  ;;  %v1378_v12 = vld [vmem:[#allocation6 + $0x350] sm:$0xff] }
 0x1ac   :  { %1490 = vmatpush.msrb.mxu0 %v1295_v10  ;;  %1472 = vmatpush.msra.mxu3 %v1386_v50 }
 0x1ad   :  { %1510 = vmatpush.msrb.mxu1 %v1327_v11  ;;  %1529 = vmatpush.msrb.mxu2 %v1361_v16  ;;  %v1339_v11 = vld [vmem:[#allocation6 + $0x218] sm:$0xff]  ;;  %v1376_v16 = vld [vmem:[#allocation6 + $0x340] sm:$0xff] }
 0x1ae   :  { %1491 = vmatpush.msrb.mxu0 %v1293_v13  ;;  %1473 = vmatpush.msra.mxu3 %v1384_v56  ;;  %v1598_v56 = vld [vmem:[%s2103_s5 + $0xf0] sm:$0xff] }
 0x1af   :  { %1511 = vmatpush.msrb.mxu1 %v1325_v14  ;;  %1530 = vmatpush.msrb.mxu2 %v1359_v21 }
 0x1b0   :  { %1492 = vmatpush.msrb.mxu0 %v1291_v18  ;;  %1474 = vmatpush.msra.mxu3 %v1382_v62  ;;  %v1595_v62 = vld [vmem:[%s2103_s5 + $0xd8] sm:$0xff] }
 0x1b1   :  { %1512 = vmatpush.msrb.mxu1 %v1323_v20  ;;  %1531 = vmatpush.msrb.mxu2 %v1357_v27  ;;  %v1374_v20 = vld [vmem:[#allocation6 + $0x330] sm:$0xff]  ;;  %v1393_v27 = vld [vmem:[#allocation6 + $0x3c8] sm:$0xff] }
 0x1b2   :  { %1493 = vmatpush.msrb.mxu0 %v1289_v17  ;;  %1475 = vmatpush.msra.mxu3 %v1380_v8  ;;  %v1397_v17 = vld [vmem:[#allocation6 + $0x3e8] sm:$0xff]  ;;  %v1592_v8 = vld [vmem:[%s2103_s5 + $0xc0] sm:$0xff] }
 0x1b3   :  { %1513 = vmatpush.msrb.mxu1 %v1321_v22  ;;  %1532 = vmatpush.msrb.mxu2 %v1355_v63  ;;  %v1395_v22 = vld [vmem:[#allocation6 + $0x3d8] sm:$0xff]  ;;  %v1385_v63 = vld [vmem:[#allocation6 + $0x388] sm:$0xff] }
 0x1b4   :  { %1494 = vmatpush.msrb.mxu0 %v1287_v1  ;;  %1476 = vmatpush.msra.mxu3 %v1378_v12  ;;  %v1391_v1 = vld [vmem:[#allocation6 + $0x3b8] sm:$0xff]  ;;  %v1573_v12 = vld [vmem:[%s2103_s5 + $0x28] sm:$0xff] }
 0x1b5   :  { %1514 = vmatpush.msrb.mxu1 %v1319_v28  ;;  %1533 = vmatpush.msrb.mxu2 %v1353_v37  ;;  %v1045_v60 = vpop.f32.mrf.mxu0  ;;  %v1389_v28 = vld [vmem:[#allocation6 + $0x3a8] sm:$0xff] }
 0x1b6   :  { %1495 = vmatpush.msrb.mxu0 %v1285_v29  ;;  %v1046_v4 = vadd.f32 %v1045_v60, %v1026_v54  ;;  %1477 = vmatpush.msra.mxu3 %v1376_v16  ;;  %v1379_v29 = vld [vmem:[#allocation6 + $0x358] sm:$0xff]  ;;  %v1373_v37 = vld [vmem:[#allocation6 + $0x328] sm:$0xff] }
 0x1b7   :  { %1515 = vmatpush.msrb.mxu1 %v1317_v35  ;;  %1534 = vmatpush.msrb.mxu2 %v1351_v42  ;;  %v1377_v35 = vld [vmem:[#allocation6 + $0x348] sm:$0xff]  ;;  %v1599_v54 = vld [vmem:[%s2103_s5 + $0xf8] sm:$0xff]  ;;  %v1596_v60 = vld [vmem:[%s2103_s5 + $0xe0] sm:$0xff] }
 0x1b8   :  { %1496 = vmatpush.msrb.mxu0 %v1283_v39  ;;  %1478 = vmatpush.msra.mxu3 %v1374_v20  ;;  %v1369_v39 = vld [vmem:[#allocation6 + $0x308] sm:$0xff] }
 0x1b9   :  { %1516 = vmatpush.msrb.mxu1 %v1315_v40  ;;  %1535 = vmatpush.msrb.mxu2 %v1349_v47  ;;  %v623_v40 = vperm.slane %v1948_v33, 3  ;;  %v1583_v33 = vld [vmem:[%s2103_s5 + $0x78] sm:$0xff]  ;;  %v1590_v16 = vld [vmem:[%s2103_s5 + $0xb0] sm:$0xff]  ;;  %v1589_v20 = vld [vmem:[%s2103_s5 + $0xa8] sm:$0xff] }
 0x1ba   :  { %1497 = vmatpush.msrb.mxu0 %v1281_v43  ;;  %1479 = vmatpush.msra.mxu3 %v1372_v30  ;;  %v1588_v30 = vld [vmem:[%s2103_s5 + $0xa0] sm:$0xff] }
 0x1bb   :  { %1517 = vmatpush.msrb.mxu1 %v1313_v23  ;;  %1536 = vmatpush.msrb.mxu2 %v1347_v49 }
 0x1bc   :  { %1498 = vmatpush.msrb.mxu0 %v1279_v25  ;;  %v1065_v5 = vpop.f32.mrf.mxu1  ;;  %1480 = vmatpush.msra.mxu3 %v1370_v52  ;;  %v1587_v52 = vld [vmem:[%s2103_s5 + $0x98] sm:$0xff] }
 0x1bd   :  { %1518 = vmatpush.msrb.mxu1 %v1311_v0  ;;  %1537 = vmatpush.msrb.mxu2 %v1345_v55  ;;  %v1066_v9 = vadd.f32 %v1065_v5, %v1046_v4  ;;  %v1085_v10 = vpop.f32.mrf.mxu2  ;;  %v1581_v55 = vld [vmem:[%s2103_s5 + $0x68] sm:$0xff] }
 0x1be   :  { %1499 = vmatpush.msrb.mxu0 %v1277_v31  ;;  %v1577_v4 = vld [vmem:[%s2103_s5 + $0x48] sm:$0xff] }
 0x1bf   :  { %1519 = vmatpush.msrb.mxu1 %v1309_v44  ;;  %1538 = vmatpush.msrb.mxu2 %v1343_v61  ;;  %v1086_v13 = vadd.f32 %v1085_v10, %v1066_v9  ;;  %v1579_v61 = vld [vmem:[%s2103_s5 + $0x58] sm:$0xff]  ;;  %v1593_v5 = vld [vmem:[%s2103_s5 + $0xc8] sm:$0xff] }
 0x1c0   :  { %1500 = vmatpush.msrb.mxu0 %v1275_v59  ;;  %v1105_v14 = vpop.f32.mrf.mxu3  ;;  %v1597_v59 = vld [vmem:[%s2103_s5 + $0xe8] sm:$0xff]  ;;  %v1575_v9 = vld [vmem:[%s2103_s5 + $0x38] sm:$0xff] }
 0x1c1   :  { %1520 = vmatpush.msrb.mxu1 %v1307_v51  ;;  %1539 = vmatpush.msrb.mxu2 %v1341_v6  ;;  %v1106_v18 = vadd.f32 %v1105_v14, %v1086_v13  ;;  %v1580_v51 = vld [vmem:[%s2103_s5 + $0x60] sm:$0xff]  ;;  %v1591_v10 = vld [vmem:[%s2103_s5 + $0xb8] sm:$0xff] }
 0x1c2   :  { %1501 = vmatpush.msrb.mxu0 %v1273_v2  ;;  %v1578_v2 = vld [vmem:[%s2103_s5 + $0x50] sm:$0xff]  ;;  %v1576_v6 = vld [vmem:[%s2103_s5 + $0x40] sm:$0xff]  ;;  %v1571_v14 = vld [vmem:[%s2103_s5 + $0x18] sm:$0xff] }
 0x1c3   :  { %1521 = vmatpush.msrb.mxu1 %v1305_v3  ;;  %1502 = vmatmul.f32.vlgmr.msrb.gmra.mxu0 %v1268_v57  ;;  %v1270_v21 = vmax.f32 %v1106_v18, 0.0  ;;  %v1368_v57 = vld [vmem:[#allocation6 + $0x300] sm:$0xff]  ;;  %v1594_v3 = vld [vmem:[%s2103_s5 + $0xd0] sm:$0xff] }
 0x1c4   :  { %1522 = vmatmul.f32.vlgmr.msrb.gmra.mxu1 %v1269_v58  ;;  %1540 = vmatpush.msrb.mxu2 %v1339_v11  ;;  %v1399_v58 = vld [vmem:[#allocation6 + $0x3f8] sm:$0xff]  ;;  %v1574_v11 = vld [vmem:[%s2103_s5 + $0x30] sm:$0xff]  ;;  %v1569_v18 = vld [vmem:[%s2103_s5 + $0x8] sm:$0xff] }
 0x1c5   :  { %1462 = vmatmul.f32.vlgmr.msra.gmra.mxu2 %v1270_v21  ;;  %1481 = vmatpush.msra.mxu3 %v1368_v57  ;;  %v1572_v13 = vld [vmem:[%s2103_s5 + $0x20] sm:$0xff]  ;;  %v1586_v57 = vld [vmem:[%s2103_s5 + $0x90] sm:$0xff] }
 0x1c6   :  { %1541 = vmatpush.msrb.mxu2 %v1337_v15  ;;  %1604 = vmatpush.msra.mxu0 %v1583_v33  ;;  %v1570_v15 = vld [vmem:[%s2103_s5 + $0x10] sm:$0xff] }
 0x1c7   :  { %1546 = vmatpush.msrb.mxu3 %v1399_v58  ;;  %1624 = vmatpush.msra.mxu1 %v1599_v54  ;;  %v1585_v58 = vld [vmem:[%s2103_s5 + $0x88] sm:$0xff] }
 0x1c8   :  { %1605 = vmatpush.msra.mxu0 %v1582_v53 }
 0x1c9   :  { %1547 = vmatpush.msrb.mxu3 %v1397_v17  ;;  %1625 = vmatpush.msra.mxu1 %v1598_v56  ;;  %v1584_v17 = vld [vmem:[%s2103_s5 + $0x80] sm:$0xff] }
 0x1ca   :  { %1606 = vmatpush.msra.mxu0 %v1581_v55 }
 0x1cb   :  { %1548 = vmatpush.msrb.mxu3 %v1395_v22  ;;  %1626 = vmatpush.msra.mxu1 %v1597_v59  ;;  %v1400_v22 = vld [vmem:[#allocation7] sm:$0x3] }
 0x1cc   :  { %1607 = vmatpush.msra.mxu0 %v1580_v51 }
 0x1cd   :  { %1542 = vmatmul.f32.vlgmr.msrb.gmra.mxu2 %v1270_v21  ;;  %1549 = vmatpush.msrb.mxu3 %v1393_v27  ;;  %v1568_v21 = vld [vmem:[%s2103_s5] sm:$0xff]  ;;  %v1402_v27 = vperm.slane %v1400_v22, 0 }
 0x1ce   :  { %1627 = vmatpush.msra.mxu1 %v1596_v60  ;;  %1608 = vmatpush.msra.mxu0 %v1579_v61 }
 0x1cf   :  { %1550 = vmatpush.msrb.mxu3 %v1391_v1 }
 0x1d0   :  { %1628 = vmatpush.msra.mxu1 %v1595_v62  ;;  %1609 = vmatpush.msra.mxu0 %v1578_v2 }
 0x1d1   :  { %1551 = vmatpush.msrb.mxu3 %v1389_v28 }
 0x1d2   :  { %1629 = vmatpush.msra.mxu1 %v1594_v3  ;;  %1610 = vmatpush.msra.mxu0 %v1577_v4 }
 0x1d3   :  { %1552 = vmatpush.msrb.mxu3 %v1387_v32 }
 0x1d4   :  { %1630 = vmatpush.msra.mxu1 %v1593_v5  ;;  %1611 = vmatpush.msra.mxu0 %v1576_v6 }
 0x1d5   :  { %1553 = vmatpush.msrb.mxu3 %v1385_v63 }
 0x1d6   :  { %1631 = vmatpush.msra.mxu1 %v1592_v8  ;;  %1612 = vmatpush.msra.mxu0 %v1575_v9 }
 0x1d7   :  { %1554 = vmatpush.msrb.mxu3 %v1383_v7 }
 0x1d8   :  { %1632 = vmatpush.msra.mxu1 %v1591_v10  ;;  %1613 = vmatpush.msra.mxu0 %v1574_v11 }
 0x1d9   :  { %1555 = vmatpush.msrb.mxu3 %v1381_v34  ;;  %v1403_v34 = vperm.slane %v1400_v22, 1 }
 0x1da   :  { %1614 = vmatpush.msra.mxu0 %v1573_v12  ;;  %1633 = vmatpush.msra.mxu1 %v1590_v16 }
 0x1db   :  { %1556 = vmatpush.msrb.mxu3 %v1379_v29 }
 0x1dc   :  { %1615 = vmatpush.msra.mxu0 %v1572_v13  ;;  %1634 = vmatpush.msra.mxu1 %v1589_v20 }
 0x1dd   :  { %1557 = vmatpush.msrb.mxu3 %v1377_v35 }
 0x1de   :  { %1616 = vmatpush.msra.mxu0 %v1571_v14  ;;  %1635 = vmatpush.msra.mxu1 %v1588_v30 }
 0x1df   :  { %1558 = vmatpush.msrb.mxu3 %v1375_v36 }
 0x1e0   :  { %1617 = vmatpush.msra.mxu0 %v1570_v15  ;;  %1636 = vmatpush.msra.mxu1 %v1587_v52 }
 0x1e1   :  { %1559 = vmatpush.msrb.mxu3 %v1373_v37 }
 0x1e2   :  { %1618 = vmatpush.msra.mxu0 %v1569_v18  ;;  %1637 = vmatpush.msra.mxu1 %v1586_v57 }
 0x1e3   :  { %1560 = vmatpush.msrb.mxu3 %v1371_v38 }
 0x1e4   :  { %1619 = vmatpush.msra.mxu0 %v1568_v21  ;;  %1638 = vmatpush.msra.mxu1 %v1585_v58 }
 0x1e5   :  { %1561 = vmatpush.msrb.mxu3 %v1369_v39 }
 0x1e6   :  { %1639 = vmatpush.msra.mxu1 %v1584_v17 }
 0x1f3   :  { %v1125_v41 = vpop.f32.mrf.mxu0  ;;  %v1145_v26 = vpop.f32.mrf.mxu1 }
 0x1f4   :  { %v1126_v42 = vadd.f32 %v1125_v41, %v623_v40 }
 0x1f6   :  { %v1146_v43 = vadd.f32 %v1145_v26, %v1126_v42  ;;  %v1165_v23 = vpop.f32.mrf.mxu2 }
 0x1f8   :  { %v1166_v19 = vadd.f32 %v1165_v23, %v1146_v43 }
 0x1fd   :  { %v1185_v45 = vpop.f32.mrf.mxu3  ;;  %v1205_v47 = vpop.f32.mrf.mxu0 }
 0x1fe   :  { %v1186_v46 = vadd.f32 %v1185_v45, %v1166_v19  ;;  %v1225_v25 = vpop.f32.mrf.mxu1  ;;  %v1662_v45 = vld [vmem:[#allocation9] ss:$0 sm:$0xff] }
 0x200   :  { %v1206_v24 = vadd.f32 %v1205_v47, %v1186_v46 }
 0x202   :  { %v1226_v0 = vadd.f32 %v1225_v25, %v1206_v24 }
 0x205   :  { %v1245_v48 = vpop.f32.mrf.mxu2 }
 0x206   :  { %v1246_v49 = vadd.f32 %v1245_v48, %v1226_v0 }
 0x20a   :  { %v1265_v50 = vpop.f32.mrf.mxu3 }
 0x20b   :  { %v1266_v31 = vadd.f32 %v1265_v50, %v1246_v49 }
 0x20d   :  { %v1271_v44 = vmax.f32 %v1266_v31, 0.0 }
 0x20f   :  { %1482 = vmatmul.f32.vlgmr.msra.gmra.mxu3 %v1271_v44 }
 0x217   :  { %1562 = vmatmul.f32.vlgmr.msrb.gmra.mxu3 %v1271_v44 }
 0x220   :  { %v1423_v1 = vpop.f32.mrf.mxu0 }
 0x221   :  { %v1424_v28 = vadd.f32 %v1423_v1, %v1402_v27  ;;  %v1443_v63 = vpop.f32.mrf.mxu1 }
 0x223   :  { %v1444_v7 = vadd.f32 %v1443_v63, %v1424_v28 }
 0x240   :  { %v1503_v29 = vpop.f32.mrf.mxu0 }
 0x241   :  { %v1504_v37 = vadd.f32 %v1503_v29, %v1403_v34  ;;  %v1523_v40 = vpop.f32.mrf.mxu1 }
 0x243   :  { %v1524_v42 = vadd.f32 %v1523_v40, %v1504_v37 }
 0x248   :  { %v1463_v32 = vpop.f32.mrf.mxu2 }
 0x249   :  { %v1464_v35 = vadd.f32 %v1463_v32, %v1444_v7 }
 0x250   :  { %v1543_v41 = vpop.f32.mrf.mxu2 }
 0x251   :  { %v1544_v26 = vadd.f32 %v1543_v41, %v1524_v42 }
 0x292   :  { %v1483_v36 = vpop.f32.mrf.mxu3 }
 0x293   :  { %v1484_v38 = vadd.f32 %v1483_v36, %v1464_v35 }
 0x295   :  { %v1566_v39 = vmax.f32 %v1484_v38, 0.0 }
 0x297   :  { %1620 = vmatmul.f32.vlgmr.msra.gmra.mxu0 %v1566_v39 }
 0x29a   :  { %v1563_v43 = vpop.f32.mrf.mxu3 }
 0x29b   :  { %v1564_v23 = vadd.f32 %v1563_v43, %v1544_v26 }
 0x29d   :  { %v1567_v19 = vmax.f32 %v1564_v23, 0.0 }
 0x29f   :  { %1640 = vmatmul.f32.vlgmr.msra.gmra.mxu1 %v1567_v19 }
 0x314   :  { %v1621_v46 = vpop.f32.mrf.mxu0 }
 0x315   :  { %v1622_v47 = vadd.f32 %v1662_v45, %v1621_v46 }
 0x31c   :  { %v1641_v24 = vpop.f32.mrf.mxu1 }
 0x31d   :  { %v1642_v25 = vadd.f32 %v1641_v24, %v1622_v47 }
 0x31f   :  { %1645 = vst.msk [vmem:[%s2105_s7] sm:$0xff] %vm1644_vm0, %v1642_v25 }
 0x320   :  { %1650 = vsyncpa [#allocation3], 1 }
 0x321   :  { %1651 = vsyncpa [#allocation5], 1 }
 0x322   :  { %1652 = vsyncpa [#allocation8], 1 }

</bundles_post_ra>
